<compile_context>
chip_gen: v7x
topology: tpu7x:2x2x1
jax: 0.10.0
libtpu: 0.0.40
codegen_flags: <defaults>
</compile_context>

<pallas_src>
import functools

import jax
import jax.numpy as jnp
from jax.experimental import pallas as pl
from jax.experimental.pallas import tpu as pltpu


WIDTH = 8
LAYER_CFG = ((WIDTH, 1), (2 * WIDTH, 2), (4 * WIDTH, 2), (8 * WIDTH, 2))
_VMEM_LIMIT = 48 * 1024 * 1024
_BN_EPS = 1e-5


# ----------------------------------------------------------------------------
# small helpers
# ----------------------------------------------------------------------------
def _row_tile(m, cap=1024):
    """Row tile: full dim if it fits the cap, else a multiple-of-8 divisor."""
    if m <= cap:
        return m
    t = cap - cap % 8
    while t >= 8:
        if m % t == 0:
            return t
        t -= 8
    return m  # TODO(synk): non power-of-two row counts fall back to a full block.


def _tap_stack(x, kh, kw, stride, pad, pad_value):
    """(N,H,W,C) -> (kh*nph, N*OH, Wph, C): row-taps x W-phases (stride folded in glue)."""
    N, H, W, C = x.shape
    if pad:
        x = jnp.pad(x, ((0, 0), (pad, pad), (pad, pad), (0, 0)),
                    constant_values=pad_value)
    Hp, Wp = H + 2 * pad, W + 2 * pad
    OH = (Hp - kh) // stride + 1
    OW = (Wp - kw) // stride + 1
    nph = min(stride, kw)
    Wph = OW + (kw - 1) // stride
    taps = []
    for i in range(kh):
        rows = x[:, i:i + stride * (OH - 1) + 1:stride, :, :]          # (N,OH,Wp,C)
        for p in range(nph):
            cols = rows[:, :, p:p + stride * (Wph - 1) + 1:stride, :]
            short = Wph - cols.shape[2]
            if short > 0:  # padded columns are never read by a valid tap
                cols = jnp.pad(cols, ((0, 0), (0, 0), (0, short), (0, 0)),
                               constant_values=pad_value)
            taps.append(cols.reshape(N * OH, Wph, C))
    return jnp.stack(taps, axis=0), OH, OW, nph, Wph


def _pixel_tap_stack(x, kh, kw, stride, pad):
    """(N,H,W,C) -> (kh*kw, N*OH*OW, C): fully-subsampled tap stack (tiny layers / 1x1)."""
    N, H, W, C = x.shape
    if pad:
        x = jnp.pad(x, ((0, 0), (pad, pad), (pad, pad), (0, 0)))
    Hp, Wp = H + 2 * pad, W + 2 * pad
    OH = (Hp - kh) // stride + 1
    OW = (Wp - kw) // stride + 1
    taps = []
    for i in range(kh):
        for j in range(kw):
            t = x[:, i:i + stride * (OH - 1) + 1:stride,
                  j:j + stride * (OW - 1) + 1:stride, :]
            taps.append(t.reshape(N * OH * OW, C))
    return jnp.stack(taps, axis=0), OH, OW


# ----------------------------------------------------------------------------
# Pallas kernels
# ----------------------------------------------------------------------------
def _conv_row_kernel(x_ref, w_ref, o_ref, sum_ref, ssq_ref, acc_ref, *,
                     kw, stride, ow):
    """Direct conv: grid = (row tiles, kh row-taps); kw column taps done in VMEM."""
    t = pl.program_id(1)

    @pl.when(t == 0)
    def _init():
        acc_ref[...] = jnp.zeros_like(acc_ref)

    nph = x_ref.shape[0]
    tm = x_ref.shape[1]
    cin = x_ref.shape[3]
    wv = w_ref[0]                                   # (kw, cin, cout) bf16
    phases = [x_ref[p] for p in range(nph)]         # each (tm, Wph, cin) bf16
    for j in range(kw):
        p, off = j % stride, j // stride
        xs = phases[p][:, off:off + ow, :].reshape(tm * ow, cin)
        acc_ref[...] += jnp.dot(xs, wv[j], preferred_element_type=jnp.float32)

    @pl.when(t == pl.num_programs(1) - 1)
    def _fin():
        acc = acc_ref[...]
        o_ref[...] = acc
        sum_ref[...] = jnp.sum(acc, axis=0, keepdims=True)[None]
        ssq_ref[...] = jnp.sum(acc * acc, axis=0, keepdims=True)[None]


def _conv_pix_kernel(x_ref, w_ref, o_ref, sum_ref, ssq_ref, acc_ref):
    """Direct conv over a full (kh*kw) tap stack: grid = (row tiles, taps)."""
    t = pl.program_id(1)

    @pl.when(t == 0)
    def _init():
        acc_ref[...] = jnp.zeros_like(acc_ref)

    acc_ref[...] += jnp.dot(x_ref[0], w_ref[0], preferred_element_type=jnp.float32)

    @pl.when(t == pl.num_programs(1) - 1)
    def _fin():
        acc = acc_ref[...]
        o_ref[...] = acc
        sum_ref[...] = jnp.sum(acc, axis=0, keepdims=True)[None]
        ssq_ref[...] = jnp.sum(acc * acc, axis=0, keepdims=True)[None]


def _maxpool_kernel(x_ref, o_ref, acc_ref, *, kw, stride, ow):
    t = pl.program_id(1)

    @pl.when(t == 0)
    def _init():
        acc_ref[...] = jnp.full(acc_ref.shape, -jnp.inf, acc_ref.dtype)

    nph = x_ref.shape[0]
    phases = [x_ref[p] for p in range(nph)]
    for j in range(kw):
        p, off = j % stride, j // stride
        acc_ref[...] = jnp.maximum(acc_ref[...], phases[p][:, off:off + ow, :])

    @pl.when(t == pl.num_programs(1) - 1)
    def _fin():
        o_ref[...] = acc_ref[...]


def _bn_act_kernel(*refs, relu, has_res):
    if has_res:
        y_ref, sc_ref, sh_ref, r_ref, o_ref = refs
    else:
        y_ref, sc_ref, sh_ref, o_ref = refs
        r_ref = None
    v = y_ref[...] * sc_ref[...] + sh_ref[...]
    if has_res:
        v = v + r_ref[...]
    if relu:
        v = jnp.maximum(v, 0.0)
    o_ref[...] = v


def _meanpool_kernel(x_ref, o_ref):
    o_ref[...] = jnp.mean(x_ref[...], axis=1)


def _linear_kernel(x_ref, w_ref, b_ref, o_ref, *, pair_sigmoid, num_pairs):
    z = jnp.dot(x_ref[...], w_ref[...], preferred_element_type=jnp.float32) + b_ref[...]
    if pair_sigmoid:
        # per-class 2-way softmax: prob of channel 1 == sigmoid(z1 - z0)
        d = z[:, num_pairs:2 * num_pairs] - z[:, :num_pairs]
        z = 1.0 / (1.0 + jnp.exp(-d))
    o_ref[...] = z


def _lse_kernel(x_ref, o_ref):
    # log-mean-exp over the last (slice / z) axis
    x = x_ref[...]
    m = jnp.max(x, axis=-1, keepdims=True)
    o_ref[...] = m + jnp.log(jnp.mean(jnp.exp(x - m), axis=-1, keepdims=True))


# ----------------------------------------------------------------------------
# Conv / BN / pool wrappers
# ----------------------------------------------------------------------------
def _conv2d_row(x, w, stride, pad):
    kh, kw, cin, cout = w.shape
    N = x.shape[0]
    xt, OH, OW, nph, Wph = _tap_stack(x.astype(jnp.bfloat16), kh, kw, stride, pad, 0.0)
    M = N * OH
    TM = _row_tile(M, max(8, 4096 // OW))
    nt = M // TM
    kernel = functools.partial(_conv_row_kernel, kw=kw, stride=stride, ow=OW)
    out_shape = (jax.ShapeDtypeStruct((M * OW, cout), jnp.float32),
                 jax.ShapeDtypeStruct((nt, 1, cout), jnp.float32),
                 jax.ShapeDtypeStruct((nt, 1, cout), jnp.float32))
    y, s, q = pl.pallas_call(
        kernel,
        out_shape=out_shape,
        grid_spec=pltpu.PrefetchScalarGridSpec(
            num_scalar_prefetch=0,
            grid=(nt, kh),
            in_specs=[
                pl.BlockSpec((nph, TM, Wph, cin), lambda m, t: (t, m, 0, 0)),
                pl.BlockSpec((1, kw, cin, cout), lambda m, t: (t, 0, 0, 0)),
            ],
            out_specs=(
                pl.BlockSpec((TM * OW, cout), lambda m, t: (m, 0)),
                pl.BlockSpec((1, 1, cout), lambda m, t: (m, 0, 0)),
                pl.BlockSpec((1, 1, cout), lambda m, t: (m, 0, 0)),
            ),
            scratch_shapes=[pltpu.VMEM((TM * OW, cout), jnp.float32)],
        ),
        compiler_params=pltpu.CompilerParams(
            dimension_semantics=("parallel", "arbitrary"),
            vmem_limit_bytes=_VMEM_LIMIT),
    )(xt, w.astype(jnp.bfloat16))
    return y, s, q, OH, OW


def _conv2d_pix(x, w, stride, pad):
    kh, kw, cin, cout = w.shape
    N = x.shape[0]
    xt, OH, OW = _pixel_tap_stack(x.astype(jnp.bfloat16), kh, kw, stride, pad)
    M = N * OH * OW
    TM = _row_tile(M, 1024)
    nt = M // TM
    ntap = kh * kw
    out_shape = (jax.ShapeDtypeStruct((M, cout), jnp.float32),
                 jax.ShapeDtypeStruct((nt, 1, cout), jnp.float32),
                 jax.ShapeDtypeStruct((nt, 1, cout), jnp.float32))
    y, s, q = pl.pallas_call(
        _conv_pix_kernel,
        out_shape=out_shape,
        grid_spec=pltpu.PrefetchScalarGridSpec(
            num_scalar_prefetch=0,
            grid=(nt, ntap),
            in_specs=[
                pl.BlockSpec((1, TM, cin), lambda m, t: (t, m, 0)),
                pl.BlockSpec((1, cin, cout), lambda m, t: (t, 0, 0)),
            ],
            out_specs=(
                pl.BlockSpec((TM, cout), lambda m, t: (m, 0)),
                pl.BlockSpec((1, 1, cout), lambda m, t: (m, 0, 0)),
                pl.BlockSpec((1, 1, cout), lambda m, t: (m, 0, 0)),
            ),
            scratch_shapes=[pltpu.VMEM((TM, cout), jnp.float32)],
        ),
        compiler_params=pltpu.CompilerParams(
            dimension_semantics=("parallel", "arbitrary"),
            vmem_limit_bytes=_VMEM_LIMIT),
    )(xt, w.reshape(ntap, cin, cout).astype(jnp.bfloat16))
    return y, s, q, OH, OW


_ROW_CONV_OK = [None]


def _row_conv_supported():
    """Compile/run a tiny row-tap conv once; fall back to the pixel path if it fails."""
    if _ROW_CONV_OK[0] is None:
        try:
            x = jnp.zeros((1, 16, 16, 8), jnp.float32)
            w = jnp.zeros((3, 3, 8, 8), jnp.float32)
            jax.block_until_ready(_conv2d_row(x, w, 1, 1)[0])
            _ROW_CONV_OK[0] = True
        except Exception:
            _ROW_CONV_OK[0] = False
    return _ROW_CONV_OK[0]


def _conv2d(x, w, stride, pad):
    kh, kw, _, _ = w.shape
    _, _, W, _ = x.shape
    OW = (W + 2 * pad - kw) // stride + 1
    # Row-tap kernel needs OW aligned to the bf16 sublane packing for the
    # in-kernel (TM, OW, Cin) -> (TM*OW, Cin) collapse to stay layout-free.
    if kh * kw > 1 and OW % 16 == 0 and _row_conv_supported():
        return _conv2d_row(x, w, stride, pad)
    return _conv2d_pix(x, w, stride, pad)


def _bn_act_call(y, scale_row, shift_row, res, relu):
    m, c = y.shape
    TR = _row_tile(m, 1024)
    nt = m // TR
    has_res = res is not None
    kernel = functools.partial(_bn_act_kernel, relu=relu, has_res=has_res)
    in_specs = [pl.BlockSpec((TR, c), lambda i: (i, 0)),
                pl.BlockSpec((1, c), lambda i: (0, 0)),
                pl.BlockSpec((1, c), lambda i: (0, 0))]
    args = [y, scale_row, shift_row]
    if has_res:
        in_specs.append(pl.BlockSpec((TR, c), lambda i: (i, 0)))
        args.append(res)
    return pl.pallas_call(
        kernel,
        out_shape=jax.ShapeDtypeStruct((m, c), jnp.float32),
        grid_spec=pltpu.PrefetchScalarGridSpec(
            num_scalar_prefetch=0,
            grid=(nt,),
            in_specs=in_specs,
            out_specs=pl.BlockSpec((TR, c), lambda i: (i, 0)),
        ),
        compiler_params=pltpu.CompilerParams(
            dimension_semantics=("parallel",),
            vmem_limit_bytes=_VMEM_LIMIT),
    )(*args)


def bn_act(y, scale, shift, residual=None, relu=True):
    """Train-mode BN affine (precomputed scale/shift) + optional residual + ReLU."""
    m, c = y.shape
    if c <= 128 and 128 % c == 0 and (m * c) % 128 == 0:
        # lane-dense layout: (rows, 128) with the per-channel scale tiled across lanes
        rep = 128 // c
        rows = m * c // 128
        sc = jnp.tile(scale.reshape(1, c), (1, rep)).astype(jnp.float32)
        sh = jnp.tile(shift.reshape(1, c), (1, rep)).astype(jnp.float32)
        r2 = None if residual is None else residual.reshape(rows, 128)
        out = _bn_act_call(y.reshape(rows, 128), sc, sh, r2, relu)
        return out.reshape(m, c)
    sc = scale.reshape(1, c).astype(jnp.float32)
    sh = shift.reshape(1, c).astype(jnp.float32)
    return _bn_act_call(y, sc, sh, residual, relu)


def conv_bn(x, w, gamma, beta, stride, pad, relu=True, residual=None):
    """Conv (no bias) + train-mode BatchNorm (+ residual) (+ ReLU). NHWC in/out."""
    _, _, _, cout = w.shape
    N = x.shape[0]
    y, sums, ssqs, OH, OW = _conv2d(x, w, stride, pad)     # y: (N*OH*OW, cout) f32
    m_tot = N * OH * OW
    mean = jnp.sum(sums, axis=(0, 1)) / m_tot
    var = jnp.maximum(jnp.sum(ssqs, axis=(0, 1)) / m_tot - mean * mean, 0.0)
    scale = gamma * jax.lax.rsqrt(var + _BN_EPS)
    shift = beta - mean * scale
    res = None if residual is None else residual.reshape(m_tot, cout)
    out = bn_act(y, scale, shift, residual=res, relu=relu)
    return out.reshape(N, OH, OW, cout)


def maxpool2d(x, k=3, stride=2, pad=1):
    N, H, W, C = x.shape
    xt, OH, OW, nph, Wph = _tap_stack(x, k, k, stride, pad, -jnp.inf)
    M = N * OH
    TM = _row_tile(M, max(8, 2048 // OW))
    nt = M // TM
    kernel = functools.partial(_maxpool_kernel, kw=k, stride=stride, ow=OW)
    y = pl.pallas_call(
        kernel,
        out_shape=jax.ShapeDtypeStruct((M, OW, C), jnp.float32),
        grid_spec=pltpu.PrefetchScalarGridSpec(
            num_scalar_prefetch=0,
            grid=(nt, k),
            in_specs=[pl.BlockSpec((nph, TM, Wph, C), lambda m, t: (t, m, 0, 0))],
            out_specs=pl.BlockSpec((TM, OW, C), lambda m, t: (m, 0, 0)),
            scratch_shapes=[pltpu.VMEM((TM, OW, C), jnp.float32)],
        ),
        compiler_params=pltpu.CompilerParams(
            dimension_semantics=("parallel", "arbitrary"),
            vmem_limit_bytes=_VMEM_LIMIT),
    )(xt)
    return y.reshape(N, OH, OW, C)


def spatial_mean(x3):
    n, hw, feat = x3.shape
    TB = _row_tile(n, 256)
    nt = n // TB
    return pl.pallas_call(
        _meanpool_kernel,
        out_shape=jax.ShapeDtypeStruct((n, feat), jnp.float32),
        grid_spec=pltpu.PrefetchScalarGridSpec(
            num_scalar_prefetch=0,
            grid=(nt,),
            in_specs=[pl.BlockSpec((TB, hw, feat), lambda i: (i, 0, 0))],
            out_specs=pl.BlockSpec((TB, feat), lambda i: (i, 0)),
        ),
        compiler_params=pltpu.CompilerParams(dimension_semantics=("parallel",)),
    )(x3)


def pallas_linear(x, w, b, pair_sigmoid=False, num_pairs=0):
    m, k = x.shape
    n_out = w.shape[1]
    TM = _row_tile(m, 512)
    nt = m // TM
    out_cols = num_pairs if pair_sigmoid else n_out
    kernel = functools.partial(_linear_kernel, pair_sigmoid=pair_sigmoid,
                               num_pairs=num_pairs)
    return pl.pallas_call(
        kernel,
        out_shape=jax.ShapeDtypeStruct((m, out_cols), jnp.float32),
        grid_spec=pltpu.PrefetchScalarGridSpec(
            num_scalar_prefetch=0,
            grid=(nt,),
            in_specs=[pl.BlockSpec((TM, k), lambda i: (i, 0)),
                      pl.BlockSpec((k, n_out), lambda i: (0, 0)),
                      pl.BlockSpec((1, n_out), lambda i: (0, 0))],
            out_specs=pl.BlockSpec((TM, out_cols), lambda i: (i, 0)),
        ),
        compiler_params=pltpu.CompilerParams(dimension_semantics=("parallel",)),
    )(x.astype(jnp.bfloat16), w.astype(jnp.bfloat16),
      b.reshape(1, n_out).astype(jnp.float32))


def lse_pool(x):
    r, z = x.shape
    return pl.pallas_call(
        _lse_kernel,
        out_shape=jax.ShapeDtypeStruct((r, 1), jnp.float32),
        grid_spec=pltpu.PrefetchScalarGridSpec(
            num_scalar_prefetch=0,
            grid=(1,),
            in_specs=[pl.BlockSpec((r, z), lambda i: (0, 0))],
            out_specs=pl.BlockSpec((r, 1), lambda i: (0, 0)),
        ),
    )(x)


# ----------------------------------------------------------------------------
# Model: parameters + forward
# ----------------------------------------------------------------------------
def _conv_init(key, kh, kw, cin, cout):
    std = (2.0 / (kh * kw * cin)) ** 0.5
    return std * jax.random.normal(key, (kh, kw, cin, cout), jnp.float32)


def init_params(key, in_ch=3, num_classes=2):
    keys = iter(jax.random.split(key, 64))
    params = {'stem': {
        'w': _conv_init(next(keys), 7, 7, in_ch, WIDTH),
        'g': 1.0 + 0.1 * jax.random.normal(next(keys), (WIDTH,), jnp.float32),
        'b': 0.1 * jax.random.normal(next(keys), (WIDTH,), jnp.float32),
    }}
    layers = []
    cin = WIDTH
    for cout, stride in LAYER_CFG:
        blk = {
            'w1': _conv_init(next(keys), 3, 3, cin, cout),
            'g1': 1.0 + 0.1 * jax.random.normal(next(keys), (cout,), jnp.float32),
            'b1': 0.1 * jax.random.normal(next(keys), (cout,), jnp.float32),
            'w2': _conv_init(next(keys), 3, 3, cout, cout),
            'g2': 1.0 + 0.1 * jax.random.normal(next(keys), (cout,), jnp.float32),
            'b2': 0.1 * jax.random.normal(next(keys), (cout,), jnp.float32),
        }
        if stride != 1 or cin != cout:
            blk['wd'] = _conv_init(next(keys), 1, 1, cin, cout)
            blk['gd'] = 1.0 + 0.1 * jax.random.normal(next(keys), (cout,), jnp.float32)
            blk['bd'] = 0.1 * jax.random.normal(next(keys), (cout,), jnp.float32)
        layers.append(blk)
        cin = cout
    params['layers'] = layers
    feat = 8 * WIDTH
    params['ms_w'] = (feat ** -0.5) * jax.random.normal(next(keys), (feat, 2 * num_classes), jnp.float32)
    params['ms_b'] = 0.01 * jax.random.normal(next(keys), (2 * num_classes,), jnp.float32)
    params['mc_w'] = (feat ** -0.5) * jax.random.normal(next(keys), (feat, 2 * num_classes), jnp.float32)
    params['mc_b'] = 0.01 * jax.random.normal(next(keys), (2 * num_classes,), jnp.float32)
    return params


def basic_block(x, p, stride):
    cin = x.shape[-1]
    cout = p['w1'].shape[-1]
    identity = x
    out = conv_bn(x, p['w1'], p['g1'], p['b1'], stride=stride, pad=1, relu=True)
    if stride != 1 or cin != cout:
        identity = conv_bn(x, p['wd'], p['gd'], p['bd'], stride=stride, pad=0,
                           relu=False)
    # conv2 -> BN -> (+identity) -> ReLU, residual add fused in the BN kernel
    out = conv_bn(out, p['w2'], p['g2'], p['b2'], stride=1, pad=1, relu=True,
                  residual=identity)
    return out


def fusion_resnet_forward(params, x, *, img_size, num_classes):
    B, C, Z, H, W = x.shape
    # x.transpose(1, 2).contiguous().view(-1, C, H, W)   (kept NHWC here)
    xn = jnp.transpose(x, (0, 2, 3, 4, 1)).reshape(B * Z, H, W, C)

    # --- backbone (ftrs): stem + maxpool + 4 basic blocks -----------------
    y = conv_bn(xn, params['stem']['w'], params['stem']['g'], params['stem']['b'],
                stride=2, pad=3, relu=True)
    y = maxpool2d(y)
    for blk, (_, stride) in zip(params['layers'], LAYER_CFG):
        y = basic_block(y, blk, stride)
    ftrs = y                                          # (B*Z, h, w, F)
    n_sl, h, w_sp, feat = ftrs.shape

    # --- 'avg' pooling over spatial dims ----------------------------------
    pooled = spatial_mean(ftrs.reshape(n_sl, h * w_sp, feat))       # (B*Z, F)

    # --- MultiSoftmax heads -------------------------------------------------
    # TODO(synk): MultiSoftmax source not provided; implemented as per-class Linear(F, 2).
    head_logits = pallas_linear(pooled, params['ms_w'], params['ms_b'])   # (B*Z, 2*nc)
    slice_output = []
    for i in range(num_classes):
        li = head_logits[:, 2 * i:2 * i + 2].reshape(B, Z, 2)
        slice_output.append(jnp.transpose(li, (0, 2, 1)))                 # (B, 2, Z)

    # --- attn_mode == 'lse' slice pooling ----------------------------------
    # TODO(synk): lse_pooling source not provided; implemented as log-mean-exp over Z.
    stacked = jnp.stack(slice_output, 0).reshape(num_classes * B * 2, Z)
    lse = lse_pool(stacked)
    img_output = list(lse.reshape(num_classes, B, 2))

    # --- pixel output: MultiConv1x1 + fused 2-way softmax -------------------
    # TODO(synk): MultiConv1x1 source not provided; implemented as per-class 1x1 conv F->2.
    w_re = jnp.concatenate([params['mc_w'][:, 0::2], params['mc_w'][:, 1::2]], axis=1)
    b_re = jnp.concatenate([params['mc_b'][0::2], params['mc_b'][1::2]], axis=0)
    probs = pallas_linear(ftrs.reshape(n_sl * h * w_sp, feat), w_re, b_re,
                          pair_sigmoid=True, num_pairs=num_classes)       # (rows, nc)
    probs = probs.reshape(B, Z, h, w_sp, num_classes)
    pixel_output = []
    for i in range(num_classes):
        vol = probs[0, :, :, :, i]                                        # (Z, h, w)
        # TODO(synk): trilinear resize (align_corners=False) done with jax.image.resize;
        # gather-based interpolation has no clean Pallas equivalent.
        vol = jax.image.resize(vol, tuple(img_size), method='trilinear',
                               antialias=False)
        pixel_output.append(vol)
    pixel_output = jnp.stack(pixel_output, 0)

    return img_output[0], slice_output[0], pixel_output


# ----------------------------------------------------------------------------
if __name__ == "__main__":
    key = jax.random.PRNGKey(0)
    pkey, xkey = jax.random.split(key)

    num_classes = 2
    img_size = (8, 16, 16)                 # small stand-in for [60, 224, 224]
    params = init_params(pkey, in_ch=3, num_classes=num_classes)

    # Probe the row-tap conv path once (eager) before jitting the forward.
    _row_conv_supported()

    # (batch, channels, z, H, W)
    x = jax.random.normal(xkey, (2, 3, 4, 64, 64), jnp.float32)

    fwd = jax.jit(functools.partial(fusion_resnet_forward,
                                    img_size=img_size,
                                    num_classes=num_classes))
    img_out, slice_out, pixel_out = fwd(params, x)
    jax.block_until_ready((img_out, slice_out, pixel_out))

    assert img_out.shape == (2, 2)
    assert slice_out.shape == (2, 2, 4)
    assert pixel_out.shape == (num_classes,) + img_size
    print("KERNEL_OK")
</pallas_src>

<mosaic_0001>
module attributes {stable_mosaic.version = 11 : i64} {
  func.func @_conv_row_kernel(%arg0: i32, %arg1: i32, %arg2: memref<1x16x18x8xbf16, #tpu.memory_space<vmem>>, %arg3: memref<1x3x8x8xbf16, #tpu.memory_space<vmem>>, %arg4: memref<256x8xf32, #tpu.memory_space<vmem>>, %arg5: memref<1x1x8xf32, #tpu.memory_space<vmem>>, %arg6: memref<1x1x8xf32, #tpu.memory_space<vmem>>, %arg7: memref<256x8xf32, #tpu.memory_space<vmem>>) attributes {dimension_semantics = [#tpu.dimension_semantics<parallel>, #tpu.dimension_semantics<arbitrary>], iteration_bounds = array<i64: 1, 3>, scalar_prefetch = 0 : i64, scratch_operands = 1 : i64, tpu.core_type = #tpu.core_type<tc>, window_params = [{transform_indices = @transform_0, window_bounds = array<i64: 1, 16, 18, 8>}, {transform_indices = @transform_1, window_bounds = array<i64: 1, 3, 8, 8>}, {transform_indices = @transform_2, window_bounds = array<i64: 256, 8>}, {transform_indices = @transform_3, window_bounds = array<i64: 1, 1, 8>}, {transform_indices = @transform_4, window_bounds = array<i64: 1, 1, 8>}]} {
    %c0_i32 = arith.constant 0 : i32
    %0 = arith.cmpi eq, %arg1, %c0_i32 : i32
    %1 = arith.extui %0 : i1 to i32
    %c0_i32_0 = arith.constant 0 : i32
    %2 = arith.cmpi ne, %1, %c0_i32_0 : i32
    scf.if %2 {
      %cst_23 = arith.constant 0.000000e+00 : f32
      %34 = vector.broadcast %cst_23 : f32 to vector<256x8xf32>
      %c0_24 = arith.constant 0 : index
      %c0_25 = arith.constant 0 : index
      %35 = vector.load %arg7[%c0_24, %c0_25] : memref<256x8xf32, #tpu.memory_space<vmem>>, vector<256x8xf32>
      tpu.vector_store %arg7[%c0_24, %c0_25], %34 {strides = array<i32>} : memref<256x8xf32, #tpu.memory_space<vmem>>, vector<256x8xf32>,
    } else {
    }
    %c0 = arith.constant 0 : index
    %c0_1 = arith.constant 0 : index
    %c0_2 = arith.constant 0 : index
    %c0_3 = arith.constant 0 : index
    %3 = vector.load %arg3[%c0, %c0_1, %c0_2, %c0_3] : memref<1x3x8x8xbf16, #tpu.memory_space<vmem>>, vector<1x3x8x8xbf16>
    %4 = vector.shape_cast %3 : vector<1x3x8x8xbf16> to vector<3x8x8xbf16>
    %c0_4 = arith.constant 0 : index
    %c0_5 = arith.constant 0 : index
    %c0_6 = arith.constant 0 : index
    %c0_7 = arith.constant 0 : index
    %5 = vector.load %arg2[%c0_4, %c0_5, %c0_6, %c0_7] : memref<1x16x18x8xbf16, #tpu.memory_space<vmem>>, vector<1x16x18x8xbf16>
    %6 = vector.shape_cast %5 : vector<1x16x18x8xbf16> to vector<16x18x8xbf16>
    %7 = vector.extract_strided_slice %6 {offsets = [0, 0, 0], sizes = [16, 16, 8], strides = [1, 1, 1]} : vector<16x18x8xbf16> to vector<16x16x8xbf16>
    %8 = vector.shape_cast %7 : vector<16x16x8xbf16> to vector<256x8xbf16>
    %c0_8 = arith.constant 0 : index
    %c0_9 = arith.constant 0 : index
    %9 = vector.load %arg7[%c0_8, %c0_9] : memref<256x8xf32, #tpu.memory_space<vmem>>, vector<256x8xf32>
    %10 = vector.extract_strided_slice %4 {offsets = [0, 0, 0], sizes = [1, 8, 8], strides = [1, 1, 1]} : vector<3x8x8xbf16> to vector<1x8x8xbf16>
    %11 = vector.shape_cast %10 : vector<1x8x8xbf16> to vector<8x8xbf16>
    %cst = arith.constant dense<0.000000e+00> : vector<256x8xf32>
    %12 = tpu.matmul %8, %11, %cst {dimension_numbers = #tpu.dot_dimension_numbers<[1], [0], [0], [1], [0, 0, 1, 1], [], []>} : vector<256x8xbf16>, vector<8x8xbf16>, vector<256x8xf32> -> vector<256x8xf32>
    %13 = arith.addf %9, %12 : vector<256x8xf32>
    %c0_10 = arith.constant 0 : index
    %c0_11 = arith.constant 0 : index
    %14 = vector.load %arg7[%c0_10, %c0_11] : memref<256x8xf32, #tpu.memory_space<vmem>>, vector<256x8xf32>
    tpu.vector_store %arg7[%c0_10, %c0_11], %13 {strides = array<i32>} : memref<256x8xf32, #tpu.memory_space<vmem>>, vector<256x8xf32>,
    %15 = vector.extract_strided_slice %6 {offsets = [0, 1, 0], sizes = [16, 16, 8], strides = [1, 1, 1]} : vector<16x18x8xbf16> to vector<16x16x8xbf16>
    %16 = vector.shape_cast %15 : vector<16x16x8xbf16> to vector<256x8xbf16>
    %c0_12 = arith.constant 0 : index
    %c0_13 = arith.constant 0 : index
    %17 = vector.load %arg7[%c0_12, %c0_13] : memref<256x8xf32, #tpu.memory_space<vmem>>, vector<256x8xf32>
    %18 = vector.extract_strided_slice %4 {offsets = [1, 0, 0], sizes = [1, 8, 8], strides = [1, 1, 1]} : vector<3x8x8xbf16> to vector<1x8x8xbf16>
    %19 = vector.shape_cast %18 : vector<1x8x8xbf16> to vector<8x8xbf16>
    %cst_14 = arith.constant dense<0.000000e+00> : vector<256x8xf32>
    %20 = tpu.matmul %16, %19, %cst_14 {dimension_numbers = #tpu.dot_dimension_numbers<[1], [0], [0], [1], [0, 0, 1, 1], [], []>} : vector<256x8xbf16>, vector<8x8xbf16>, vector<256x8xf32> -> vector<256x8xf32>
    %21 = arith.addf %17, %20 : vector<256x8xf32>
    %c0_15 = arith.constant 0 : index
    %c0_16 = arith.constant 0 : index
    %22 = vector.load %arg7[%c0_15, %c0_16] : memref<256x8xf32, #tpu.memory_space<vmem>>, vector<256x8xf32>
    tpu.vector_store %arg7[%c0_15, %c0_16], %21 {strides = array<i32>} : memref<256x8xf32, #tpu.memory_space<vmem>>, vector<256x8xf32>,
    %23 = vector.extract_strided_slice %6 {offsets = [0, 2, 0], sizes = [16, 16, 8], strides = [1, 1, 1]} : vector<16x18x8xbf16> to vector<16x16x8xbf16>
    %24 = vector.shape_cast %23 : vector<16x16x8xbf16> to vector<256x8xbf16>
    %c0_17 = arith.constant 0 : index
    %c0_18 = arith.constant 0 : index
    %25 = vector.load %arg7[%c0_17, %c0_18] : memref<256x8xf32, #tpu.memory_space<vmem>>, vector<256x8xf32>
    %26 = vector.extract_strided_slice %4 {offsets = [2, 0, 0], sizes = [1, 8, 8], strides = [1, 1, 1]} : vector<3x8x8xbf16> to vector<1x8x8xbf16>
    %27 = vector.shape_cast %26 : vector<1x8x8xbf16> to vector<8x8xbf16>
    %cst_19 = arith.constant dense<0.000000e+00> : vector<256x8xf32>
    %28 = tpu.matmul %24, %27, %cst_19 {dimension_numbers = #tpu.dot_dimension_numbers<[1], [0], [0], [1], [0, 0, 1, 1], [], []>} : vector<256x8xbf16>, vector<8x8xbf16>, vector<256x8xf32> -> vector<256x8xf32>
    %29 = arith.addf %25, %28 : vector<256x8xf32>
    %c0_20 = arith.constant 0 : index
    %c0_21 = arith.constant 0 : index
    %30 = vector.load %arg7[%c0_20, %c0_21] : memref<256x8xf32, #tpu.memory_space<vmem>>, vector<256x8xf32>
    tpu.vector_store %arg7[%c0_20, %c0_21], %29 {strides = array<i32>} : memref<256x8xf32, #tpu.memory_space<vmem>>, vector<256x8xf32>,
    %c2_i32 = arith.constant 2 : i32
    %31 = arith.cmpi eq, %arg1, %c2_i32 : i32
    %32 = arith.extui %31 : i1 to i32
    %c0_i32_22 = arith.constant 0 : i32
    %33 = arith.cmpi ne, %32, %c0_i32_22 : i32
    scf.if %33 {
      %c0_23 = arith.constant 0 : index
      %c0_24 = arith.constant 0 : index
      %34 = vector.load %arg7[%c0_23, %c0_24] : memref<256x8xf32, #tpu.memory_space<vmem>>, vector<256x8xf32>
      %c0_25 = arith.constant 0 : index
      %c0_26 = arith.constant 0 : index
      %35 = vector.load %arg4[%c0_25, %c0_26] : memref<256x8xf32, #tpu.memory_space<vmem>>, vector<256x8xf32>
      tpu.vector_store %arg4[%c0_25, %c0_26], %34 {strides = array<i32>} : memref<256x8xf32, #tpu.memory_space<vmem>>, vector<256x8xf32>,
      %cst_27 = arith.constant dense<0.000000e+00> : vector<8xf32>
      %36 = vector.multi_reduction <add>, %34, %cst_27 [0] : vector<256x8xf32> to vector<8xf32>
      %37 = vector.shape_cast %36 : vector<8xf32> to vector<1x8xf32>
      %38 = vector.shape_cast %37 : vector<1x8xf32> to vector<1x1x8xf32>
      %c0_28 = arith.constant 0 : index
      %c0_29 = arith.constant 0 : index
      %c0_30 = arith.constant 0 : index
      %39 = vector.load %arg5[%c0_28, %c0_29, %c0_30] : memref<1x1x8xf32, #tpu.memory_space<vmem>>, vector<1x1x8xf32>
      tpu.vector_store %arg5[%c0_28, %c0_29, %c0_30], %38 {strides = array<i32>} : memref<1x1x8xf32, #tpu.memory_space<vmem>>, vector<1x1x8xf32>,
      %40 = arith.mulf %34, %34 : vector<256x8xf32>
      %cst_31 = arith.constant dense<0.000000e+00> : vector<8xf32>
      %41 = vector.multi_reduction <add>, %40, %cst_31 [0] : vector<256x8xf32> to vector<8xf32>
      %42 = vector.shape_cast %41 : vector<8xf32> to vector<1x8xf32>
      %43 = vector.shape_cast %42 : vector<1x8xf32> to vector<1x1x8xf32>
      %c0_32 = arith.constant 0 : index
      %c0_33 = arith.constant 0 : index
      %c0_34 = arith.constant 0 : index
      %44 = vector.load %arg6[%c0_32, %c0_33, %c0_34] : memref<1x1x8xf32, #tpu.memory_space<vmem>>, vector<1x1x8xf32>
      tpu.vector_store %arg6[%c0_32, %c0_33, %c0_34], %43 {strides = array<i32>} : memref<1x1x8xf32, #tpu.memory_space<vmem>>, vector<1x1x8xf32>,
    } else {
    }
    return
  }
  func.func @transform_0(%arg0: i32, %arg1: i32) -> (i32, i32, i32, i32) {
    %c0_i32 = arith.constant 0 : i32
    %c0_i32_0 = arith.constant 0 : i32
    %c0_i32_1 = arith.constant 0 : i32
    return %arg1, %arg0, %c0_i32, %c0_i32_0 : i32, i32, i32, i32
  }
  func.func @transform_1(%arg0: i32, %arg1: i32) -> (i32, i32, i32, i32) {
    %c0_i32 = arith.constant 0 : i32
    %c0_i32_0 = arith.constant 0 : i32
    %c0_i32_1 = arith.constant 0 : i32
    %c0_i32_2 = arith.constant 0 : i32
    return %arg1, %c0_i32, %c0_i32_0, %c0_i32_1 : i32, i32, i32, i32
  }
  func.func @transform_2(%arg0: i32, %arg1: i32) -> (i32, i32) {
    %c0_i32 = arith.constant 0 : i32
    %c0_i32_0 = arith.constant 0 : i32
    return %arg0, %c0_i32 : i32, i32
  }
  func.func @transform_3(%arg0: i32, %arg1: i32) -> (i32, i32, i32) {
    %c0_i32 = arith.constant 0 : i32
    %c0_i32_0 = arith.constant 0 : i32
    %c0_i32_1 = arith.constant 0 : i32
    return %arg0, %c0_i32, %c0_i32_0 : i32, i32, i32
  }
  func.func @transform_4(%arg0: i32, %arg1: i32) -> (i32, i32, i32) {
    %c0_i32 = arith.constant 0 : i32
    %c0_i32_0 = arith.constant 0 : i32
    %c0_i32_1 = arith.constant 0 : i32
    return %arg0, %c0_i32, %c0_i32_0 : i32, i32, i32
  }
}

module attributes {stable_mosaic.version = 11 : i64} {
  func.func @_conv_pix_kernel(%arg0: i32, %arg1: i32, %arg2: memref<1x1024x3xbf16, #tpu.memory_space<vmem>>, %arg3: memref<1x3x8xbf16, #tpu.memory_space<vmem>>, %arg4: memref<1024x8xf32, #tpu.memory_space<vmem>>, %arg5: memref<1x1x8xf32, #tpu.memory_space<vmem>>, %arg6: memref<1x1x8xf32, #tpu.memory_space<vmem>>, %arg7: memref<1024x8xf32, #tpu.memory_space<vmem>>) attributes {dimension_semantics = [#tpu.dimension_semantics<parallel>, #tpu.dimension_semantics<arbitrary>], iteration_bounds = array<i64: 8, 49>, scalar_prefetch = 0 : i64, scratch_operands = 1 : i64, tpu.core_type = #tpu.core_type<tc>, window_params = [{transform_indices = @transform_0, window_bounds = array<i64: 1, 1024, 3>}, {transform_indices = @transform_1, window_bounds = array<i64: 1, 3, 8>}, {transform_indices = @transform_2, window_bounds = array<i64: 1024, 8>}, {transform_indices = @transform_3, window_bounds = array<i64: 1, 1, 8>}, {transform_indices = @transform_4, window_bounds = array<i64: 1, 1, 8>}]} {
    %c0_i32 = arith.constant 0 : i32
    %0 = arith.cmpi eq, %arg1, %c0_i32 : i32
    %1 = arith.extui %0 : i1 to i32
    %c0_i32_0 = arith.constant 0 : i32
    %2 = arith.cmpi ne, %1, %c0_i32_0 : i32
    scf.if %2 {
      %cst_11 = arith.constant 0.000000e+00 : f32
      %14 = vector.broadcast %cst_11 : f32 to vector<1024x8xf32>
      %c0_12 = arith.constant 0 : index
      %c0_13 = arith.constant 0 : index
      %15 = vector.load %arg7[%c0_12, %c0_13] : memref<1024x8xf32, #tpu.memory_space<vmem>>, vector<1024x8xf32>
      tpu.vector_store %arg7[%c0_12, %c0_13], %14 {strides = array<i32>} : memref<1024x8xf32, #tpu.memory_space<vmem>>, vector<1024x8xf32>,
    } else {
    }
    %c0 = arith.constant 0 : index
    %c0_1 = arith.constant 0 : index
    %3 = vector.load %arg7[%c0, %c0_1] : memref<1024x8xf32, #tpu.memory_space<vmem>>, vector<1024x8xf32>
    %c0_2 = arith.constant 0 : index
    %c0_3 = arith.constant 0 : index
    %c0_4 = arith.constant 0 : index
    %4 = vector.load %arg2[%c0_2, %c0_3, %c0_4] : memref<1x1024x3xbf16, #tpu.memory_space<vmem>>, vector<1x1024x3xbf16>
    %5 = vector.shape_cast %4 : vector<1x1024x3xbf16> to vector<1024x3xbf16>
    %c0_5 = arith.constant 0 : index
    %c0_6 = arith.constant 0 : index
    %c0_7 = arith.constant 0 : index
    %6 = vector.load %arg3[%c0_5, %c0_6, %c0_7] : memref<1x3x8xbf16, #tpu.memory_space<vmem>>, vector<1x3x8xbf16>
    %7 = vector.shape_cast %6 : vector<1x3x8xbf16> to vector<3x8xbf16>
    %cst = arith.constant dense<0.000000e+00> : vector<1024x8xf32>
    %8 = tpu.matmul %5, %7, %cst {dimension_numbers = #tpu.dot_dimension_numbers<[1], [0], [0], [1], [0, 0, 1, 1], [], []>} : vector<1024x3xbf16>, vector<3x8xbf16>, vector<1024x8xf32> -> vector<1024x8xf32>
    %9 = arith.addf %3, %8 : vector<1024x8xf32>
    %c0_8 = arith.constant 0 : index
    %c0_9 = arith.constant 0 : index
    %10 = vector.load %arg7[%c0_8, %c0_9] : memref<1024x8xf32, #tpu.memory_space<vmem>>, vector<1024x8xf32>
    tpu.vector_store %arg7[%c0_8, %c0_9], %9 {strides = array<i32>} : memref<1024x8xf32, #tpu.memory_space<vmem>>, vector<1024x8xf32>,
    %c48_i32 = arith.constant 48 : i32
    %11 = arith.cmpi eq, %arg1, %c48_i32 : i32
    %12 = arith.extui %11 : i1 to i32
    %c0_i32_10 = arith.constant 0 : i32
    %13 = arith.cmpi ne, %12, %c0_i32_10 : i32
    scf.if %13 {
      %c0_11 = arith.constant 0 : index
      %c0_12 = arith.constant 0 : index
      %14 = vector.load %arg7[%c0_11, %c0_12] : memref<1024x8xf32, #tpu.memory_space<vmem>>, vector<1024x8xf32>
      %c0_13 = arith.constant 0 : index
      %c0_14 = arith.constant 0 : index
      %15 = vector.load %arg4[%c0_13, %c0_14] : memref<1024x8xf32, #tpu.memory_space<vmem>>, vector<1024x8xf32>
      tpu.vector_store %arg4[%c0_13, %c0_14], %14 {strides = array<i32>} : memref<1024x8xf32, #tpu.memory_space<vmem>>, vector<1024x8xf32>,
      %cst_15 = arith.constant dense<0.000000e+00> : vector<8xf32>
      %16 = vector.multi_reduction <add>, %14, %cst_15 [0] : vector<1024x8xf32> to vector<8xf32>
      %17 = vector.shape_cast %16 : vector<8xf32> to vector<1x8xf32>
      %18 = vector.shape_cast %17 : vector<1x8xf32> to vector<1x1x8xf32>
      %c0_16 = arith.constant 0 : index
      %c0_17 = arith.constant 0 : index
      %c0_18 = arith.constant 0 : index
      %19 = vector.load %arg5[%c0_16, %c0_17, %c0_18] : memref<1x1x8xf32, #tpu.memory_space<vmem>>, vector<1x1x8xf32>
      tpu.vector_store %arg5[%c0_16, %c0_17, %c0_18], %18 {strides = array<i32>} : memref<1x1x8xf32, #tpu.memory_space<vmem>>, vector<1x1x8xf32>,
      %20 = arith.mulf %14, %14 : vector<1024x8xf32>
      %cst_19 = arith.constant dense<0.000000e+00> : vector<8xf32>
      %21 = vector.multi_reduction <add>, %20, %cst_19 [0] : vector<1024x8xf32> to vector<8xf32>
      %22 = vector.shape_cast %21 : vector<8xf32> to vector<1x8xf32>
      %23 = vector.shape_cast %22 : vector<1x8xf32> to vector<1x1x8xf32>
      %c0_20 = arith.constant 0 : index
      %c0_21 = arith.constant 0 : index
      %c0_22 = arith.constant 0 : index
      %24 = vector.load %arg6[%c0_20, %c0_21, %c0_22] : memref<1x1x8xf32, #tpu.memory_space<vmem>>, vector<1x1x8xf32>
      tpu.vector_store %arg6[%c0_20, %c0_21, %c0_22], %23 {strides = array<i32>} : memref<1x1x8xf32, #tpu.memory_space<vmem>>, vector<1x1x8xf32>,
    } else {
    }
    return
  }
  func.func @transform_0(%arg0: i32, %arg1: i32) -> (i32, i32, i32) {
    %c0_i32 = arith.constant 0 : i32
    %c0_i32_0 = arith.constant 0 : i32
    return %arg1, %arg0, %c0_i32 : i32, i32, i32
  }
  func.func @transform_1(%arg0: i32, %arg1: i32) -> (i32, i32, i32) {
    %c0_i32 = arith.constant 0 : i32
    %c0_i32_0 = arith.constant 0 : i32
    %c0_i32_1 = arith.constant 0 : i32
    return %arg1, %c0_i32, %c0_i32_0 : i32, i32, i32
  }
  func.func @transform_2(%arg0: i32, %arg1: i32) -> (i32, i32) {
    %c0_i32 = arith.constant 0 : i32
    %c0_i32_0 = arith.constant 0 : i32
    return %arg0, %c0_i32 : i32, i32
  }
  func.func @transform_3(%arg0: i32, %arg1: i32) -> (i32, i32, i32) {
    %c0_i32 = arith.constant 0 : i32
    %c0_i32_0 = arith.constant 0 : i32
    %c0_i32_1 = arith.constant 0 : i32
    return %arg0, %c0_i32, %c0_i32_0 : i32, i32, i32
  }
  func.func @transform_4(%arg0: i32, %arg1: i32) -> (i32, i32, i32) {
    %c0_i32 = arith.constant 0 : i32
    %c0_i32_0 = arith.constant 0 : i32
    %c0_i32_1 = arith.constant 0 : i32
    return %arg0, %c0_i32, %c0_i32_0 : i32, i32, i32
  }
}

module attributes {stable_mosaic.version = 11 : i64} {
  func.func @_bn_act_kernel(%arg0: i32, %arg1: memref<512x128xf32, #tpu.memory_space<vmem>>, %arg2: memref<1x128xf32, #tpu.memory_space<vmem>>, %arg3: memref<1x128xf32, #tpu.memory_space<vmem>>, %arg4: memref<512x128xf32, #tpu.memory_space<vmem>>) attributes {dimension_semantics = [#tpu.dimension_semantics<parallel>], iteration_bounds = array<i64: 1>, scalar_prefetch = 0 : i64, scratch_operands = 0 : i64, tpu.core_type = #tpu.core_type<tc>, window_params = [{transform_indices = @transform_0, window_bounds = array<i64: 512, 128>}, {pipeline_mode = #tpu.pipeline_mode<synchronous>, transform_indices = @transform_1, window_bounds = array<i64: 1, 128>}, {pipeline_mode = #tpu.pipeline_mode<synchronous>, transform_indices = @transform_2, window_bounds = array<i64: 1, 128>}, {transform_indices = @transform_3, window_bounds = array<i64: 512, 128>}]} {
    %c0 = arith.constant 0 : index
    %c0_0 = arith.constant 0 : index
    %0 = vector.load %arg1[%c0, %c0_0] : memref<512x128xf32, #tpu.memory_space<vmem>>, vector<512x128xf32>
    %c0_1 = arith.constant 0 : index
    %c0_2 = arith.constant 0 : index
    %1 = vector.load %arg2[%c0_1, %c0_2] : memref<1x128xf32, #tpu.memory_space<vmem>>, vector<1x128xf32>
    %2 = vector.broadcast %1 : vector<1x128xf32> to vector<512x128xf32>
    %3 = arith.mulf %0, %2 : vector<512x128xf32>
    %c0_3 = arith.constant 0 : index
    %c0_4 = arith.constant 0 : index
    %4 = vector.load %arg3[%c0_3, %c0_4] : memref<1x128xf32, #tpu.memory_space<vmem>>, vector<1x128xf32>
    %5 = vector.broadcast %4 : vector<1x128xf32> to vector<512x128xf32>
    %6 = arith.addf %3, %5 : vector<512x128xf32>
    %cst = arith.constant 0.000000e+00 : f32
    %7 = vector.broadcast %cst : f32 to vector<512x128xf32>
    %8 = arith.maximumf %6, %7 : vector<512x128xf32>
    %c0_5 = arith.constant 0 : index
    %c0_6 = arith.constant 0 : index
    %9 = vector.load %arg4[%c0_5, %c0_6] : memref<512x128xf32, #tpu.memory_space<vmem>>, vector<512x128xf32>
    tpu.vector_store %arg4[%c0_5, %c0_6], %8 {strides = array<i32>} : memref<512x128xf32, #tpu.memory_space<vmem>>, vector<512x128xf32>,
    return
  }
  func.func @transform_0(%arg0: i32) -> (i32, i32) {
    %c0_i32 = arith.constant 0 : i32
    %c0_i32_0 = arith.constant 0 : i32
    return %arg0, %c0_i32 : i32, i32
  }
  func.func @transform_1(%arg0: i32) -> (i32, i32) {
    %c0_i32 = arith.constant 0 : i32
    %c0_i32_0 = arith.constant 0 : i32
    %c0_i32_1 = arith.constant 0 : i32
    return %c0_i32, %c0_i32_0 : i32, i32
  }
  func.func @transform_2(%arg0: i32) -> (i32, i32) {
    %c0_i32 = arith.constant 0 : i32
    %c0_i32_0 = arith.constant 0 : i32
    %c0_i32_1 = arith.constant 0 : i32
    return %c0_i32, %c0_i32_0 : i32, i32
  }
  func.func @transform_3(%arg0: i32) -> (i32, i32) {
    %c0_i32 = arith.constant 0 : i32
    %c0_i32_0 = arith.constant 0 : i32
    return %arg0, %c0_i32 : i32, i32
  }
}

module attributes {stable_mosaic.version = 11 : i64} {
  func.func @_maxpool_kernel(%arg0: i32, %arg1: i32, %arg2: memref<2x128x17x8xf32, #tpu.memory_space<vmem>>, %arg3: memref<128x16x8xf32, #tpu.memory_space<vmem>>, %arg4: memref<128x16x8xf32, #tpu.memory_space<vmem>>) attributes {dimension_semantics = [#tpu.dimension_semantics<parallel>, #tpu.dimension_semantics<arbitrary>], iteration_bounds = array<i64: 1, 3>, scalar_prefetch = 0 : i64, scratch_operands = 1 : i64, tpu.core_type = #tpu.core_type<tc>, window_params = [{transform_indices = @transform_0, window_bounds = array<i64: 2, 128, 17, 8>}, {transform_indices = @transform_1, window_bounds = array<i64: 128, 16, 8>}]} {
    %c0_i32 = arith.constant 0 : i32
    %0 = arith.cmpi eq, %arg1, %c0_i32 : i32
    %1 = arith.extui %0 : i1 to i32
    %c0_i32_0 = arith.constant 0 : i32
    %2 = arith.cmpi ne, %1, %c0_i32_0 : i32
    scf.if %2 {
      %cst = arith.constant 0xFF800000 : f32
      %22 = vector.broadcast %cst : f32 to vector<128x16x8xf32>
      %c0_26 = arith.constant 0 : index
      %c0_27 = arith.constant 0 : index
      %c0_28 = arith.constant 0 : index
      %23 = vector.load %arg4[%c0_26, %c0_27, %c0_28] : memref<128x16x8xf32, #tpu.memory_space<vmem>>, vector<128x16x8xf32>
      tpu.vector_store %arg4[%c0_26, %c0_27, %c0_28], %22 {strides = array<i32>} : memref<128x16x8xf32, #tpu.memory_space<vmem>>, vector<128x16x8xf32>,
    } else {
    }
    %c0 = arith.constant 0 : index
    %c0_1 = arith.constant 0 : index
    %c0_2 = arith.constant 0 : index
    %c0_3 = arith.constant 0 : index
    %3 = vector.load %arg2[%c0, %c0_1, %c0_2, %c0_3] : memref<2x128x17x8xf32, #tpu.memory_space<vmem>>, vector<1x128x17x8xf32>
    %4 = vector.shape_cast %3 : vector<1x128x17x8xf32> to vector<128x17x8xf32>
    %c1 = arith.constant 1 : index
    %c0_4 = arith.constant 0 : index
    %c0_5 = arith.constant 0 : index
    %c0_6 = arith.constant 0 : index
    %5 = vector.load %arg2[%c1, %c0_4, %c0_5, %c0_6] : memref<2x128x17x8xf32, #tpu.memory_space<vmem>>, vector<1x128x17x8xf32>
    %6 = vector.shape_cast %5 : vector<1x128x17x8xf32> to vector<128x17x8xf32>
    %c0_7 = arith.constant 0 : index
    %c0_8 = arith.constant 0 : index
    %c0_9 = arith.constant 0 : index
    %7 = vector.load %arg4[%c0_7, %c0_8, %c0_9] : memref<128x16x8xf32, #tpu.memory_space<vmem>>, vector<128x16x8xf32>
    %8 = vector.extract_strided_slice %4 {offsets = [0, 0, 0], sizes = [128, 16, 8], strides = [1, 1, 1]} : vector<128x17x8xf32> to vector<128x16x8xf32>
    %9 = arith.maximumf %7, %8 : vector<128x16x8xf32>
    %c0_10 = arith.constant 0 : index
    %c0_11 = arith.constant 0 : index
    %c0_12 = arith.constant 0 : index
    %10 = vector.load %arg4[%c0_10, %c0_11, %c0_12] : memref<128x16x8xf32, #tpu.memory_space<vmem>>, vector<128x16x8xf32>
    tpu.vector_store %arg4[%c0_10, %c0_11, %c0_12], %9 {strides = array<i32>} : memref<128x16x8xf32, #tpu.memory_space<vmem>>, vector<128x16x8xf32>,
    %c0_13 = arith.constant 0 : index
    %c0_14 = arith.constant 0 : index
    %c0_15 = arith.constant 0 : index
    %11 = vector.load %arg4[%c0_13, %c0_14, %c0_15] : memref<128x16x8xf32, #tpu.memory_space<vmem>>, vector<128x16x8xf32>
    %12 = vector.extract_strided_slice %6 {offsets = [0, 0, 0], sizes = [128, 16, 8], strides = [1, 1, 1]} : vector<128x17x8xf32> to vector<128x16x8xf32>
    %13 = arith.maximumf %11, %12 : vector<128x16x8xf32>
    %c0_16 = arith.constant 0 : index
    %c0_17 = arith.constant 0 : index
    %c0_18 = arith.constant 0 : index
    %14 = vector.load %arg4[%c0_16, %c0_17, %c0_18] : memref<128x16x8xf32, #tpu.memory_space<vmem>>, vector<128x16x8xf32>
    tpu.vector_store %arg4[%c0_16, %c0_17, %c0_18], %13 {strides = array<i32>} : memref<128x16x8xf32, #tpu.memory_space<vmem>>, vector<128x16x8xf32>,
    %c0_19 = arith.constant 0 : index
    %c0_20 = arith.constant 0 : index
    %c0_21 = arith.constant 0 : index
    %15 = vector.load %arg4[%c0_19, %c0_20, %c0_21] : memref<128x16x8xf32, #tpu.memory_space<vmem>>, vector<128x16x8xf32>
    %16 = vector.extract_strided_slice %4 {offsets = [0, 1, 0], sizes = [128, 16, 8], strides = [1, 1, 1]} : vector<128x17x8xf32> to vector<128x16x8xf32>
    %17 = arith.maximumf %15, %16 : vector<128x16x8xf32>
    %c0_22 = arith.constant 0 : index
    %c0_23 = arith.constant 0 : index
    %c0_24 = arith.constant 0 : index
    %18 = vector.load %arg4[%c0_22, %c0_23, %c0_24] : memref<128x16x8xf32, #tpu.memory_space<vmem>>, vector<128x16x8xf32>
    tpu.vector_store %arg4[%c0_22, %c0_23, %c0_24], %17 {strides = array<i32>} : memref<128x16x8xf32, #tpu.memory_space<vmem>>, vector<128x16x8xf32>,
    %c2_i32 = arith.constant 2 : i32
    %19 = arith.cmpi eq, %arg1, %c2_i32 : i32
    %20 = arith.extui %19 : i1 to i32
    %c0_i32_25 = arith.constant 0 : i32
    %21 = arith.cmpi ne, %20, %c0_i32_25 : i32
    scf.if %21 {
      %c0_26 = arith.constant 0 : index
      %c0_27 = arith.constant 0 : index
      %c0_28 = arith.constant 0 : index
      %22 = vector.load %arg4[%c0_26, %c0_27, %c0_28] : memref<128x16x8xf32, #tpu.memory_space<vmem>>, vector<128x16x8xf32>
      %c0_29 = arith.constant 0 : index
      %c0_30 = arith.constant 0 : index
      %c0_31 = arith.constant 0 : index
      %23 = vector.load %arg3[%c0_29, %c0_30, %c0_31] : memref<128x16x8xf32, #tpu.memory_space<vmem>>, vector<128x16x8xf32>
      tpu.vector_store %arg3[%c0_29, %c0_30, %c0_31], %22 {strides = array<i32>} : memref<128x16x8xf32, #tpu.memory_space<vmem>>, vector<128x16x8xf32>,
    } else {
    }
    return
  }
  func.func @transform_0(%arg0: i32, %arg1: i32) -> (i32, i32, i32, i32) {
    %c0_i32 = arith.constant 0 : i32
    %c0_i32_0 = arith.constant 0 : i32
    %c0_i32_1 = arith.constant 0 : i32
    return %arg1, %arg0, %c0_i32, %c0_i32_0 : i32, i32, i32, i32
  }
  func.func @transform_1(%arg0: i32, %arg1: i32) -> (i32, i32, i32) {
    %c0_i32 = arith.constant 0 : i32
    %c0_i32_0 = arith.constant 0 : i32
    %c0_i32_1 = arith.constant 0 : i32
    return %arg0, %c0_i32, %c0_i32_0 : i32, i32, i32
  }
}

module attributes {stable_mosaic.version = 11 : i64} {
  func.func @_conv_pix_kernel(%arg0: i32, %arg1: i32, %arg2: memref<1x1024x8xbf16, #tpu.memory_space<vmem>>, %arg3: memref<1x8x8xbf16, #tpu.memory_space<vmem>>, %arg4: memref<1024x8xf32, #tpu.memory_space<vmem>>, %arg5: memref<1x1x8xf32, #tpu.memory_space<vmem>>, %arg6: memref<1x1x8xf32, #tpu.memory_space<vmem>>, %arg7: memref<1024x8xf32, #tpu.memory_space<vmem>>) attributes {dimension_semantics = [#tpu.dimension_semantics<parallel>, #tpu.dimension_semantics<arbitrary>], iteration_bounds = array<i64: 2, 9>, scalar_prefetch = 0 : i64, scratch_operands = 1 : i64, tpu.core_type = #tpu.core_type<tc>, window_params = [{transform_indices = @transform_0, window_bounds = array<i64: 1, 1024, 8>}, {transform_indices = @transform_1, window_bounds = array<i64: 1, 8, 8>}, {transform_indices = @transform_2, window_bounds = array<i64: 1024, 8>}, {transform_indices = @transform_3, window_bounds = array<i64: 1, 1, 8>}, {transform_indices = @transform_4, window_bounds = array<i64: 1, 1, 8>}]} {
    %c0_i32 = arith.constant 0 : i32
    %0 = arith.cmpi eq, %arg1, %c0_i32 : i32
    %1 = arith.extui %0 : i1 to i32
    %c0_i32_0 = arith.constant 0 : i32
    %2 = arith.cmpi ne, %1, %c0_i32_0 : i32
    scf.if %2 {
      %cst_11 = arith.constant 0.000000e+00 : f32
      %14 = vector.broadcast %cst_11 : f32 to vector<1024x8xf32>
      %c0_12 = arith.constant 0 : index
      %c0_13 = arith.constant 0 : index
      %15 = vector.load %arg7[%c0_12, %c0_13] : memref<1024x8xf32, #tpu.memory_space<vmem>>, vector<1024x8xf32>
      tpu.vector_store %arg7[%c0_12, %c0_13], %14 {strides = array<i32>} : memref<1024x8xf32, #tpu.memory_space<vmem>>, vector<1024x8xf32>,
    } else {
    }
    %c0 = arith.constant 0 : index
    %c0_1 = arith.constant 0 : index
    %3 = vector.load %arg7[%c0, %c0_1] : memref<1024x8xf32, #tpu.memory_space<vmem>>, vector<1024x8xf32>
    %c0_2 = arith.constant 0 : index
    %c0_3 = arith.constant 0 : index
    %c0_4 = arith.constant 0 : index
    %4 = vector.load %arg2[%c0_2, %c0_3, %c0_4] : memref<1x1024x8xbf16, #tpu.memory_space<vmem>>, vector<1x1024x8xbf16>
    %5 = vector.shape_cast %4 : vector<1x1024x8xbf16> to vector<1024x8xbf16>
    %c0_5 = arith.constant 0 : index
    %c0_6 = arith.constant 0 : index
    %c0_7 = arith.constant 0 : index
    %6 = vector.load %arg3[%c0_5, %c0_6, %c0_7] : memref<1x8x8xbf16, #tpu.memory_space<vmem>>, vector<1x8x8xbf16>
    %7 = vector.shape_cast %6 : vector<1x8x8xbf16> to vector<8x8xbf16>
    %cst = arith.constant dense<0.000000e+00> : vector<1024x8xf32>
    %8 = tpu.matmul %5, %7, %cst {dimension_numbers = #tpu.dot_dimension_numbers<[1], [0], [0], [1], [0, 0, 1, 1], [], []>} : vector<1024x8xbf16>, vector<8x8xbf16>, vector<1024x8xf32> -> vector<1024x8xf32>
    %9 = arith.addf %3, %8 : vector<1024x8xf32>
    %c0_8 = arith.constant 0 : index
    %c0_9 = arith.constant 0 : index
    %10 = vector.load %arg7[%c0_8, %c0_9] : memref<1024x8xf32, #tpu.memory_space<vmem>>, vector<1024x8xf32>
    tpu.vector_store %arg7[%c0_8, %c0_9], %9 {strides = array<i32>} : memref<1024x8xf32, #tpu.memory_space<vmem>>, vector<1024x8xf32>,
    %c8_i32 = arith.constant 8 : i32
    %11 = arith.cmpi eq, %arg1, %c8_i32 : i32
    %12 = arith.extui %11 : i1 to i32
    %c0_i32_10 = arith.constant 0 : i32
    %13 = arith.cmpi ne, %12, %c0_i32_10 : i32
    scf.if %13 {
      %c0_11 = arith.constant 0 : index
      %c0_12 = arith.constant 0 : index
      %14 = vector.load %arg7[%c0_11, %c0_12] : memref<1024x8xf32, #tpu.memory_space<vmem>>, vector<1024x8xf32>
      %c0_13 = arith.constant 0 : index
      %c0_14 = arith.constant 0 : index
      %15 = vector.load %arg4[%c0_13, %c0_14] : memref<1024x8xf32, #tpu.memory_space<vmem>>, vector<1024x8xf32>
      tpu.vector_store %arg4[%c0_13, %c0_14], %14 {strides = array<i32>} : memref<1024x8xf32, #tpu.memory_space<vmem>>, vector<1024x8xf32>,
      %cst_15 = arith.constant dense<0.000000e+00> : vector<8xf32>
      %16 = vector.multi_reduction <add>, %14, %cst_15 [0] : vector<1024x8xf32> to vector<8xf32>
      %17 = vector.shape_cast %16 : vector<8xf32> to vector<1x8xf32>
      %18 = vector.shape_cast %17 : vector<1x8xf32> to vector<1x1x8xf32>
      %c0_16 = arith.constant 0 : index
      %c0_17 = arith.constant 0 : index
      %c0_18 = arith.constant 0 : index
      %19 = vector.load %arg5[%c0_16, %c0_17, %c0_18] : memref<1x1x8xf32, #tpu.memory_space<vmem>>, vector<1x1x8xf32>
      tpu.vector_store %arg5[%c0_16, %c0_17, %c0_18], %18 {strides = array<i32>} : memref<1x1x8xf32, #tpu.memory_space<vmem>>, vector<1x1x8xf32>,
      %20 = arith.mulf %14, %14 : vector<1024x8xf32>
      %cst_19 = arith.constant dense<0.000000e+00> : vector<8xf32>
      %21 = vector.multi_reduction <add>, %20, %cst_19 [0] : vector<1024x8xf32> to vector<8xf32>
      %22 = vector.shape_cast %21 : vector<8xf32> to vector<1x8xf32>
      %23 = vector.shape_cast %22 : vector<1x8xf32> to vector<1x1x8xf32>
      %c0_20 = arith.constant 0 : index
      %c0_21 = arith.constant 0 : index
      %c0_22 = arith.constant 0 : index
      %24 = vector.load %arg6[%c0_20, %c0_21, %c0_22] : memref<1x1x8xf32, #tpu.memory_space<vmem>>, vector<1x1x8xf32>
      tpu.vector_store %arg6[%c0_20, %c0_21, %c0_22], %23 {strides = array<i32>} : memref<1x1x8xf32, #tpu.memory_space<vmem>>, vector<1x1x8xf32>,
    } else {
    }
    return
  }
  func.func @transform_0(%arg0: i32, %arg1: i32) -> (i32, i32, i32) {
    %c0_i32 = arith.constant 0 : i32
    %c0_i32_0 = arith.constant 0 : i32
    return %arg1, %arg0, %c0_i32 : i32, i32, i32
  }
  func.func @transform_1(%arg0: i32, %arg1: i32) -> (i32, i32, i32) {
    %c0_i32 = arith.constant 0 : i32
    %c0_i32_0 = arith.constant 0 : i32
    %c0_i32_1 = arith.constant 0 : i32
    return %arg1, %c0_i32, %c0_i32_0 : i32, i32, i32
  }
  func.func @transform_2(%arg0: i32, %arg1: i32) -> (i32, i32) {
    %c0_i32 = arith.constant 0 : i32
    %c0_i32_0 = arith.constant 0 : i32
    return %arg0, %c0_i32 : i32, i32
  }
  func.func @transform_3(%arg0: i32, %arg1: i32) -> (i32, i32, i32) {
    %c0_i32 = arith.constant 0 : i32
    %c0_i32_0 = arith.constant 0 : i32
    %c0_i32_1 = arith.constant 0 : i32
    return %arg0, %c0_i32, %c0_i32_0 : i32, i32, i32
  }
  func.func @transform_4(%arg0: i32, %arg1: i32) -> (i32, i32, i32) {
    %c0_i32 = arith.constant 0 : i32
    %c0_i32_0 = arith.constant 0 : i32
    %c0_i32_1 = arith.constant 0 : i32
    return %arg0, %c0_i32, %c0_i32_0 : i32, i32, i32
  }
}

module attributes {stable_mosaic.version = 11 : i64} {
  func.func @_bn_act_kernel(%arg0: i32, %arg1: memref<128x128xf32, #tpu.memory_space<vmem>>, %arg2: memref<1x128xf32, #tpu.memory_space<vmem>>, %arg3: memref<1x128xf32, #tpu.memory_space<vmem>>, %arg4: memref<128x128xf32, #tpu.memory_space<vmem>>) attributes {dimension_semantics = [#tpu.dimension_semantics<parallel>], iteration_bounds = array<i64: 1>, scalar_prefetch = 0 : i64, scratch_operands = 0 : i64, tpu.core_type = #tpu.core_type<tc>, window_params = [{transform_indices = @transform_0, window_bounds = array<i64: 128, 128>}, {pipeline_mode = #tpu.pipeline_mode<synchronous>, transform_indices = @transform_1, window_bounds = array<i64: 1, 128>}, {pipeline_mode = #tpu.pipeline_mode<synchronous>, transform_indices = @transform_2, window_bounds = array<i64: 1, 128>}, {transform_indices = @transform_3, window_bounds = array<i64: 128, 128>}]} {
    %c0 = arith.constant 0 : index
    %c0_0 = arith.constant 0 : index
    %0 = vector.load %arg1[%c0, %c0_0] : memref<128x128xf32, #tpu.memory_space<vmem>>, vector<128x128xf32>
    %c0_1 = arith.constant 0 : index
    %c0_2 = arith.constant 0 : index
    %1 = vector.load %arg2[%c0_1, %c0_2] : memref<1x128xf32, #tpu.memory_space<vmem>>, vector<1x128xf32>
    %2 = vector.broadcast %1 : vector<1x128xf32> to vector<128x128xf32>
    %3 = arith.mulf %0, %2 : vector<128x128xf32>
    %c0_3 = arith.constant 0 : index
    %c0_4 = arith.constant 0 : index
    %4 = vector.load %arg3[%c0_3, %c0_4] : memref<1x128xf32, #tpu.memory_space<vmem>>, vector<1x128xf32>
    %5 = vector.broadcast %4 : vector<1x128xf32> to vector<128x128xf32>
    %6 = arith.addf %3, %5 : vector<128x128xf32>
    %cst = arith.constant 0.000000e+00 : f32
    %7 = vector.broadcast %cst : f32 to vector<128x128xf32>
    %8 = arith.maximumf %6, %7 : vector<128x128xf32>
    %c0_5 = arith.constant 0 : index
    %c0_6 = arith.constant 0 : index
    %9 = vector.load %arg4[%c0_5, %c0_6] : memref<128x128xf32, #tpu.memory_space<vmem>>, vector<128x128xf32>
    tpu.vector_store %arg4[%c0_5, %c0_6], %8 {strides = array<i32>} : memref<128x128xf32, #tpu.memory_space<vmem>>, vector<128x128xf32>,
    return
  }
  func.func @transform_0(%arg0: i32) -> (i32, i32) {
    %c0_i32 = arith.constant 0 : i32
    %c0_i32_0 = arith.constant 0 : i32
    return %arg0, %c0_i32 : i32, i32
  }
  func.func @transform_1(%arg0: i32) -> (i32, i32) {
    %c0_i32 = arith.constant 0 : i32
    %c0_i32_0 = arith.constant 0 : i32
    %c0_i32_1 = arith.constant 0 : i32
    return %c0_i32, %c0_i32_0 : i32, i32
  }
  func.func @transform_2(%arg0: i32) -> (i32, i32) {
    %c0_i32 = arith.constant 0 : i32
    %c0_i32_0 = arith.constant 0 : i32
    %c0_i32_1 = arith.constant 0 : i32
    return %c0_i32, %c0_i32_0 : i32, i32
  }
  func.func @transform_3(%arg0: i32) -> (i32, i32) {
    %c0_i32 = arith.constant 0 : i32
    %c0_i32_0 = arith.constant 0 : i32
    return %arg0, %c0_i32 : i32, i32
  }
}

module attributes {stable_mosaic.version = 11 : i64} {
  func.func @_bn_act_kernel(%arg0: i32, %arg1: memref<128x128xf32, #tpu.memory_space<vmem>>, %arg2: memref<1x128xf32, #tpu.memory_space<vmem>>, %arg3: memref<1x128xf32, #tpu.memory_space<vmem>>, %arg4: memref<128x128xf32, #tpu.memory_space<vmem>>, %arg5: memref<128x128xf32, #tpu.memory_space<vmem>>) attributes {dimension_semantics = [#tpu.dimension_semantics<parallel>], iteration_bounds = array<i64: 1>, scalar_prefetch = 0 : i64, scratch_operands = 0 : i64, tpu.core_type = #tpu.core_type<tc>, window_params = [{transform_indices = @transform_0, window_bounds = array<i64: 128, 128>}, {pipeline_mode = #tpu.pipeline_mode<synchronous>, transform_indices = @transform_1, window_bounds = array<i64: 1, 128>}, {pipeline_mode = #tpu.pipeline_mode<synchronous>, transform_indices = @transform_2, window_bounds = array<i64: 1, 128>}, {transform_indices = @transform_3, window_bounds = array<i64: 128, 128>}, {transform_indices = @transform_4, window_bounds = array<i64: 128, 128>}]} {
    %c0 = arith.constant 0 : index
    %c0_0 = arith.constant 0 : index
    %0 = vector.load %arg1[%c0, %c0_0] : memref<128x128xf32, #tpu.memory_space<vmem>>, vector<128x128xf32>
    %c0_1 = arith.constant 0 : index
    %c0_2 = arith.constant 0 : index
    %1 = vector.load %arg2[%c0_1, %c0_2] : memref<1x128xf32, #tpu.memory_space<vmem>>, vector<1x128xf32>
    %2 = vector.broadcast %1 : vector<1x128xf32> to vector<128x128xf32>
    %3 = arith.mulf %0, %2 : vector<128x128xf32>
    %c0_3 = arith.constant 0 : index
    %c0_4 = arith.constant 0 : index
    %4 = vector.load %arg3[%c0_3, %c0_4] : memref<1x128xf32, #tpu.memory_space<vmem>>, vector<1x128xf32>
    %5 = vector.broadcast %4 : vector<1x128xf32> to vector<128x128xf32>
    %6 = arith.addf %3, %5 : vector<128x128xf32>
    %c0_5 = arith.constant 0 : index
    %c0_6 = arith.constant 0 : index
    %7 = vector.load %arg4[%c0_5, %c0_6] : memref<128x128xf32, #tpu.memory_space<vmem>>, vector<128x128xf32>
    %8 = arith.addf %6, %7 : vector<128x128xf32>
    %cst = arith.constant 0.000000e+00 : f32
    %9 = vector.broadcast %cst : f32 to vector<128x128xf32>
    %10 = arith.maximumf %8, %9 : vector<128x128xf32>
    %c0_7 = arith.constant 0 : index
    %c0_8 = arith.constant 0 : index
    %11 = vector.load %arg5[%c0_7, %c0_8] : memref<128x128xf32, #tpu.memory_space<vmem>>, vector<128x128xf32>
    tpu.vector_store %arg5[%c0_7, %c0_8], %10 {strides = array<i32>} : memref<128x128xf32, #tpu.memory_space<vmem>>, vector<128x128xf32>,
    return
  }
  func.func @transform_0(%arg0: i32) -> (i32, i32) {
    %c0_i32 = arith.constant 0 : i32
    %c0_i32_0 = arith.constant 0 : i32
    return %arg0, %c0_i32 : i32, i32
  }
  func.func @transform_1(%arg0: i32) -> (i32, i32) {
    %c0_i32 = arith.constant 0 : i32
    %c0_i32_0 = arith.constant 0 : i32
    %c0_i32_1 = arith.constant 0 : i32
    return %c0_i32, %c0_i32_0 : i32, i32
  }
  func.func @transform_2(%arg0: i32) -> (i32, i32) {
    %c0_i32 = arith.constant 0 : i32
    %c0_i32_0 = arith.constant 0 : i32
    %c0_i32_1 = arith.constant 0 : i32
    return %c0_i32, %c0_i32_0 : i32, i32
  }
  func.func @transform_3(%arg0: i32) -> (i32, i32) {
    %c0_i32 = arith.constant 0 : i32
    %c0_i32_0 = arith.constant 0 : i32
    return %arg0, %c0_i32 : i32, i32
  }
  func.func @transform_4(%arg0: i32) -> (i32, i32) {
    %c0_i32 = arith.constant 0 : i32
    %c0_i32_0 = arith.constant 0 : i32
    return %arg0, %c0_i32 : i32, i32
  }
}

module attributes {stable_mosaic.version = 11 : i64} {
  func.func @_conv_pix_kernel(%arg0: i32, %arg1: i32, %arg2: memref<1x512x8xbf16, #tpu.memory_space<vmem>>, %arg3: memref<1x8x16xbf16, #tpu.memory_space<vmem>>, %arg4: memref<512x16xf32, #tpu.memory_space<vmem>>, %arg5: memref<1x1x16xf32, #tpu.memory_space<vmem>>, %arg6: memref<1x1x16xf32, #tpu.memory_space<vmem>>, %arg7: memref<512x16xf32, #tpu.memory_space<vmem>>) attributes {dimension_semantics = [#tpu.dimension_semantics<parallel>, #tpu.dimension_semantics<arbitrary>], iteration_bounds = array<i64: 1, 1>, scalar_prefetch = 0 : i64, scratch_operands = 1 : i64, tpu.core_type = #tpu.core_type<tc>, window_params = [{transform_indices = @transform_0, window_bounds = array<i64: 1, 512, 8>}, {transform_indices = @transform_1, window_bounds = array<i64: 1, 8, 16>}, {transform_indices = @transform_2, window_bounds = array<i64: 512, 16>}, {transform_indices = @transform_3, window_bounds = array<i64: 1, 1, 16>}, {transform_indices = @transform_4, window_bounds = array<i64: 1, 1, 16>}]} {
    %c0_i32 = arith.constant 0 : i32
    %0 = arith.cmpi eq, %arg1, %c0_i32 : i32
    %1 = arith.extui %0 : i1 to i32
    %c0_i32_0 = arith.constant 0 : i32
    %2 = arith.cmpi ne, %1, %c0_i32_0 : i32
    scf.if %2 {
      %cst_12 = arith.constant 0.000000e+00 : f32
      %14 = vector.broadcast %cst_12 : f32 to vector<512x16xf32>
      %c0_13 = arith.constant 0 : index
      %c0_14 = arith.constant 0 : index
      %15 = vector.load %arg7[%c0_13, %c0_14] : memref<512x16xf32, #tpu.memory_space<vmem>>, vector<512x16xf32>
      tpu.vector_store %arg7[%c0_13, %c0_14], %14 {strides = array<i32>} : memref<512x16xf32, #tpu.memory_space<vmem>>, vector<512x16xf32>,
    } else {
    }
    %c0 = arith.constant 0 : index
    %c0_1 = arith.constant 0 : index
    %3 = vector.load %arg7[%c0, %c0_1] : memref<512x16xf32, #tpu.memory_space<vmem>>, vector<512x16xf32>
    %c0_2 = arith.constant 0 : index
    %c0_3 = arith.constant 0 : index
    %c0_4 = arith.constant 0 : index
    %4 = vector.load %arg2[%c0_2, %c0_3, %c0_4] : memref<1x512x8xbf16, #tpu.memory_space<vmem>>, vector<1x512x8xbf16>
    %5 = vector.shape_cast %4 : vector<1x512x8xbf16> to vector<512x8xbf16>
    %c0_5 = arith.constant 0 : index
    %c0_6 = arith.constant 0 : index
    %c0_7 = arith.constant 0 : index
    %6 = vector.load %arg3[%c0_5, %c0_6, %c0_7] : memref<1x8x16xbf16, #tpu.memory_space<vmem>>, vector<1x8x16xbf16>
    %7 = vector.shape_cast %6 : vector<1x8x16xbf16> to vector<8x16xbf16>
    %cst = arith.constant dense<0.000000e+00> : vector<512x16xf32>
    %8 = tpu.matmul %5, %7, %cst {dimension_numbers = #tpu.dot_dimension_numbers<[1], [0], [0], [1], [0, 0, 1, 1], [], []>} : vector<512x8xbf16>, vector<8x16xbf16>, vector<512x16xf32> -> vector<512x16xf32>
    %9 = arith.addf %3, %8 : vector<512x16xf32>
    %c0_8 = arith.constant 0 : index
    %c0_9 = arith.constant 0 : index
    %10 = vector.load %arg7[%c0_8, %c0_9] : memref<512x16xf32, #tpu.memory_space<vmem>>, vector<512x16xf32>
    tpu.vector_store %arg7[%c0_8, %c0_9], %9 {strides = array<i32>} : memref<512x16xf32, #tpu.memory_space<vmem>>, vector<512x16xf32>,
    %c0_i32_10 = arith.constant 0 : i32
    %11 = arith.cmpi eq, %arg1, %c0_i32_10 : i32
    %12 = arith.extui %11 : i1 to i32
    %c0_i32_11 = arith.constant 0 : i32
    %13 = arith.cmpi ne, %12, %c0_i32_11 : i32
    scf.if %13 {
      %c0_12 = arith.constant 0 : index
      %c0_13 = arith.constant 0 : index
      %14 = vector.load %arg7[%c0_12, %c0_13] : memref<512x16xf32, #tpu.memory_space<vmem>>, vector<512x16xf32>
      %c0_14 = arith.constant 0 : index
      %c0_15 = arith.constant 0 : index
      %15 = vector.load %arg4[%c0_14, %c0_15] : memref<512x16xf32, #tpu.memory_space<vmem>>, vector<512x16xf32>
      tpu.vector_store %arg4[%c0_14, %c0_15], %14 {strides = array<i32>} : memref<512x16xf32, #tpu.memory_space<vmem>>, vector<512x16xf32>,
      %cst_16 = arith.constant dense<0.000000e+00> : vector<16xf32>
      %16 = vector.multi_reduction <add>, %14, %cst_16 [0] : vector<512x16xf32> to vector<16xf32>
      %17 = vector.shape_cast %16 : vector<16xf32> to vector<1x16xf32>
      %18 = vector.shape_cast %17 : vector<1x16xf32> to vector<1x1x16xf32>
      %c0_17 = arith.constant 0 : index
      %c0_18 = arith.constant 0 : index
      %c0_19 = arith.constant 0 : index
      %19 = vector.load %arg5[%c0_17, %c0_18, %c0_19] : memref<1x1x16xf32, #tpu.memory_space<vmem>>, vector<1x1x16xf32>
      tpu.vector_store %arg5[%c0_17, %c0_18, %c0_19], %18 {strides = array<i32>} : memref<1x1x16xf32, #tpu.memory_space<vmem>>, vector<1x1x16xf32>,
      %20 = arith.mulf %14, %14 : vector<512x16xf32>
      %cst_20 = arith.constant dense<0.000000e+00> : vector<16xf32>
      %21 = vector.multi_reduction <add>, %20, %cst_20 [0] : vector<512x16xf32> to vector<16xf32>
      %22 = vector.shape_cast %21 : vector<16xf32> to vector<1x16xf32>
      %23 = vector.shape_cast %22 : vector<1x16xf32> to vector<1x1x16xf32>
      %c0_21 = arith.constant 0 : index
      %c0_22 = arith.constant 0 : index
      %c0_23 = arith.constant 0 : index
      %24 = vector.load %arg6[%c0_21, %c0_22, %c0_23] : memref<1x1x16xf32, #tpu.memory_space<vmem>>, vector<1x1x16xf32>
      tpu.vector_store %arg6[%c0_21, %c0_22, %c0_23], %23 {strides = array<i32>} : memref<1x1x16xf32, #tpu.memory_space<vmem>>, vector<1x1x16xf32>,
    } else {
    }
    return
  }
  func.func @transform_0(%arg0: i32, %arg1: i32) -> (i32, i32, i32) {
    %c0_i32 = arith.constant 0 : i32
    %c0_i32_0 = arith.constant 0 : i32
    return %arg1, %arg0, %c0_i32 : i32, i32, i32
  }
  func.func @transform_1(%arg0: i32, %arg1: i32) -> (i32, i32, i32) {
    %c0_i32 = arith.constant 0 : i32
    %c0_i32_0 = arith.constant 0 : i32
    %c0_i32_1 = arith.constant 0 : i32
    return %arg1, %c0_i32, %c0_i32_0 : i32, i32, i32
  }
  func.func @transform_2(%arg0: i32, %arg1: i32) -> (i32, i32) {
    %c0_i32 = arith.constant 0 : i32
    %c0_i32_0 = arith.constant 0 : i32
    return %arg0, %c0_i32 : i32, i32
  }
  func.func @transform_3(%arg0: i32, %arg1: i32) -> (i32, i32, i32) {
    %c0_i32 = arith.constant 0 : i32
    %c0_i32_0 = arith.constant 0 : i32
    %c0_i32_1 = arith.constant 0 : i32
    return %arg0, %c0_i32, %c0_i32_0 : i32, i32, i32
  }
  func.func @transform_4(%arg0: i32, %arg1: i32) -> (i32, i32, i32) {
    %c0_i32 = arith.constant 0 : i32
    %c0_i32_0 = arith.constant 0 : i32
    %c0_i32_1 = arith.constant 0 : i32
    return %arg0, %c0_i32, %c0_i32_0 : i32, i32, i32
  }
}

module attributes {stable_mosaic.version = 11 : i64} {
  func.func @_bn_act_kernel(%arg0: i32, %arg1: memref<64x128xf32, #tpu.memory_space<vmem>>, %arg2: memref<1x128xf32, #tpu.memory_space<vmem>>, %arg3: memref<1x128xf32, #tpu.memory_space<vmem>>, %arg4: memref<64x128xf32, #tpu.memory_space<vmem>>) attributes {dimension_semantics = [#tpu.dimension_semantics<parallel>], iteration_bounds = array<i64: 1>, scalar_prefetch = 0 : i64, scratch_operands = 0 : i64, tpu.core_type = #tpu.core_type<tc>, window_params = [{transform_indices = @transform_0, window_bounds = array<i64: 64, 128>}, {pipeline_mode = #tpu.pipeline_mode<synchronous>, transform_indices = @transform_1, window_bounds = array<i64: 1, 128>}, {pipeline_mode = #tpu.pipeline_mode<synchronous>, transform_indices = @transform_2, window_bounds = array<i64: 1, 128>}, {transform_indices = @transform_3, window_bounds = array<i64: 64, 128>}]} {
    %c0 = arith.constant 0 : index
    %c0_0 = arith.constant 0 : index
    %0 = vector.load %arg1[%c0, %c0_0] : memref<64x128xf32, #tpu.memory_space<vmem>>, vector<64x128xf32>
    %c0_1 = arith.constant 0 : index
    %c0_2 = arith.constant 0 : index
    %1 = vector.load %arg2[%c0_1, %c0_2] : memref<1x128xf32, #tpu.memory_space<vmem>>, vector<1x128xf32>
    %2 = vector.broadcast %1 : vector<1x128xf32> to vector<64x128xf32>
    %3 = arith.mulf %0, %2 : vector<64x128xf32>
    %c0_3 = arith.constant 0 : index
    %c0_4 = arith.constant 0 : index
    %4 = vector.load %arg3[%c0_3, %c0_4] : memref<1x128xf32, #tpu.memory_space<vmem>>, vector<1x128xf32>
    %5 = vector.broadcast %4 : vector<1x128xf32> to vector<64x128xf32>
    %6 = arith.addf %3, %5 : vector<64x128xf32>
    %c0_5 = arith.constant 0 : index
    %c0_6 = arith.constant 0 : index
    %7 = vector.load %arg4[%c0_5, %c0_6] : memref<64x128xf32, #tpu.memory_space<vmem>>, vector<64x128xf32>
    tpu.vector_store %arg4[%c0_5, %c0_6], %6 {strides = array<i32>} : memref<64x128xf32, #tpu.memory_space<vmem>>, vector<64x128xf32>,
    return
  }
  func.func @transform_0(%arg0: i32) -> (i32, i32) {
    %c0_i32 = arith.constant 0 : i32
    %c0_i32_0 = arith.constant 0 : i32
    return %arg0, %c0_i32 : i32, i32
  }
  func.func @transform_1(%arg0: i32) -> (i32, i32) {
    %c0_i32 = arith.constant 0 : i32
    %c0_i32_0 = arith.constant 0 : i32
    %c0_i32_1 = arith.constant 0 : i32
    return %c0_i32, %c0_i32_0 : i32, i32
  }
  func.func @transform_2(%arg0: i32) -> (i32, i32) {
    %c0_i32 = arith.constant 0 : i32
    %c0_i32_0 = arith.constant 0 : i32
    %c0_i32_1 = arith.constant 0 : i32
    return %c0_i32, %c0_i32_0 : i32, i32
  }
  func.func @transform_3(%arg0: i32) -> (i32, i32) {
    %c0_i32 = arith.constant 0 : i32
    %c0_i32_0 = arith.constant 0 : i32
    return %arg0, %c0_i32 : i32, i32
  }
}

module attributes {stable_mosaic.version = 11 : i64} {
  func.func @_bn_act_kernel(%arg0: i32, %arg1: memref<64x128xf32, #tpu.memory_space<vmem>>, %arg2: memref<1x128xf32, #tpu.memory_space<vmem>>, %arg3: memref<1x128xf32, #tpu.memory_space<vmem>>, %arg4: memref<64x128xf32, #tpu.memory_space<vmem>>) attributes {dimension_semantics = [#tpu.dimension_semantics<parallel>], iteration_bounds = array<i64: 1>, scalar_prefetch = 0 : i64, scratch_operands = 0 : i64, tpu.core_type = #tpu.core_type<tc>, window_params = [{transform_indices = @transform_0, window_bounds = array<i64: 64, 128>}, {pipeline_mode = #tpu.pipeline_mode<synchronous>, transform_indices = @transform_1, window_bounds = array<i64: 1, 128>}, {pipeline_mode = #tpu.pipeline_mode<synchronous>, transform_indices = @transform_2, window_bounds = array<i64: 1, 128>}, {transform_indices = @transform_3, window_bounds = array<i64: 64, 128>}]} {
    %c0 = arith.constant 0 : index
    %c0_0 = arith.constant 0 : index
    %0 = vector.load %arg1[%c0, %c0_0] : memref<64x128xf32, #tpu.memory_space<vmem>>, vector<64x128xf32>
    %c0_1 = arith.constant 0 : index
    %c0_2 = arith.constant 0 : index
    %1 = vector.load %arg2[%c0_1, %c0_2] : memref<1x128xf32, #tpu.memory_space<vmem>>, vector<1x128xf32>
    %2 = vector.broadcast %1 : vector<1x128xf32> to vector<64x128xf32>
    %3 = arith.mulf %0, %2 : vector<64x128xf32>
    %c0_3 = arith.constant 0 : index
    %c0_4 = arith.constant 0 : index
    %4 = vector.load %arg3[%c0_3, %c0_4] : memref<1x128xf32, #tpu.memory_space<vmem>>, vector<1x128xf32>
    %5 = vector.broadcast %4 : vector<1x128xf32> to vector<64x128xf32>
    %6 = arith.addf %3, %5 : vector<64x128xf32>
    %cst = arith.constant 0.000000e+00 : f32
    %7 = vector.broadcast %cst : f32 to vector<64x128xf32>
    %8 = arith.maximumf %6, %7 : vector<64x128xf32>
    %c0_5 = arith.constant 0 : index
    %c0_6 = arith.constant 0 : index
    %9 = vector.load %arg4[%c0_5, %c0_6] : memref<64x128xf32, #tpu.memory_space<vmem>>, vector<64x128xf32>
    tpu.vector_store %arg4[%c0_5, %c0_6], %8 {strides = array<i32>} : memref<64x128xf32, #tpu.memory_space<vmem>>, vector<64x128xf32>,
    return
  }
  func.func @transform_0(%arg0: i32) -> (i32, i32) {
    %c0_i32 = arith.constant 0 : i32
    %c0_i32_0 = arith.constant 0 : i32
    return %arg0, %c0_i32 : i32, i32
  }
  func.func @transform_1(%arg0: i32) -> (i32, i32) {
    %c0_i32 = arith.constant 0 : i32
    %c0_i32_0 = arith.constant 0 : i32
    %c0_i32_1 = arith.constant 0 : i32
    return %c0_i32, %c0_i32_0 : i32, i32
  }
  func.func @transform_2(%arg0: i32) -> (i32, i32) {
    %c0_i32 = arith.constant 0 : i32
    %c0_i32_0 = arith.constant 0 : i32
    %c0_i32_1 = arith.constant 0 : i32
    return %c0_i32, %c0_i32_0 : i32, i32
  }
  func.func @transform_3(%arg0: i32) -> (i32, i32) {
    %c0_i32 = arith.constant 0 : i32
    %c0_i32_0 = arith.constant 0 : i32
    return %arg0, %c0_i32 : i32, i32
  }
}

module attributes {stable_mosaic.version = 11 : i64} {
  func.func @_conv_pix_kernel(%arg0: i32, %arg1: i32, %arg2: memref<1x512x8xbf16, #tpu.memory_space<vmem>>, %arg3: memref<1x8x16xbf16, #tpu.memory_space<vmem>>, %arg4: memref<512x16xf32, #tpu.memory_space<vmem>>, %arg5: memref<1x1x16xf32, #tpu.memory_space<vmem>>, %arg6: memref<1x1x16xf32, #tpu.memory_space<vmem>>, %arg7: memref<512x16xf32, #tpu.memory_space<vmem>>) attributes {dimension_semantics = [#tpu.dimension_semantics<parallel>, #tpu.dimension_semantics<arbitrary>], iteration_bounds = array<i64: 1, 9>, scalar_prefetch = 0 : i64, scratch_operands = 1 : i64, tpu.core_type = #tpu.core_type<tc>, window_params = [{transform_indices = @transform_0, window_bounds = array<i64: 1, 512, 8>}, {transform_indices = @transform_1, window_bounds = array<i64: 1, 8, 16>}, {transform_indices = @transform_2, window_bounds = array<i64: 512, 16>}, {transform_indices = @transform_3, window_bounds = array<i64: 1, 1, 16>}, {transform_indices = @transform_4, window_bounds = array<i64: 1, 1, 16>}]} {
    %c0_i32 = arith.constant 0 : i32
    %0 = arith.cmpi eq, %arg1, %c0_i32 : i32
    %1 = arith.extui %0 : i1 to i32
    %c0_i32_0 = arith.constant 0 : i32
    %2 = arith.cmpi ne, %1, %c0_i32_0 : i32
    scf.if %2 {
      %cst_11 = arith.constant 0.000000e+00 : f32
      %14 = vector.broadcast %cst_11 : f32 to vector<512x16xf32>
      %c0_12 = arith.constant 0 : index
      %c0_13 = arith.constant 0 : index
      %15 = vector.load %arg7[%c0_12, %c0_13] : memref<512x16xf32, #tpu.memory_space<vmem>>, vector<512x16xf32>
      tpu.vector_store %arg7[%c0_12, %c0_13], %14 {strides = array<i32>} : memref<512x16xf32, #tpu.memory_space<vmem>>, vector<512x16xf32>,
    } else {
    }
    %c0 = arith.constant 0 : index
    %c0_1 = arith.constant 0 : index
    %3 = vector.load %arg7[%c0, %c0_1] : memref<512x16xf32, #tpu.memory_space<vmem>>, vector<512x16xf32>
    %c0_2 = arith.constant 0 : index
    %c0_3 = arith.constant 0 : index
    %c0_4 = arith.constant 0 : index
    %4 = vector.load %arg2[%c0_2, %c0_3, %c0_4] : memref<1x512x8xbf16, #tpu.memory_space<vmem>>, vector<1x512x8xbf16>
    %5 = vector.shape_cast %4 : vector<1x512x8xbf16> to vector<512x8xbf16>
    %c0_5 = arith.constant 0 : index
    %c0_6 = arith.constant 0 : index
    %c0_7 = arith.constant 0 : index
    %6 = vector.load %arg3[%c0_5, %c0_6, %c0_7] : memref<1x8x16xbf16, #tpu.memory_space<vmem>>, vector<1x8x16xbf16>
    %7 = vector.shape_cast %6 : vector<1x8x16xbf16> to vector<8x16xbf16>
    %cst = arith.constant dense<0.000000e+00> : vector<512x16xf32>
    %8 = tpu.matmul %5, %7, %cst {dimension_numbers = #tpu.dot_dimension_numbers<[1], [0], [0], [1], [0, 0, 1, 1], [], []>} : vector<512x8xbf16>, vector<8x16xbf16>, vector<512x16xf32> -> vector<512x16xf32>
    %9 = arith.addf %3, %8 : vector<512x16xf32>
    %c0_8 = arith.constant 0 : index
    %c0_9 = arith.constant 0 : index
    %10 = vector.load %arg7[%c0_8, %c0_9] : memref<512x16xf32, #tpu.memory_space<vmem>>, vector<512x16xf32>
    tpu.vector_store %arg7[%c0_8, %c0_9], %9 {strides = array<i32>} : memref<512x16xf32, #tpu.memory_space<vmem>>, vector<512x16xf32>,
    %c8_i32 = arith.constant 8 : i32
    %11 = arith.cmpi eq, %arg1, %c8_i32 : i32
    %12 = arith.extui %11 : i1 to i32
    %c0_i32_10 = arith.constant 0 : i32
    %13 = arith.cmpi ne, %12, %c0_i32_10 : i32
    scf.if %13 {
      %c0_11 = arith.constant 0 : index
      %c0_12 = arith.constant 0 : index
      %14 = vector.load %arg7[%c0_11, %c0_12] : memref<512x16xf32, #tpu.memory_space<vmem>>, vector<512x16xf32>
      %c0_13 = arith.constant 0 : index
      %c0_14 = arith.constant 0 : index
      %15 = vector.load %arg4[%c0_13, %c0_14] : memref<512x16xf32, #tpu.memory_space<vmem>>, vector<512x16xf32>
      tpu.vector_store %arg4[%c0_13, %c0_14], %14 {strides = array<i32>} : memref<512x16xf32, #tpu.memory_space<vmem>>, vector<512x16xf32>,
      %cst_15 = arith.constant dense<0.000000e+00> : vector<16xf32>
      %16 = vector.multi_reduction <add>, %14, %cst_15 [0] : vector<512x16xf32> to vector<16xf32>
      %17 = vector.shape_cast %16 : vector<16xf32> to vector<1x16xf32>
      %18 = vector.shape_cast %17 : vector<1x16xf32> to vector<1x1x16xf32>
      %c0_16 = arith.constant 0 : index
      %c0_17 = arith.constant 0 : index
      %c0_18 = arith.constant 0 : index
      %19 = vector.load %arg5[%c0_16, %c0_17, %c0_18] : memref<1x1x16xf32, #tpu.memory_space<vmem>>, vector<1x1x16xf32>
      tpu.vector_store %arg5[%c0_16, %c0_17, %c0_18], %18 {strides = array<i32>} : memref<1x1x16xf32, #tpu.memory_space<vmem>>, vector<1x1x16xf32>,
      %20 = arith.mulf %14, %14 : vector<512x16xf32>
      %cst_19 = arith.constant dense<0.000000e+00> : vector<16xf32>
      %21 = vector.multi_reduction <add>, %20, %cst_19 [0] : vector<512x16xf32> to vector<16xf32>
      %22 = vector.shape_cast %21 : vector<16xf32> to vector<1x16xf32>
      %23 = vector.shape_cast %22 : vector<1x16xf32> to vector<1x1x16xf32>
      %c0_20 = arith.constant 0 : index
      %c0_21 = arith.constant 0 : index
      %c0_22 = arith.constant 0 : index
      %24 = vector.load %arg6[%c0_20, %c0_21, %c0_22] : memref<1x1x16xf32, #tpu.memory_space<vmem>>, vector<1x1x16xf32>
      tpu.vector_store %arg6[%c0_20, %c0_21, %c0_22], %23 {strides = array<i32>} : memref<1x1x16xf32, #tpu.memory_space<vmem>>, vector<1x1x16xf32>,
    } else {
    }
    return
  }
  func.func @transform_0(%arg0: i32, %arg1: i32) -> (i32, i32, i32) {
    %c0_i32 = arith.constant 0 : i32
    %c0_i32_0 = arith.constant 0 : i32
    return %arg1, %arg0, %c0_i32 : i32, i32, i32
  }
  func.func @transform_1(%arg0: i32, %arg1: i32) -> (i32, i32, i32) {
    %c0_i32 = arith.constant 0 : i32
    %c0_i32_0 = arith.constant 0 : i32
    %c0_i32_1 = arith.constant 0 : i32
    return %arg1, %c0_i32, %c0_i32_0 : i32, i32, i32
  }
  func.func @transform_2(%arg0: i32, %arg1: i32) -> (i32, i32) {
    %c0_i32 = arith.constant 0 : i32
    %c0_i32_0 = arith.constant 0 : i32
    return %arg0, %c0_i32 : i32, i32
  }
  func.func @transform_3(%arg0: i32, %arg1: i32) -> (i32, i32, i32) {
    %c0_i32 = arith.constant 0 : i32
    %c0_i32_0 = arith.constant 0 : i32
    %c0_i32_1 = arith.constant 0 : i32
    return %arg0, %c0_i32, %c0_i32_0 : i32, i32, i32
  }
  func.func @transform_4(%arg0: i32, %arg1: i32) -> (i32, i32, i32) {
    %c0_i32 = arith.constant 0 : i32
    %c0_i32_0 = arith.constant 0 : i32
    %c0_i32_1 = arith.constant 0 : i32
    return %arg0, %c0_i32, %c0_i32_0 : i32, i32, i32
  }
}

module attributes {stable_mosaic.version = 11 : i64} {
  func.func @_conv_pix_kernel(%arg0: i32, %arg1: i32, %arg2: memref<1x512x16xbf16, #tpu.memory_space<vmem>>, %arg3: memref<1x16x16xbf16, #tpu.memory_space<vmem>>, %arg4: memref<512x16xf32, #tpu.memory_space<vmem>>, %arg5: memref<1x1x16xf32, #tpu.memory_space<vmem>>, %arg6: memref<1x1x16xf32, #tpu.memory_space<vmem>>, %arg7: memref<512x16xf32, #tpu.memory_space<vmem>>) attributes {dimension_semantics = [#tpu.dimension_semantics<parallel>, #tpu.dimension_semantics<arbitrary>], iteration_bounds = array<i64: 1, 9>, scalar_prefetch = 0 : i64, scratch_operands = 1 : i64, tpu.core_type = #tpu.core_type<tc>, window_params = [{transform_indices = @transform_0, window_bounds = array<i64: 1, 512, 16>}, {transform_indices = @transform_1, window_bounds = array<i64: 1, 16, 16>}, {transform_indices = @transform_2, window_bounds = array<i64: 512, 16>}, {transform_indices = @transform_3, window_bounds = array<i64: 1, 1, 16>}, {transform_indices = @transform_4, window_bounds = array<i64: 1, 1, 16>}]} {
    %c0_i32 = arith.constant 0 : i32
    %0 = arith.cmpi eq, %arg1, %c0_i32 : i32
    %1 = arith.extui %0 : i1 to i32
    %c0_i32_0 = arith.constant 0 : i32
    %2 = arith.cmpi ne, %1, %c0_i32_0 : i32
    scf.if %2 {
      %cst_11 = arith.constant 0.000000e+00 : f32
      %14 = vector.broadcast %cst_11 : f32 to vector<512x16xf32>
      %c0_12 = arith.constant 0 : index
      %c0_13 = arith.constant 0 : index
      %15 = vector.load %arg7[%c0_12, %c0_13] : memref<512x16xf32, #tpu.memory_space<vmem>>, vector<512x16xf32>
      tpu.vector_store %arg7[%c0_12, %c0_13], %14 {strides = array<i32>} : memref<512x16xf32, #tpu.memory_space<vmem>>, vector<512x16xf32>,
    } else {
    }
    %c0 = arith.constant 0 : index
    %c0_1 = arith.constant 0 : index
    %3 = vector.load %arg7[%c0, %c0_1] : memref<512x16xf32, #tpu.memory_space<vmem>>, vector<512x16xf32>
    %c0_2 = arith.constant 0 : index
    %c0_3 = arith.constant 0 : index
    %c0_4 = arith.constant 0 : index
    %4 = vector.load %arg2[%c0_2, %c0_3, %c0_4] : memref<1x512x16xbf16, #tpu.memory_space<vmem>>, vector<1x512x16xbf16>
    %5 = vector.shape_cast %4 : vector<1x512x16xbf16> to vector<512x16xbf16>
    %c0_5 = arith.constant 0 : index
    %c0_6 = arith.constant 0 : index
    %c0_7 = arith.constant 0 : index
    %6 = vector.load %arg3[%c0_5, %c0_6, %c0_7] : memref<1x16x16xbf16, #tpu.memory_space<vmem>>, vector<1x16x16xbf16>
    %7 = vector.shape_cast %6 : vector<1x16x16xbf16> to vector<16x16xbf16>
    %cst = arith.constant dense<0.000000e+00> : vector<512x16xf32>
    %8 = tpu.matmul %5, %7, %cst {dimension_numbers = #tpu.dot_dimension_numbers<[1], [0], [0], [1], [0, 0, 1, 1], [], []>} : vector<512x16xbf16>, vector<16x16xbf16>, vector<512x16xf32> -> vector<512x16xf32>
    %9 = arith.addf %3, %8 : vector<512x16xf32>
    %c0_8 = arith.constant 0 : index
    %c0_9 = arith.constant 0 : index
    %10 = vector.load %arg7[%c0_8, %c0_9] : memref<512x16xf32, #tpu.memory_space<vmem>>, vector<512x16xf32>
    tpu.vector_store %arg7[%c0_8, %c0_9], %9 {strides = array<i32>} : memref<512x16xf32, #tpu.memory_space<vmem>>, vector<512x16xf32>,
    %c8_i32 = arith.constant 8 : i32
    %11 = arith.cmpi eq, %arg1, %c8_i32 : i32
    %12 = arith.extui %11 : i1 to i32
    %c0_i32_10 = arith.constant 0 : i32
    %13 = arith.cmpi ne, %12, %c0_i32_10 : i32
    scf.if %13 {
      %c0_11 = arith.constant 0 : index
      %c0_12 = arith.constant 0 : index
      %14 = vector.load %arg7[%c0_11, %c0_12] : memref<512x16xf32, #tpu.memory_space<vmem>>, vector<512x16xf32>
      %c0_13 = arith.constant 0 : index
      %c0_14 = arith.constant 0 : index
      %15 = vector.load %arg4[%c0_13, %c0_14] : memref<512x16xf32, #tpu.memory_space<vmem>>, vector<512x16xf32>
      tpu.vector_store %arg4[%c0_13, %c0_14], %14 {strides = array<i32>} : memref<512x16xf32, #tpu.memory_space<vmem>>, vector<512x16xf32>,
      %cst_15 = arith.constant dense<0.000000e+00> : vector<16xf32>
      %16 = vector.multi_reduction <add>, %14, %cst_15 [0] : vector<512x16xf32> to vector<16xf32>
      %17 = vector.shape_cast %16 : vector<16xf32> to vector<1x16xf32>
      %18 = vector.shape_cast %17 : vector<1x16xf32> to vector<1x1x16xf32>
      %c0_16 = arith.constant 0 : index
      %c0_17 = arith.constant 0 : index
      %c0_18 = arith.constant 0 : index
      %19 = vector.load %arg5[%c0_16, %c0_17, %c0_18] : memref<1x1x16xf32, #tpu.memory_space<vmem>>, vector<1x1x16xf32>
      tpu.vector_store %arg5[%c0_16, %c0_17, %c0_18], %18 {strides = array<i32>} : memref<1x1x16xf32, #tpu.memory_space<vmem>>, vector<1x1x16xf32>,
      %20 = arith.mulf %14, %14 : vector<512x16xf32>
      %cst_19 = arith.constant dense<0.000000e+00> : vector<16xf32>
      %21 = vector.multi_reduction <add>, %20, %cst_19 [0] : vector<512x16xf32> to vector<16xf32>
      %22 = vector.shape_cast %21 : vector<16xf32> to vector<1x16xf32>
      %23 = vector.shape_cast %22 : vector<1x16xf32> to vector<1x1x16xf32>
      %c0_20 = arith.constant 0 : index
      %c0_21 = arith.constant 0 : index
      %c0_22 = arith.constant 0 : index
      %24 = vector.load %arg6[%c0_20, %c0_21, %c0_22] : memref<1x1x16xf32, #tpu.memory_space<vmem>>, vector<1x1x16xf32>
      tpu.vector_store %arg6[%c0_20, %c0_21, %c0_22], %23 {strides = array<i32>} : memref<1x1x16xf32, #tpu.memory_space<vmem>>, vector<1x1x16xf32>,
    } else {
    }
    return
  }
  func.func @transform_0(%arg0: i32, %arg1: i32) -> (i32, i32, i32) {
    %c0_i32 = arith.constant 0 : i32
    %c0_i32_0 = arith.constant 0 : i32
    return %arg1, %arg0, %c0_i32 : i32, i32, i32
  }
  func.func @transform_1(%arg0: i32, %arg1: i32) -> (i32, i32, i32) {
    %c0_i32 = arith.constant 0 : i32
    %c0_i32_0 = arith.constant 0 : i32
    %c0_i32_1 = arith.constant 0 : i32
    return %arg1, %c0_i32, %c0_i32_0 : i32, i32, i32
  }
  func.func @transform_2(%arg0: i32, %arg1: i32) -> (i32, i32) {
    %c0_i32 = arith.constant 0 : i32
    %c0_i32_0 = arith.constant 0 : i32
    return %arg0, %c0_i32 : i32, i32
  }
  func.func @transform_3(%arg0: i32, %arg1: i32) -> (i32, i32, i32) {
    %c0_i32 = arith.constant 0 : i32
    %c0_i32_0 = arith.constant 0 : i32
    %c0_i32_1 = arith.constant 0 : i32
    return %arg0, %c0_i32, %c0_i32_0 : i32, i32, i32
  }
  func.func @transform_4(%arg0: i32, %arg1: i32) -> (i32, i32, i32) {
    %c0_i32 = arith.constant 0 : i32
    %c0_i32_0 = arith.constant 0 : i32
    %c0_i32_1 = arith.constant 0 : i32
    return %arg0, %c0_i32, %c0_i32_0 : i32, i32, i32
  }
}

module attributes {stable_mosaic.version = 11 : i64} {
  func.func @_bn_act_kernel(%arg0: i32, %arg1: memref<64x128xf32, #tpu.memory_space<vmem>>, %arg2: memref<1x128xf32, #tpu.memory_space<vmem>>, %arg3: memref<1x128xf32, #tpu.memory_space<vmem>>, %arg4: memref<64x128xf32, #tpu.memory_space<vmem>>, %arg5: memref<64x128xf32, #tpu.memory_space<vmem>>) attributes {dimension_semantics = [#tpu.dimension_semantics<parallel>], iteration_bounds = array<i64: 1>, scalar_prefetch = 0 : i64, scratch_operands = 0 : i64, tpu.core_type = #tpu.core_type<tc>, window_params = [{transform_indices = @transform_0, window_bounds = array<i64: 64, 128>}, {pipeline_mode = #tpu.pipeline_mode<synchronous>, transform_indices = @transform_1, window_bounds = array<i64: 1, 128>}, {pipeline_mode = #tpu.pipeline_mode<synchronous>, transform_indices = @transform_2, window_bounds = array<i64: 1, 128>}, {transform_indices = @transform_3, window_bounds = array<i64: 64, 128>}, {transform_indices = @transform_4, window_bounds = array<i64: 64, 128>}]} {
    %c0 = arith.constant 0 : index
    %c0_0 = arith.constant 0 : index
    %0 = vector.load %arg1[%c0, %c0_0] : memref<64x128xf32, #tpu.memory_space<vmem>>, vector<64x128xf32>
    %c0_1 = arith.constant 0 : index
    %c0_2 = arith.constant 0 : index
    %1 = vector.load %arg2[%c0_1, %c0_2] : memref<1x128xf32, #tpu.memory_space<vmem>>, vector<1x128xf32>
    %2 = vector.broadcast %1 : vector<1x128xf32> to vector<64x128xf32>
    %3 = arith.mulf %0, %2 : vector<64x128xf32>
    %c0_3 = arith.constant 0 : index
    %c0_4 = arith.constant 0 : index
    %4 = vector.load %arg3[%c0_3, %c0_4] : memref<1x128xf32, #tpu.memory_space<vmem>>, vector<1x128xf32>
    %5 = vector.broadcast %4 : vector<1x128xf32> to vector<64x128xf32>
    %6 = arith.addf %3, %5 : vector<64x128xf32>
    %c0_5 = arith.constant 0 : index
    %c0_6 = arith.constant 0 : index
    %7 = vector.load %arg4[%c0_5, %c0_6] : memref<64x128xf32, #tpu.memory_space<vmem>>, vector<64x128xf32>
    %8 = arith.addf %6, %7 : vector<64x128xf32>
    %cst = arith.constant 0.000000e+00 : f32
    %9 = vector.broadcast %cst : f32 to vector<64x128xf32>
    %10 = arith.maximumf %8, %9 : vector<64x128xf32>
    %c0_7 = arith.constant 0 : index
    %c0_8 = arith.constant 0 : index
    %11 = vector.load %arg5[%c0_7, %c0_8] : memref<64x128xf32, #tpu.memory_space<vmem>>, vector<64x128xf32>
    tpu.vector_store %arg5[%c0_7, %c0_8], %10 {strides = array<i32>} : memref<64x128xf32, #tpu.memory_space<vmem>>, vector<64x128xf32>,
    return
  }
  func.func @transform_0(%arg0: i32) -> (i32, i32) {
    %c0_i32 = arith.constant 0 : i32
    %c0_i32_0 = arith.constant 0 : i32
    return %arg0, %c0_i32 : i32, i32
  }
  func.func @transform_1(%arg0: i32) -> (i32, i32) {
    %c0_i32 = arith.constant 0 : i32
    %c0_i32_0 = arith.constant 0 : i32
    %c0_i32_1 = arith.constant 0 : i32
    return %c0_i32, %c0_i32_0 : i32, i32
  }
  func.func @transform_2(%arg0: i32) -> (i32, i32) {
    %c0_i32 = arith.constant 0 : i32
    %c0_i32_0 = arith.constant 0 : i32
    %c0_i32_1 = arith.constant 0 : i32
    return %c0_i32, %c0_i32_0 : i32, i32
  }
  func.func @transform_3(%arg0: i32) -> (i32, i32) {
    %c0_i32 = arith.constant 0 : i32
    %c0_i32_0 = arith.constant 0 : i32
    return %arg0, %c0_i32 : i32, i32
  }
  func.func @transform_4(%arg0: i32) -> (i32, i32) {
    %c0_i32 = arith.constant 0 : i32
    %c0_i32_0 = arith.constant 0 : i32
    return %arg0, %c0_i32 : i32, i32
  }
}

module attributes {stable_mosaic.version = 11 : i64} {
  func.func @_conv_pix_kernel(%arg0: i32, %arg1: i32, %arg2: memref<1x128x16xbf16, #tpu.memory_space<vmem>>, %arg3: memref<1x16x32xbf16, #tpu.memory_space<vmem>>, %arg4: memref<128x32xf32, #tpu.memory_space<vmem>>, %arg5: memref<1x1x32xf32, #tpu.memory_space<vmem>>, %arg6: memref<1x1x32xf32, #tpu.memory_space<vmem>>, %arg7: memref<128x32xf32, #tpu.memory_space<vmem>>) attributes {dimension_semantics = [#tpu.dimension_semantics<parallel>, #tpu.dimension_semantics<arbitrary>], iteration_bounds = array<i64: 1, 1>, scalar_prefetch = 0 : i64, scratch_operands = 1 : i64, tpu.core_type = #tpu.core_type<tc>, window_params = [{transform_indices = @transform_0, window_bounds = array<i64: 1, 128, 16>}, {transform_indices = @transform_1, window_bounds = array<i64: 1, 16, 32>}, {transform_indices = @transform_2, window_bounds = array<i64: 128, 32>}, {transform_indices = @transform_3, window_bounds = array<i64: 1, 1, 32>}, {transform_indices = @transform_4, window_bounds = array<i64: 1, 1, 32>}]} {
    %c0_i32 = arith.constant 0 : i32
    %0 = arith.cmpi eq, %arg1, %c0_i32 : i32
    %1 = arith.extui %0 : i1 to i32
    %c0_i32_0 = arith.constant 0 : i32
    %2 = arith.cmpi ne, %1, %c0_i32_0 : i32
    scf.if %2 {
      %cst_12 = arith.constant 0.000000e+00 : f32
      %14 = vector.broadcast %cst_12 : f32 to vector<128x32xf32>
      %c0_13 = arith.constant 0 : index
      %c0_14 = arith.constant 0 : index
      %15 = vector.load %arg7[%c0_13, %c0_14] : memref<128x32xf32, #tpu.memory_space<vmem>>, vector<128x32xf32>
      tpu.vector_store %arg7[%c0_13, %c0_14], %14 {strides = array<i32>} : memref<128x32xf32, #tpu.memory_space<vmem>>, vector<128x32xf32>,
    } else {
    }
    %c0 = arith.constant 0 : index
    %c0_1 = arith.constant 0 : index
    %3 = vector.load %arg7[%c0, %c0_1] : memref<128x32xf32, #tpu.memory_space<vmem>>, vector<128x32xf32>
    %c0_2 = arith.constant 0 : index
    %c0_3 = arith.constant 0 : index
    %c0_4 = arith.constant 0 : index
    %4 = vector.load %arg2[%c0_2, %c0_3, %c0_4] : memref<1x128x16xbf16, #tpu.memory_space<vmem>>, vector<1x128x16xbf16>
    %5 = vector.shape_cast %4 : vector<1x128x16xbf16> to vector<128x16xbf16>
    %c0_5 = arith.constant 0 : index
    %c0_6 = arith.constant 0 : index
    %c0_7 = arith.constant 0 : index
    %6 = vector.load %arg3[%c0_5, %c0_6, %c0_7] : memref<1x16x32xbf16, #tpu.memory_space<vmem>>, vector<1x16x32xbf16>
    %7 = vector.shape_cast %6 : vector<1x16x32xbf16> to vector<16x32xbf16>
    %cst = arith.constant dense<0.000000e+00> : vector<128x32xf32>
    %8 = tpu.matmul %5, %7, %cst {dimension_numbers = #tpu.dot_dimension_numbers<[1], [0], [0], [1], [0, 0, 1, 1], [], []>} : vector<128x16xbf16>, vector<16x32xbf16>, vector<128x32xf32> -> vector<128x32xf32>
    %9 = arith.addf %3, %8 : vector<128x32xf32>
    %c0_8 = arith.constant 0 : index
    %c0_9 = arith.constant 0 : index
    %10 = vector.load %arg7[%c0_8, %c0_9] : memref<128x32xf32, #tpu.memory_space<vmem>>, vector<128x32xf32>
    tpu.vector_store %arg7[%c0_8, %c0_9], %9 {strides = array<i32>} : memref<128x32xf32, #tpu.memory_space<vmem>>, vector<128x32xf32>,
    %c0_i32_10 = arith.constant 0 : i32
    %11 = arith.cmpi eq, %arg1, %c0_i32_10 : i32
    %12 = arith.extui %11 : i1 to i32
    %c0_i32_11 = arith.constant 0 : i32
    %13 = arith.cmpi ne, %12, %c0_i32_11 : i32
    scf.if %13 {
      %c0_12 = arith.constant 0 : index
      %c0_13 = arith.constant 0 : index
      %14 = vector.load %arg7[%c0_12, %c0_13] : memref<128x32xf32, #tpu.memory_space<vmem>>, vector<128x32xf32>
      %c0_14 = arith.constant 0 : index
      %c0_15 = arith.constant 0 : index
      %15 = vector.load %arg4[%c0_14, %c0_15] : memref<128x32xf32, #tpu.memory_space<vmem>>, vector<128x32xf32>
      tpu.vector_store %arg4[%c0_14, %c0_15], %14 {strides = array<i32>} : memref<128x32xf32, #tpu.memory_space<vmem>>, vector<128x32xf32>,
      %cst_16 = arith.constant dense<0.000000e+00> : vector<32xf32>
      %16 = vector.multi_reduction <add>, %14, %cst_16 [0] : vector<128x32xf32> to vector<32xf32>
      %17 = vector.shape_cast %16 : vector<32xf32> to vector<1x32xf32>
      %18 = vector.shape_cast %17 : vector<1x32xf32> to vector<1x1x32xf32>
      %c0_17 = arith.constant 0 : index
      %c0_18 = arith.constant 0 : index
      %c0_19 = arith.constant 0 : index
      %19 = vector.load %arg5[%c0_17, %c0_18, %c0_19] : memref<1x1x32xf32, #tpu.memory_space<vmem>>, vector<1x1x32xf32>
      tpu.vector_store %arg5[%c0_17, %c0_18, %c0_19], %18 {strides = array<i32>} : memref<1x1x32xf32, #tpu.memory_space<vmem>>, vector<1x1x32xf32>,
      %20 = arith.mulf %14, %14 : vector<128x32xf32>
      %cst_20 = arith.constant dense<0.000000e+00> : vector<32xf32>
      %21 = vector.multi_reduction <add>, %20, %cst_20 [0] : vector<128x32xf32> to vector<32xf32>
      %22 = vector.shape_cast %21 : vector<32xf32> to vector<1x32xf32>
      %23 = vector.shape_cast %22 : vector<1x32xf32> to vector<1x1x32xf32>
      %c0_21 = arith.constant 0 : index
      %c0_22 = arith.constant 0 : index
      %c0_23 = arith.constant 0 : index
      %24 = vector.load %arg6[%c0_21, %c0_22, %c0_23] : memref<1x1x32xf32, #tpu.memory_space<vmem>>, vector<1x1x32xf32>
      tpu.vector_store %arg6[%c0_21, %c0_22, %c0_23], %23 {strides = array<i32>} : memref<1x1x32xf32, #tpu.memory_space<vmem>>, vector<1x1x32xf32>,
    } else {
    }
    return
  }
  func.func @transform_0(%arg0: i32, %arg1: i32) -> (i32, i32, i32) {
    %c0_i32 = arith.constant 0 : i32
    %c0_i32_0 = arith.constant 0 : i32
    return %arg1, %arg0, %c0_i32 : i32, i32, i32
  }
  func.func @transform_1(%arg0: i32, %arg1: i32) -> (i32, i32, i32) {
    %c0_i32 = arith.constant 0 : i32
    %c0_i32_0 = arith.constant 0 : i32
    %c0_i32_1 = arith.constant 0 : i32
    return %arg1, %c0_i32, %c0_i32_0 : i32, i32, i32
  }
  func.func @transform_2(%arg0: i32, %arg1: i32) -> (i32, i32) {
    %c0_i32 = arith.constant 0 : i32
    %c0_i32_0 = arith.constant 0 : i32
    return %arg0, %c0_i32 : i32, i32
  }
  func.func @transform_3(%arg0: i32, %arg1: i32) -> (i32, i32, i32) {
    %c0_i32 = arith.constant 0 : i32
    %c0_i32_0 = arith.constant 0 : i32
    %c0_i32_1 = arith.constant 0 : i32
    return %arg0, %c0_i32, %c0_i32_0 : i32, i32, i32
  }
  func.func @transform_4(%arg0: i32, %arg1: i32) -> (i32, i32, i32) {
    %c0_i32 = arith.constant 0 : i32
    %c0_i32_0 = arith.constant 0 : i32
    %c0_i32_1 = arith.constant 0 : i32
    return %arg0, %c0_i32, %c0_i32_0 : i32, i32, i32
  }
}

module attributes {stable_mosaic.version = 11 : i64} {
  func.func @_bn_act_kernel(%arg0: i32, %arg1: memref<32x128xf32, #tpu.memory_space<vmem>>, %arg2: memref<1x128xf32, #tpu.memory_space<vmem>>, %arg3: memref<1x128xf32, #tpu.memory_space<vmem>>, %arg4: memref<32x128xf32, #tpu.memory_space<vmem>>) attributes {dimension_semantics = [#tpu.dimension_semantics<parallel>], iteration_bounds = array<i64: 1>, scalar_prefetch = 0 : i64, scratch_operands = 0 : i64, tpu.core_type = #tpu.core_type<tc>, window_params = [{transform_indices = @transform_0, window_bounds = array<i64: 32, 128>}, {pipeline_mode = #tpu.pipeline_mode<synchronous>, transform_indices = @transform_1, window_bounds = array<i64: 1, 128>}, {pipeline_mode = #tpu.pipeline_mode<synchronous>, transform_indices = @transform_2, window_bounds = array<i64: 1, 128>}, {transform_indices = @transform_3, window_bounds = array<i64: 32, 128>}]} {
    %c0 = arith.constant 0 : index
    %c0_0 = arith.constant 0 : index
    %0 = vector.load %arg1[%c0, %c0_0] : memref<32x128xf32, #tpu.memory_space<vmem>>, vector<32x128xf32>
    %c0_1 = arith.constant 0 : index
    %c0_2 = arith.constant 0 : index
    %1 = vector.load %arg2[%c0_1, %c0_2] : memref<1x128xf32, #tpu.memory_space<vmem>>, vector<1x128xf32>
    %2 = vector.broadcast %1 : vector<1x128xf32> to vector<32x128xf32>
    %3 = arith.mulf %0, %2 : vector<32x128xf32>
    %c0_3 = arith.constant 0 : index
    %c0_4 = arith.constant 0 : index
    %4 = vector.load %arg3[%c0_3, %c0_4] : memref<1x128xf32, #tpu.memory_space<vmem>>, vector<1x128xf32>
    %5 = vector.broadcast %4 : vector<1x128xf32> to vector<32x128xf32>
    %6 = arith.addf %3, %5 : vector<32x128xf32>
    %c0_5 = arith.constant 0 : index
    %c0_6 = arith.constant 0 : index
    %7 = vector.load %arg4[%c0_5, %c0_6] : memref<32x128xf32, #tpu.memory_space<vmem>>, vector<32x128xf32>
    tpu.vector_store %arg4[%c0_5, %c0_6], %6 {strides = array<i32>} : memref<32x128xf32, #tpu.memory_space<vmem>>, vector<32x128xf32>,
    return
  }
  func.func @transform_0(%arg0: i32) -> (i32, i32) {
    %c0_i32 = arith.constant 0 : i32
    %c0_i32_0 = arith.constant 0 : i32
    return %arg0, %c0_i32 : i32, i32
  }
  func.func @transform_1(%arg0: i32) -> (i32, i32) {
    %c0_i32 = arith.constant 0 : i32
    %c0_i32_0 = arith.constant 0 : i32
    %c0_i32_1 = arith.constant 0 : i32
    return %c0_i32, %c0_i32_0 : i32, i32
  }
  func.func @transform_2(%arg0: i32) -> (i32, i32) {
    %c0_i32 = arith.constant 0 : i32
    %c0_i32_0 = arith.constant 0 : i32
    %c0_i32_1 = arith.constant 0 : i32
    return %c0_i32, %c0_i32_0 : i32, i32
  }
  func.func @transform_3(%arg0: i32) -> (i32, i32) {
    %c0_i32 = arith.constant 0 : i32
    %c0_i32_0 = arith.constant 0 : i32
    return %arg0, %c0_i32 : i32, i32
  }
}

module attributes {stable_mosaic.version = 11 : i64} {
  func.func @_bn_act_kernel(%arg0: i32, %arg1: memref<32x128xf32, #tpu.memory_space<vmem>>, %arg2: memref<1x128xf32, #tpu.memory_space<vmem>>, %arg3: memref<1x128xf32, #tpu.memory_space<vmem>>, %arg4: memref<32x128xf32, #tpu.memory_space<vmem>>) attributes {dimension_semantics = [#tpu.dimension_semantics<parallel>], iteration_bounds = array<i64: 1>, scalar_prefetch = 0 : i64, scratch_operands = 0 : i64, tpu.core_type = #tpu.core_type<tc>, window_params = [{transform_indices = @transform_0, window_bounds = array<i64: 32, 128>}, {pipeline_mode = #tpu.pipeline_mode<synchronous>, transform_indices = @transform_1, window_bounds = array<i64: 1, 128>}, {pipeline_mode = #tpu.pipeline_mode<synchronous>, transform_indices = @transform_2, window_bounds = array<i64: 1, 128>}, {transform_indices = @transform_3, window_bounds = array<i64: 32, 128>}]} {
    %c0 = arith.constant 0 : index
    %c0_0 = arith.constant 0 : index
    %0 = vector.load %arg1[%c0, %c0_0] : memref<32x128xf32, #tpu.memory_space<vmem>>, vector<32x128xf32>
    %c0_1 = arith.constant 0 : index
    %c0_2 = arith.constant 0 : index
    %1 = vector.load %arg2[%c0_1, %c0_2] : memref<1x128xf32, #tpu.memory_space<vmem>>, vector<1x128xf32>
    %2 = vector.broadcast %1 : vector<1x128xf32> to vector<32x128xf32>
    %3 = arith.mulf %0, %2 : vector<32x128xf32>
    %c0_3 = arith.constant 0 : index
    %c0_4 = arith.constant 0 : index
    %4 = vector.load %arg3[%c0_3, %c0_4] : memref<1x128xf32, #tpu.memory_space<vmem>>, vector<1x128xf32>
    %5 = vector.broadcast %4 : vector<1x128xf32> to vector<32x128xf32>
    %6 = arith.addf %3, %5 : vector<32x128xf32>
    %cst = arith.constant 0.000000e+00 : f32
    %7 = vector.broadcast %cst : f32 to vector<32x128xf32>
    %8 = arith.maximumf %6, %7 : vector<32x128xf32>
    %c0_5 = arith.constant 0 : index
    %c0_6 = arith.constant 0 : index
    %9 = vector.load %arg4[%c0_5, %c0_6] : memref<32x128xf32, #tpu.memory_space<vmem>>, vector<32x128xf32>
    tpu.vector_store %arg4[%c0_5, %c0_6], %8 {strides = array<i32>} : memref<32x128xf32, #tpu.memory_space<vmem>>, vector<32x128xf32>,
    return
  }
  func.func @transform_0(%arg0: i32) -> (i32, i32) {
    %c0_i32 = arith.constant 0 : i32
    %c0_i32_0 = arith.constant 0 : i32
    return %arg0, %c0_i32 : i32, i32
  }
  func.func @transform_1(%arg0: i32) -> (i32, i32) {
    %c0_i32 = arith.constant 0 : i32
    %c0_i32_0 = arith.constant 0 : i32
    %c0_i32_1 = arith.constant 0 : i32
    return %c0_i32, %c0_i32_0 : i32, i32
  }
  func.func @transform_2(%arg0: i32) -> (i32, i32) {
    %c0_i32 = arith.constant 0 : i32
    %c0_i32_0 = arith.constant 0 : i32
    %c0_i32_1 = arith.constant 0 : i32
    return %c0_i32, %c0_i32_0 : i32, i32
  }
  func.func @transform_3(%arg0: i32) -> (i32, i32) {
    %c0_i32 = arith.constant 0 : i32
    %c0_i32_0 = arith.constant 0 : i32
    return %arg0, %c0_i32 : i32, i32
  }
}

module attributes {stable_mosaic.version = 11 : i64} {
  func.func @_conv_pix_kernel(%arg0: i32, %arg1: i32, %arg2: memref<1x128x16xbf16, #tpu.memory_space<vmem>>, %arg3: memref<1x16x32xbf16, #tpu.memory_space<vmem>>, %arg4: memref<128x32xf32, #tpu.memory_space<vmem>>, %arg5: memref<1x1x32xf32, #tpu.memory_space<vmem>>, %arg6: memref<1x1x32xf32, #tpu.memory_space<vmem>>, %arg7: memref<128x32xf32, #tpu.memory_space<vmem>>) attributes {dimension_semantics = [#tpu.dimension_semantics<parallel>, #tpu.dimension_semantics<arbitrary>], iteration_bounds = array<i64: 1, 9>, scalar_prefetch = 0 : i64, scratch_operands = 1 : i64, tpu.core_type = #tpu.core_type<tc>, window_params = [{transform_indices = @transform_0, window_bounds = array<i64: 1, 128, 16>}, {transform_indices = @transform_1, window_bounds = array<i64: 1, 16, 32>}, {transform_indices = @transform_2, window_bounds = array<i64: 128, 32>}, {transform_indices = @transform_3, window_bounds = array<i64: 1, 1, 32>}, {transform_indices = @transform_4, window_bounds = array<i64: 1, 1, 32>}]} {
    %c0_i32 = arith.constant 0 : i32
    %0 = arith.cmpi eq, %arg1, %c0_i32 : i32
    %1 = arith.extui %0 : i1 to i32
    %c0_i32_0 = arith.constant 0 : i32
    %2 = arith.cmpi ne, %1, %c0_i32_0 : i32
    scf.if %2 {
      %cst_11 = arith.constant 0.000000e+00 : f32
      %14 = vector.broadcast %cst_11 : f32 to vector<128x32xf32>
      %c0_12 = arith.constant 0 : index
      %c0_13 = arith.constant 0 : index
      %15 = vector.load %arg7[%c0_12, %c0_13] : memref<128x32xf32, #tpu.memory_space<vmem>>, vector<128x32xf32>
      tpu.vector_store %arg7[%c0_12, %c0_13], %14 {strides = array<i32>} : memref<128x32xf32, #tpu.memory_space<vmem>>, vector<128x32xf32>,
    } else {
    }
    %c0 = arith.constant 0 : index
    %c0_1 = arith.constant 0 : index
    %3 = vector.load %arg7[%c0, %c0_1] : memref<128x32xf32, #tpu.memory_space<vmem>>, vector<128x32xf32>
    %c0_2 = arith.constant 0 : index
    %c0_3 = arith.constant 0 : index
    %c0_4 = arith.constant 0 : index
    %4 = vector.load %arg2[%c0_2, %c0_3, %c0_4] : memref<1x128x16xbf16, #tpu.memory_space<vmem>>, vector<1x128x16xbf16>
    %5 = vector.shape_cast %4 : vector<1x128x16xbf16> to vector<128x16xbf16>
    %c0_5 = arith.constant 0 : index
    %c0_6 = arith.constant 0 : index
    %c0_7 = arith.constant 0 : index
    %6 = vector.load %arg3[%c0_5, %c0_6, %c0_7] : memref<1x16x32xbf16, #tpu.memory_space<vmem>>, vector<1x16x32xbf16>
    %7 = vector.shape_cast %6 : vector<1x16x32xbf16> to vector<16x32xbf16>
    %cst = arith.constant dense<0.000000e+00> : vector<128x32xf32>
    %8 = tpu.matmul %5, %7, %cst {dimension_numbers = #tpu.dot_dimension_numbers<[1], [0], [0], [1], [0, 0, 1, 1], [], []>} : vector<128x16xbf16>, vector<16x32xbf16>, vector<128x32xf32> -> vector<128x32xf32>
    %9 = arith.addf %3, %8 : vector<128x32xf32>
    %c0_8 = arith.constant 0 : index
    %c0_9 = arith.constant 0 : index
    %10 = vector.load %arg7[%c0_8, %c0_9] : memref<128x32xf32, #tpu.memory_space<vmem>>, vector<128x32xf32>
    tpu.vector_store %arg7[%c0_8, %c0_9], %9 {strides = array<i32>} : memref<128x32xf32, #tpu.memory_space<vmem>>, vector<128x32xf32>,
    %c8_i32 = arith.constant 8 : i32
    %11 = arith.cmpi eq, %arg1, %c8_i32 : i32
    %12 = arith.extui %11 : i1 to i32
    %c0_i32_10 = arith.constant 0 : i32
    %13 = arith.cmpi ne, %12, %c0_i32_10 : i32
    scf.if %13 {
      %c0_11 = arith.constant 0 : index
      %c0_12 = arith.constant 0 : index
      %14 = vector.load %arg7[%c0_11, %c0_12] : memref<128x32xf32, #tpu.memory_space<vmem>>, vector<128x32xf32>
      %c0_13 = arith.constant 0 : index
      %c0_14 = arith.constant 0 : index
      %15 = vector.load %arg4[%c0_13, %c0_14] : memref<128x32xf32, #tpu.memory_space<vmem>>, vector<128x32xf32>
      tpu.vector_store %arg4[%c0_13, %c0_14], %14 {strides = array<i32>} : memref<128x32xf32, #tpu.memory_space<vmem>>, vector<128x32xf32>,
      %cst_15 = arith.constant dense<0.000000e+00> : vector<32xf32>
      %16 = vector.multi_reduction <add>, %14, %cst_15 [0] : vector<128x32xf32> to vector<32xf32>
      %17 = vector.shape_cast %16 : vector<32xf32> to vector<1x32xf32>
      %18 = vector.shape_cast %17 : vector<1x32xf32> to vector<1x1x32xf32>
      %c0_16 = arith.constant 0 : index
      %c0_17 = arith.constant 0 : index
      %c0_18 = arith.constant 0 : index
      %19 = vector.load %arg5[%c0_16, %c0_17, %c0_18] : memref<1x1x32xf32, #tpu.memory_space<vmem>>, vector<1x1x32xf32>
      tpu.vector_store %arg5[%c0_16, %c0_17, %c0_18], %18 {strides = array<i32>} : memref<1x1x32xf32, #tpu.memory_space<vmem>>, vector<1x1x32xf32>,
      %20 = arith.mulf %14, %14 : vector<128x32xf32>
      %cst_19 = arith.constant dense<0.000000e+00> : vector<32xf32>
      %21 = vector.multi_reduction <add>, %20, %cst_19 [0] : vector<128x32xf32> to vector<32xf32>
      %22 = vector.shape_cast %21 : vector<32xf32> to vector<1x32xf32>
      %23 = vector.shape_cast %22 : vector<1x32xf32> to vector<1x1x32xf32>
      %c0_20 = arith.constant 0 : index
      %c0_21 = arith.constant 0 : index
      %c0_22 = arith.constant 0 : index
      %24 = vector.load %arg6[%c0_20, %c0_21, %c0_22] : memref<1x1x32xf32, #tpu.memory_space<vmem>>, vector<1x1x32xf32>
      tpu.vector_store %arg6[%c0_20, %c0_21, %c0_22], %23 {strides = array<i32>} : memref<1x1x32xf32, #tpu.memory_space<vmem>>, vector<1x1x32xf32>,
    } else {
    }
    return
  }
  func.func @transform_0(%arg0: i32, %arg1: i32) -> (i32, i32, i32) {
    %c0_i32 = arith.constant 0 : i32
    %c0_i32_0 = arith.constant 0 : i32
    return %arg1, %arg0, %c0_i32 : i32, i32, i32
  }
  func.func @transform_1(%arg0: i32, %arg1: i32) -> (i32, i32, i32) {
    %c0_i32 = arith.constant 0 : i32
    %c0_i32_0 = arith.constant 0 : i32
    %c0_i32_1 = arith.constant 0 : i32
    return %arg1, %c0_i32, %c0_i32_0 : i32, i32, i32
  }
  func.func @transform_2(%arg0: i32, %arg1: i32) -> (i32, i32) {
    %c0_i32 = arith.constant 0 : i32
    %c0_i32_0 = arith.constant 0 : i32
    return %arg0, %c0_i32 : i32, i32
  }
  func.func @transform_3(%arg0: i32, %arg1: i32) -> (i32, i32, i32) {
    %c0_i32 = arith.constant 0 : i32
    %c0_i32_0 = arith.constant 0 : i32
    %c0_i32_1 = arith.constant 0 : i32
    return %arg0, %c0_i32, %c0_i32_0 : i32, i32, i32
  }
  func.func @transform_4(%arg0: i32, %arg1: i32) -> (i32, i32, i32) {
    %c0_i32 = arith.constant 0 : i32
    %c0_i32_0 = arith.constant 0 : i32
    %c0_i32_1 = arith.constant 0 : i32
    return %arg0, %c0_i32, %c0_i32_0 : i32, i32, i32
  }
}

module attributes {stable_mosaic.version = 11 : i64} {
  func.func @_conv_pix_kernel(%arg0: i32, %arg1: i32, %arg2: memref<1x128x32xbf16, #tpu.memory_space<vmem>>, %arg3: memref<1x32x32xbf16, #tpu.memory_space<vmem>>, %arg4: memref<128x32xf32, #tpu.memory_space<vmem>>, %arg5: memref<1x1x32xf32, #tpu.memory_space<vmem>>, %arg6: memref<1x1x32xf32, #tpu.memory_space<vmem>>, %arg7: memref<128x32xf32, #tpu.memory_space<vmem>>) attributes {dimension_semantics = [#tpu.dimension_semantics<parallel>, #tpu.dimension_semantics<arbitrary>], iteration_bounds = array<i64: 1, 9>, scalar_prefetch = 0 : i64, scratch_operands = 1 : i64, tpu.core_type = #tpu.core_type<tc>, window_params = [{transform_indices = @transform_0, window_bounds = array<i64: 1, 128, 32>}, {transform_indices = @transform_1, window_bounds = array<i64: 1, 32, 32>}, {transform_indices = @transform_2, window_bounds = array<i64: 128, 32>}, {transform_indices = @transform_3, window_bounds = array<i64: 1, 1, 32>}, {transform_indices = @transform_4, window_bounds = array<i64: 1, 1, 32>}]} {
    %c0_i32 = arith.constant 0 : i32
    %0 = arith.cmpi eq, %arg1, %c0_i32 : i32
    %1 = arith.extui %0 : i1 to i32
    %c0_i32_0 = arith.constant 0 : i32
    %2 = arith.cmpi ne, %1, %c0_i32_0 : i32
    scf.if %2 {
      %cst_11 = arith.constant 0.000000e+00 : f32
      %14 = vector.broadcast %cst_11 : f32 to vector<128x32xf32>
      %c0_12 = arith.constant 0 : index
      %c0_13 = arith.constant 0 : index
      %15 = vector.load %arg7[%c0_12, %c0_13] : memref<128x32xf32, #tpu.memory_space<vmem>>, vector<128x32xf32>
      tpu.vector_store %arg7[%c0_12, %c0_13], %14 {strides = array<i32>} : memref<128x32xf32, #tpu.memory_space<vmem>>, vector<128x32xf32>,
    } else {
    }
    %c0 = arith.constant 0 : index
    %c0_1 = arith.constant 0 : index
    %3 = vector.load %arg7[%c0, %c0_1] : memref<128x32xf32, #tpu.memory_space<vmem>>, vector<128x32xf32>
    %c0_2 = arith.constant 0 : index
    %c0_3 = arith.constant 0 : index
    %c0_4 = arith.constant 0 : index
    %4 = vector.load %arg2[%c0_2, %c0_3, %c0_4] : memref<1x128x32xbf16, #tpu.memory_space<vmem>>, vector<1x128x32xbf16>
    %5 = vector.shape_cast %4 : vector<1x128x32xbf16> to vector<128x32xbf16>
    %c0_5 = arith.constant 0 : index
    %c0_6 = arith.constant 0 : index
    %c0_7 = arith.constant 0 : index
    %6 = vector.load %arg3[%c0_5, %c0_6, %c0_7] : memref<1x32x32xbf16, #tpu.memory_space<vmem>>, vector<1x32x32xbf16>
    %7 = vector.shape_cast %6 : vector<1x32x32xbf16> to vector<32x32xbf16>
    %cst = arith.constant dense<0.000000e+00> : vector<128x32xf32>
    %8 = tpu.matmul %5, %7, %cst {dimension_numbers = #tpu.dot_dimension_numbers<[1], [0], [0], [1], [0, 0, 1, 1], [], []>} : vector<128x32xbf16>, vector<32x32xbf16>, vector<128x32xf32> -> vector<128x32xf32>
    %9 = arith.addf %3, %8 : vector<128x32xf32>
    %c0_8 = arith.constant 0 : index
    %c0_9 = arith.constant 0 : index
    %10 = vector.load %arg7[%c0_8, %c0_9] : memref<128x32xf32, #tpu.memory_space<vmem>>, vector<128x32xf32>
    tpu.vector_store %arg7[%c0_8, %c0_9], %9 {strides = array<i32>} : memref<128x32xf32, #tpu.memory_space<vmem>>, vector<128x32xf32>,
    %c8_i32 = arith.constant 8 : i32
    %11 = arith.cmpi eq, %arg1, %c8_i32 : i32
    %12 = arith.extui %11 : i1 to i32
    %c0_i32_10 = arith.constant 0 : i32
    %13 = arith.cmpi ne, %12, %c0_i32_10 : i32
    scf.if %13 {
      %c0_11 = arith.constant 0 : index
      %c0_12 = arith.constant 0 : index
      %14 = vector.load %arg7[%c0_11, %c0_12] : memref<128x32xf32, #tpu.memory_space<vmem>>, vector<128x32xf32>
      %c0_13 = arith.constant 0 : index
      %c0_14 = arith.constant 0 : index
      %15 = vector.load %arg4[%c0_13, %c0_14] : memref<128x32xf32, #tpu.memory_space<vmem>>, vector<128x32xf32>
      tpu.vector_store %arg4[%c0_13, %c0_14], %14 {strides = array<i32>} : memref<128x32xf32, #tpu.memory_space<vmem>>, vector<128x32xf32>,
      %cst_15 = arith.constant dense<0.000000e+00> : vector<32xf32>
      %16 = vector.multi_reduction <add>, %14, %cst_15 [0] : vector<128x32xf32> to vector<32xf32>
      %17 = vector.shape_cast %16 : vector<32xf32> to vector<1x32xf32>
      %18 = vector.shape_cast %17 : vector<1x32xf32> to vector<1x1x32xf32>
      %c0_16 = arith.constant 0 : index
      %c0_17 = arith.constant 0 : index
      %c0_18 = arith.constant 0 : index
      %19 = vector.load %arg5[%c0_16, %c0_17, %c0_18] : memref<1x1x32xf32, #tpu.memory_space<vmem>>, vector<1x1x32xf32>
      tpu.vector_store %arg5[%c0_16, %c0_17, %c0_18], %18 {strides = array<i32>} : memref<1x1x32xf32, #tpu.memory_space<vmem>>, vector<1x1x32xf32>,
      %20 = arith.mulf %14, %14 : vector<128x32xf32>
      %cst_19 = arith.constant dense<0.000000e+00> : vector<32xf32>
      %21 = vector.multi_reduction <add>, %20, %cst_19 [0] : vector<128x32xf32> to vector<32xf32>
      %22 = vector.shape_cast %21 : vector<32xf32> to vector<1x32xf32>
      %23 = vector.shape_cast %22 : vector<1x32xf32> to vector<1x1x32xf32>
      %c0_20 = arith.constant 0 : index
      %c0_21 = arith.constant 0 : index
      %c0_22 = arith.constant 0 : index
      %24 = vector.load %arg6[%c0_20, %c0_21, %c0_22] : memref<1x1x32xf32, #tpu.memory_space<vmem>>, vector<1x1x32xf32>
      tpu.vector_store %arg6[%c0_20, %c0_21, %c0_22], %23 {strides = array<i32>} : memref<1x1x32xf32, #tpu.memory_space<vmem>>, vector<1x1x32xf32>,
    } else {
    }
    return
  }
  func.func @transform_0(%arg0: i32, %arg1: i32) -> (i32, i32, i32) {
    %c0_i32 = arith.constant 0 : i32
    %c0_i32_0 = arith.constant 0 : i32
    return %arg1, %arg0, %c0_i32 : i32, i32, i32
  }
  func.func @transform_1(%arg0: i32, %arg1: i32) -> (i32, i32, i32) {
    %c0_i32 = arith.constant 0 : i32
    %c0_i32_0 = arith.constant 0 : i32
    %c0_i32_1 = arith.constant 0 : i32
    return %arg1, %c0_i32, %c0_i32_0 : i32, i32, i32
  }
  func.func @transform_2(%arg0: i32, %arg1: i32) -> (i32, i32) {
    %c0_i32 = arith.constant 0 : i32
    %c0_i32_0 = arith.constant 0 : i32
    return %arg0, %c0_i32 : i32, i32
  }
  func.func @transform_3(%arg0: i32, %arg1: i32) -> (i32, i32, i32) {
    %c0_i32 = arith.constant 0 : i32
    %c0_i32_0 = arith.constant 0 : i32
    %c0_i32_1 = arith.constant 0 : i32
    return %arg0, %c0_i32, %c0_i32_0 : i32, i32, i32
  }
  func.func @transform_4(%arg0: i32, %arg1: i32) -> (i32, i32, i32) {
    %c0_i32 = arith.constant 0 : i32
    %c0_i32_0 = arith.constant 0 : i32
    %c0_i32_1 = arith.constant 0 : i32
    return %arg0, %c0_i32, %c0_i32_0 : i32, i32, i32
  }
}

module attributes {stable_mosaic.version = 11 : i64} {
  func.func @_bn_act_kernel(%arg0: i32, %arg1: memref<32x128xf32, #tpu.memory_space<vmem>>, %arg2: memref<1x128xf32, #tpu.memory_space<vmem>>, %arg3: memref<1x128xf32, #tpu.memory_space<vmem>>, %arg4: memref<32x128xf32, #tpu.memory_space<vmem>>, %arg5: memref<32x128xf32, #tpu.memory_space<vmem>>) attributes {dimension_semantics = [#tpu.dimension_semantics<parallel>], iteration_bounds = array<i64: 1>, scalar_prefetch = 0 : i64, scratch_operands = 0 : i64, tpu.core_type = #tpu.core_type<tc>, window_params = [{transform_indices = @transform_0, window_bounds = array<i64: 32, 128>}, {pipeline_mode = #tpu.pipeline_mode<synchronous>, transform_indices = @transform_1, window_bounds = array<i64: 1, 128>}, {pipeline_mode = #tpu.pipeline_mode<synchronous>, transform_indices = @transform_2, window_bounds = array<i64: 1, 128>}, {transform_indices = @transform_3, window_bounds = array<i64: 32, 128>}, {transform_indices = @transform_4, window_bounds = array<i64: 32, 128>}]} {
    %c0 = arith.constant 0 : index
    %c0_0 = arith.constant 0 : index
    %0 = vector.load %arg1[%c0, %c0_0] : memref<32x128xf32, #tpu.memory_space<vmem>>, vector<32x128xf32>
    %c0_1 = arith.constant 0 : index
    %c0_2 = arith.constant 0 : index
    %1 = vector.load %arg2[%c0_1, %c0_2] : memref<1x128xf32, #tpu.memory_space<vmem>>, vector<1x128xf32>
    %2 = vector.broadcast %1 : vector<1x128xf32> to vector<32x128xf32>
    %3 = arith.mulf %0, %2 : vector<32x128xf32>
    %c0_3 = arith.constant 0 : index
    %c0_4 = arith.constant 0 : index
    %4 = vector.load %arg3[%c0_3, %c0_4] : memref<1x128xf32, #tpu.memory_space<vmem>>, vector<1x128xf32>
    %5 = vector.broadcast %4 : vector<1x128xf32> to vector<32x128xf32>
    %6 = arith.addf %3, %5 : vector<32x128xf32>
    %c0_5 = arith.constant 0 : index
    %c0_6 = arith.constant 0 : index
    %7 = vector.load %arg4[%c0_5, %c0_6] : memref<32x128xf32, #tpu.memory_space<vmem>>, vector<32x128xf32>
    %8 = arith.addf %6, %7 : vector<32x128xf32>
    %cst = arith.constant 0.000000e+00 : f32
    %9 = vector.broadcast %cst : f32 to vector<32x128xf32>
    %10 = arith.maximumf %8, %9 : vector<32x128xf32>
    %c0_7 = arith.constant 0 : index
    %c0_8 = arith.constant 0 : index
    %11 = vector.load %arg5[%c0_7, %c0_8] : memref<32x128xf32, #tpu.memory_space<vmem>>, vector<32x128xf32>
    tpu.vector_store %arg5[%c0_7, %c0_8], %10 {strides = array<i32>} : memref<32x128xf32, #tpu.memory_space<vmem>>, vector<32x128xf32>,
    return
  }
  func.func @transform_0(%arg0: i32) -> (i32, i32) {
    %c0_i32 = arith.constant 0 : i32
    %c0_i32_0 = arith.constant 0 : i32
    return %arg0, %c0_i32 : i32, i32
  }
  func.func @transform_1(%arg0: i32) -> (i32, i32) {
    %c0_i32 = arith.constant 0 : i32
    %c0_i32_0 = arith.constant 0 : i32
    %c0_i32_1 = arith.constant 0 : i32
    return %c0_i32, %c0_i32_0 : i32, i32
  }
  func.func @transform_2(%arg0: i32) -> (i32, i32) {
    %c0_i32 = arith.constant 0 : i32
    %c0_i32_0 = arith.constant 0 : i32
    %c0_i32_1 = arith.constant 0 : i32
    return %c0_i32, %c0_i32_0 : i32, i32
  }
  func.func @transform_3(%arg0: i32) -> (i32, i32) {
    %c0_i32 = arith.constant 0 : i32
    %c0_i32_0 = arith.constant 0 : i32
    return %arg0, %c0_i32 : i32, i32
  }
  func.func @transform_4(%arg0: i32) -> (i32, i32) {
    %c0_i32 = arith.constant 0 : i32
    %c0_i32_0 = arith.constant 0 : i32
    return %arg0, %c0_i32 : i32, i32
  }
}

module attributes {stable_mosaic.version = 11 : i64} {
  func.func @_conv_pix_kernel(%arg0: i32, %arg1: i32, %arg2: memref<1x32x32xbf16, #tpu.memory_space<vmem>>, %arg3: memref<1x32x64xbf16, #tpu.memory_space<vmem>>, %arg4: memref<32x64xf32, #tpu.memory_space<vmem>>, %arg5: memref<1x1x64xf32, #tpu.memory_space<vmem>>, %arg6: memref<1x1x64xf32, #tpu.memory_space<vmem>>, %arg7: memref<32x64xf32, #tpu.memory_space<vmem>>) attributes {dimension_semantics = [#tpu.dimension_semantics<parallel>, #tpu.dimension_semantics<arbitrary>], iteration_bounds = array<i64: 1, 1>, scalar_prefetch = 0 : i64, scratch_operands = 1 : i64, tpu.core_type = #tpu.core_type<tc>, window_params = [{transform_indices = @transform_0, window_bounds = array<i64: 1, 32, 32>}, {transform_indices = @transform_1, window_bounds = array<i64: 1, 32, 64>}, {transform_indices = @transform_2, window_bounds = array<i64: 32, 64>}, {transform_indices = @transform_3, window_bounds = array<i64: 1, 1, 64>}, {transform_indices = @transform_4, window_bounds = array<i64: 1, 1, 64>}]} {
    %c0_i32 = arith.constant 0 : i32
    %0 = arith.cmpi eq, %arg1, %c0_i32 : i32
    %1 = arith.extui %0 : i1 to i32
    %c0_i32_0 = arith.constant 0 : i32
    %2 = arith.cmpi ne, %1, %c0_i32_0 : i32
    scf.if %2 {
      %cst_12 = arith.constant 0.000000e+00 : f32
      %14 = vector.broadcast %cst_12 : f32 to vector<32x64xf32>
      %c0_13 = arith.constant 0 : index
      %c0_14 = arith.constant 0 : index
      %15 = vector.load %arg7[%c0_13, %c0_14] : memref<32x64xf32, #tpu.memory_space<vmem>>, vector<32x64xf32>
      tpu.vector_store %arg7[%c0_13, %c0_14], %14 {strides = array<i32>} : memref<32x64xf32, #tpu.memory_space<vmem>>, vector<32x64xf32>,
    } else {
    }
    %c0 = arith.constant 0 : index
    %c0_1 = arith.constant 0 : index
    %3 = vector.load %arg7[%c0, %c0_1] : memref<32x64xf32, #tpu.memory_space<vmem>>, vector<32x64xf32>
    %c0_2 = arith.constant 0 : index
    %c0_3 = arith.constant 0 : index
    %c0_4 = arith.constant 0 : index
    %4 = vector.load %arg2[%c0_2, %c0_3, %c0_4] : memref<1x32x32xbf16, #tpu.memory_space<vmem>>, vector<1x32x32xbf16>
    %5 = vector.shape_cast %4 : vector<1x32x32xbf16> to vector<32x32xbf16>
    %c0_5 = arith.constant 0 : index
    %c0_6 = arith.constant 0 : index
    %c0_7 = arith.constant 0 : index
    %6 = vector.load %arg3[%c0_5, %c0_6, %c0_7] : memref<1x32x64xbf16, #tpu.memory_space<vmem>>, vector<1x32x64xbf16>
    %7 = vector.shape_cast %6 : vector<1x32x64xbf16> to vector<32x64xbf16>
    %cst = arith.constant dense<0.000000e+00> : vector<32x64xf32>
    %8 = tpu.matmul %5, %7, %cst {dimension_numbers = #tpu.dot_dimension_numbers<[1], [0], [0], [1], [0, 0, 1, 1], [], []>} : vector<32x32xbf16>, vector<32x64xbf16>, vector<32x64xf32> -> vector<32x64xf32>
    %9 = arith.addf %3, %8 : vector<32x64xf32>
    %c0_8 = arith.constant 0 : index
    %c0_9 = arith.constant 0 : index
    %10 = vector.load %arg7[%c0_8, %c0_9] : memref<32x64xf32, #tpu.memory_space<vmem>>, vector<32x64xf32>
    tpu.vector_store %arg7[%c0_8, %c0_9], %9 {strides = array<i32>} : memref<32x64xf32, #tpu.memory_space<vmem>>, vector<32x64xf32>,
    %c0_i32_10 = arith.constant 0 : i32
    %11 = arith.cmpi eq, %arg1, %c0_i32_10 : i32
    %12 = arith.extui %11 : i1 to i32
    %c0_i32_11 = arith.constant 0 : i32
    %13 = arith.cmpi ne, %12, %c0_i32_11 : i32
    scf.if %13 {
      %c0_12 = arith.constant 0 : index
      %c0_13 = arith.constant 0 : index
      %14 = vector.load %arg7[%c0_12, %c0_13] : memref<32x64xf32, #tpu.memory_space<vmem>>, vector<32x64xf32>
      %c0_14 = arith.constant 0 : index
      %c0_15 = arith.constant 0 : index
      %15 = vector.load %arg4[%c0_14, %c0_15] : memref<32x64xf32, #tpu.memory_space<vmem>>, vector<32x64xf32>
      tpu.vector_store %arg4[%c0_14, %c0_15], %14 {strides = array<i32>} : memref<32x64xf32, #tpu.memory_space<vmem>>, vector<32x64xf32>,
      %cst_16 = arith.constant dense<0.000000e+00> : vector<64xf32>
      %16 = vector.multi_reduction <add>, %14, %cst_16 [0] : vector<32x64xf32> to vector<64xf32>
      %17 = vector.shape_cast %16 : vector<64xf32> to vector<1x64xf32>
      %18 = vector.shape_cast %17 : vector<1x64xf32> to vector<1x1x64xf32>
      %c0_17 = arith.constant 0 : index
      %c0_18 = arith.constant 0 : index
      %c0_19 = arith.constant 0 : index
      %19 = vector.load %arg5[%c0_17, %c0_18, %c0_19] : memref<1x1x64xf32, #tpu.memory_space<vmem>>, vector<1x1x64xf32>
      tpu.vector_store %arg5[%c0_17, %c0_18, %c0_19], %18 {strides = array<i32>} : memref<1x1x64xf32, #tpu.memory_space<vmem>>, vector<1x1x64xf32>,
      %20 = arith.mulf %14, %14 : vector<32x64xf32>
      %cst_20 = arith.constant dense<0.000000e+00> : vector<64xf32>
      %21 = vector.multi_reduction <add>, %20, %cst_20 [0] : vector<32x64xf32> to vector<64xf32>
      %22 = vector.shape_cast %21 : vector<64xf32> to vector<1x64xf32>
      %23 = vector.shape_cast %22 : vector<1x64xf32> to vector<1x1x64xf32>
      %c0_21 = arith.constant 0 : index
      %c0_22 = arith.constant 0 : index
      %c0_23 = arith.constant 0 : index
      %24 = vector.load %arg6[%c0_21, %c0_22, %c0_23] : memref<1x1x64xf32, #tpu.memory_space<vmem>>, vector<1x1x64xf32>
      tpu.vector_store %arg6[%c0_21, %c0_22, %c0_23], %23 {strides = array<i32>} : memref<1x1x64xf32, #tpu.memory_space<vmem>>, vector<1x1x64xf32>,
    } else {
    }
    return
  }
  func.func @transform_0(%arg0: i32, %arg1: i32) -> (i32, i32, i32) {
    %c0_i32 = arith.constant 0 : i32
    %c0_i32_0 = arith.constant 0 : i32
    return %arg1, %arg0, %c0_i32 : i32, i32, i32
  }
  func.func @transform_1(%arg0: i32, %arg1: i32) -> (i32, i32, i32) {
    %c0_i32 = arith.constant 0 : i32
    %c0_i32_0 = arith.constant 0 : i32
    %c0_i32_1 = arith.constant 0 : i32
    return %arg1, %c0_i32, %c0_i32_0 : i32, i32, i32
  }
  func.func @transform_2(%arg0: i32, %arg1: i32) -> (i32, i32) {
    %c0_i32 = arith.constant 0 : i32
    %c0_i32_0 = arith.constant 0 : i32
    return %arg0, %c0_i32 : i32, i32
  }
  func.func @transform_3(%arg0: i32, %arg1: i32) -> (i32, i32, i32) {
    %c0_i32 = arith.constant 0 : i32
    %c0_i32_0 = arith.constant 0 : i32
    %c0_i32_1 = arith.constant 0 : i32
    return %arg0, %c0_i32, %c0_i32_0 : i32, i32, i32
  }
  func.func @transform_4(%arg0: i32, %arg1: i32) -> (i32, i32, i32) {
    %c0_i32 = arith.constant 0 : i32
    %c0_i32_0 = arith.constant 0 : i32
    %c0_i32_1 = arith.constant 0 : i32
    return %arg0, %c0_i32, %c0_i32_0 : i32, i32, i32
  }
}

module attributes {stable_mosaic.version = 11 : i64} {
  func.func @_bn_act_kernel(%arg0: i32, %arg1: memref<16x128xf32, #tpu.memory_space<vmem>>, %arg2: memref<1x128xf32, #tpu.memory_space<vmem>>, %arg3: memref<1x128xf32, #tpu.memory_space<vmem>>, %arg4: memref<16x128xf32, #tpu.memory_space<vmem>>) attributes {dimension_semantics = [#tpu.dimension_semantics<parallel>], iteration_bounds = array<i64: 1>, scalar_prefetch = 0 : i64, scratch_operands = 0 : i64, tpu.core_type = #tpu.core_type<tc>, window_params = [{transform_indices = @transform_0, window_bounds = array<i64: 16, 128>}, {pipeline_mode = #tpu.pipeline_mode<synchronous>, transform_indices = @transform_1, window_bounds = array<i64: 1, 128>}, {pipeline_mode = #tpu.pipeline_mode<synchronous>, transform_indices = @transform_2, window_bounds = array<i64: 1, 128>}, {transform_indices = @transform_3, window_bounds = array<i64: 16, 128>}]} {
    %c0 = arith.constant 0 : index
    %c0_0 = arith.constant 0 : index
    %0 = vector.load %arg1[%c0, %c0_0] : memref<16x128xf32, #tpu.memory_space<vmem>>, vector<16x128xf32>
    %c0_1 = arith.constant 0 : index
    %c0_2 = arith.constant 0 : index
    %1 = vector.load %arg2[%c0_1, %c0_2] : memref<1x128xf32, #tpu.memory_space<vmem>>, vector<1x128xf32>
    %2 = vector.broadcast %1 : vector<1x128xf32> to vector<16x128xf32>
    %3 = arith.mulf %0, %2 : vector<16x128xf32>
    %c0_3 = arith.constant 0 : index
    %c0_4 = arith.constant 0 : index
    %4 = vector.load %arg3[%c0_3, %c0_4] : memref<1x128xf32, #tpu.memory_space<vmem>>, vector<1x128xf32>
    %5 = vector.broadcast %4 : vector<1x128xf32> to vector<16x128xf32>
    %6 = arith.addf %3, %5 : vector<16x128xf32>
    %c0_5 = arith.constant 0 : index
    %c0_6 = arith.constant 0 : index
    %7 = vector.load %arg4[%c0_5, %c0_6] : memref<16x128xf32, #tpu.memory_space<vmem>>, vector<16x128xf32>
    tpu.vector_store %arg4[%c0_5, %c0_6], %6 {strides = array<i32>} : memref<16x128xf32, #tpu.memory_space<vmem>>, vector<16x128xf32>,
    return
  }
  func.func @transform_0(%arg0: i32) -> (i32, i32) {
    %c0_i32 = arith.constant 0 : i32
    %c0_i32_0 = arith.constant 0 : i32
    return %arg0, %c0_i32 : i32, i32
  }
  func.func @transform_1(%arg0: i32) -> (i32, i32) {
    %c0_i32 = arith.constant 0 : i32
    %c0_i32_0 = arith.constant 0 : i32
    %c0_i32_1 = arith.constant 0 : i32
    return %c0_i32, %c0_i32_0 : i32, i32
  }
  func.func @transform_2(%arg0: i32) -> (i32, i32) {
    %c0_i32 = arith.constant 0 : i32
    %c0_i32_0 = arith.constant 0 : i32
    %c0_i32_1 = arith.constant 0 : i32
    return %c0_i32, %c0_i32_0 : i32, i32
  }
  func.func @transform_3(%arg0: i32) -> (i32, i32) {
    %c0_i32 = arith.constant 0 : i32
    %c0_i32_0 = arith.constant 0 : i32
    return %arg0, %c0_i32 : i32, i32
  }
}

module attributes {stable_mosaic.version = 11 : i64} {
  func.func @_conv_pix_kernel(%arg0: i32, %arg1: i32, %arg2: memref<1x32x32xbf16, #tpu.memory_space<vmem>>, %arg3: memref<1x32x64xbf16, #tpu.memory_space<vmem>>, %arg4: memref<32x64xf32, #tpu.memory_space<vmem>>, %arg5: memref<1x1x64xf32, #tpu.memory_space<vmem>>, %arg6: memref<1x1x64xf32, #tpu.memory_space<vmem>>, %arg7: memref<32x64xf32, #tpu.memory_space<vmem>>) attributes {dimension_semantics = [#tpu.dimension_semantics<parallel>, #tpu.dimension_semantics<arbitrary>], iteration_bounds = array<i64: 1, 9>, scalar_prefetch = 0 : i64, scratch_operands = 1 : i64, tpu.core_type = #tpu.core_type<tc>, window_params = [{transform_indices = @transform_0, window_bounds = array<i64: 1, 32, 32>}, {transform_indices = @transform_1, window_bounds = array<i64: 1, 32, 64>}, {transform_indices = @transform_2, window_bounds = array<i64: 32, 64>}, {transform_indices = @transform_3, window_bounds = array<i64: 1, 1, 64>}, {transform_indices = @transform_4, window_bounds = array<i64: 1, 1, 64>}]} {
    %c0_i32 = arith.constant 0 : i32
    %0 = arith.cmpi eq, %arg1, %c0_i32 : i32
    %1 = arith.extui %0 : i1 to i32
    %c0_i32_0 = arith.constant 0 : i32
    %2 = arith.cmpi ne, %1, %c0_i32_0 : i32
    scf.if %2 {
      %cst_11 = arith.constant 0.000000e+00 : f32
      %14 = vector.broadcast %cst_11 : f32 to vector<32x64xf32>
      %c0_12 = arith.constant 0 : index
      %c0_13 = arith.constant 0 : index
      %15 = vector.load %arg7[%c0_12, %c0_13] : memref<32x64xf32, #tpu.memory_space<vmem>>, vector<32x64xf32>
      tpu.vector_store %arg7[%c0_12, %c0_13], %14 {strides = array<i32>} : memref<32x64xf32, #tpu.memory_space<vmem>>, vector<32x64xf32>,
    } else {
    }
    %c0 = arith.constant 0 : index
    %c0_1 = arith.constant 0 : index
    %3 = vector.load %arg7[%c0, %c0_1] : memref<32x64xf32, #tpu.memory_space<vmem>>, vector<32x64xf32>
    %c0_2 = arith.constant 0 : index
    %c0_3 = arith.constant 0 : index
    %c0_4 = arith.constant 0 : index
    %4 = vector.load %arg2[%c0_2, %c0_3, %c0_4] : memref<1x32x32xbf16, #tpu.memory_space<vmem>>, vector<1x32x32xbf16>
    %5 = vector.shape_cast %4 : vector<1x32x32xbf16> to vector<32x32xbf16>
    %c0_5 = arith.constant 0 : index
    %c0_6 = arith.constant 0 : index
    %c0_7 = arith.constant 0 : index
    %6 = vector.load %arg3[%c0_5, %c0_6, %c0_7] : memref<1x32x64xbf16, #tpu.memory_space<vmem>>, vector<1x32x64xbf16>
    %7 = vector.shape_cast %6 : vector<1x32x64xbf16> to vector<32x64xbf16>
    %cst = arith.constant dense<0.000000e+00> : vector<32x64xf32>
    %8 = tpu.matmul %5, %7, %cst {dimension_numbers = #tpu.dot_dimension_numbers<[1], [0], [0], [1], [0, 0, 1, 1], [], []>} : vector<32x32xbf16>, vector<32x64xbf16>, vector<32x64xf32> -> vector<32x64xf32>
    %9 = arith.addf %3, %8 : vector<32x64xf32>
    %c0_8 = arith.constant 0 : index
    %c0_9 = arith.constant 0 : index
    %10 = vector.load %arg7[%c0_8, %c0_9] : memref<32x64xf32, #tpu.memory_space<vmem>>, vector<32x64xf32>
    tpu.vector_store %arg7[%c0_8, %c0_9], %9 {strides = array<i32>} : memref<32x64xf32, #tpu.memory_space<vmem>>, vector<32x64xf32>,
    %c8_i32 = arith.constant 8 : i32
    %11 = arith.cmpi eq, %arg1, %c8_i32 : i32
    %12 = arith.extui %11 : i1 to i32
    %c0_i32_10 = arith.constant 0 : i32
    %13 = arith.cmpi ne, %12, %c0_i32_10 : i32
    scf.if %13 {
      %c0_11 = arith.constant 0 : index
      %c0_12 = arith.constant 0 : index
      %14 = vector.load %arg7[%c0_11, %c0_12] : memref<32x64xf32, #tpu.memory_space<vmem>>, vector<32x64xf32>
      %c0_13 = arith.constant 0 : index
      %c0_14 = arith.constant 0 : index
      %15 = vector.load %arg4[%c0_13, %c0_14] : memref<32x64xf32, #tpu.memory_space<vmem>>, vector<32x64xf32>
      tpu.vector_store %arg4[%c0_13, %c0_14], %14 {strides = array<i32>} : memref<32x64xf32, #tpu.memory_space<vmem>>, vector<32x64xf32>,
      %cst_15 = arith.constant dense<0.000000e+00> : vector<64xf32>
      %16 = vector.multi_reduction <add>, %14, %cst_15 [0] : vector<32x64xf32> to vector<64xf32>
      %17 = vector.shape_cast %16 : vector<64xf32> to vector<1x64xf32>
      %18 = vector.shape_cast %17 : vector<1x64xf32> to vector<1x1x64xf32>
      %c0_16 = arith.constant 0 : index
      %c0_17 = arith.constant 0 : index
      %c0_18 = arith.constant 0 : index
      %19 = vector.load %arg5[%c0_16, %c0_17, %c0_18] : memref<1x1x64xf32, #tpu.memory_space<vmem>>, vector<1x1x64xf32>
      tpu.vector_store %arg5[%c0_16, %c0_17, %c0_18], %18 {strides = array<i32>} : memref<1x1x64xf32, #tpu.memory_space<vmem>>, vector<1x1x64xf32>,
      %20 = arith.mulf %14, %14 : vector<32x64xf32>
      %cst_19 = arith.constant dense<0.000000e+00> : vector<64xf32>
      %21 = vector.multi_reduction <add>, %20, %cst_19 [0] : vector<32x64xf32> to vector<64xf32>
      %22 = vector.shape_cast %21 : vector<64xf32> to vector<1x64xf32>
      %23 = vector.shape_cast %22 : vector<1x64xf32> to vector<1x1x64xf32>
      %c0_20 = arith.constant 0 : index
      %c0_21 = arith.constant 0 : index
      %c0_22 = arith.constant 0 : index
      %24 = vector.load %arg6[%c0_20, %c0_21, %c0_22] : memref<1x1x64xf32, #tpu.memory_space<vmem>>, vector<1x1x64xf32>
      tpu.vector_store %arg6[%c0_20, %c0_21, %c0_22], %23 {strides = array<i32>} : memref<1x1x64xf32, #tpu.memory_space<vmem>>, vector<1x1x64xf32>,
    } else {
    }
    return
  }
  func.func @transform_0(%arg0: i32, %arg1: i32) -> (i32, i32, i32) {
    %c0_i32 = arith.constant 0 : i32
    %c0_i32_0 = arith.constant 0 : i32
    return %arg1, %arg0, %c0_i32 : i32, i32, i32
  }
  func.func @transform_1(%arg0: i32, %arg1: i32) -> (i32, i32, i32) {
    %c0_i32 = arith.constant 0 : i32
    %c0_i32_0 = arith.constant 0 : i32
    %c0_i32_1 = arith.constant 0 : i32
    return %arg1, %c0_i32, %c0_i32_0 : i32, i32, i32
  }
  func.func @transform_2(%arg0: i32, %arg1: i32) -> (i32, i32) {
    %c0_i32 = arith.constant 0 : i32
    %c0_i32_0 = arith.constant 0 : i32
    return %arg0, %c0_i32 : i32, i32
  }
  func.func @transform_3(%arg0: i32, %arg1: i32) -> (i32, i32, i32) {
    %c0_i32 = arith.constant 0 : i32
    %c0_i32_0 = arith.constant 0 : i32
    %c0_i32_1 = arith.constant 0 : i32
    return %arg0, %c0_i32, %c0_i32_0 : i32, i32, i32
  }
  func.func @transform_4(%arg0: i32, %arg1: i32) -> (i32, i32, i32) {
    %c0_i32 = arith.constant 0 : i32
    %c0_i32_0 = arith.constant 0 : i32
    %c0_i32_1 = arith.constant 0 : i32
    return %arg0, %c0_i32, %c0_i32_0 : i32, i32, i32
  }
}

module attributes {stable_mosaic.version = 11 : i64} {
  func.func @_bn_act_kernel(%arg0: i32, %arg1: memref<16x128xf32, #tpu.memory_space<vmem>>, %arg2: memref<1x128xf32, #tpu.memory_space<vmem>>, %arg3: memref<1x128xf32, #tpu.memory_space<vmem>>, %arg4: memref<16x128xf32, #tpu.memory_space<vmem>>) attributes {dimension_semantics = [#tpu.dimension_semantics<parallel>], iteration_bounds = array<i64: 1>, scalar_prefetch = 0 : i64, scratch_operands = 0 : i64, tpu.core_type = #tpu.core_type<tc>, window_params = [{transform_indices = @transform_0, window_bounds = array<i64: 16, 128>}, {pipeline_mode = #tpu.pipeline_mode<synchronous>, transform_indices = @transform_1, window_bounds = array<i64: 1, 128>}, {pipeline_mode = #tpu.pipeline_mode<synchronous>, transform_indices = @transform_2, window_bounds = array<i64: 1, 128>}, {transform_indices = @transform_3, window_bounds = array<i64: 16, 128>}]} {
    %c0 = arith.constant 0 : index
    %c0_0 = arith.constant 0 : index
    %0 = vector.load %arg1[%c0, %c0_0] : memref<16x128xf32, #tpu.memory_space<vmem>>, vector<16x128xf32>
    %c0_1 = arith.constant 0 : index
    %c0_2 = arith.constant 0 : index
    %1 = vector.load %arg2[%c0_1, %c0_2] : memref<1x128xf32, #tpu.memory_space<vmem>>, vector<1x128xf32>
    %2 = vector.broadcast %1 : vector<1x128xf32> to vector<16x128xf32>
    %3 = arith.mulf %0, %2 : vector<16x128xf32>
    %c0_3 = arith.constant 0 : index
    %c0_4 = arith.constant 0 : index
    %4 = vector.load %arg3[%c0_3, %c0_4] : memref<1x128xf32, #tpu.memory_space<vmem>>, vector<1x128xf32>
    %5 = vector.broadcast %4 : vector<1x128xf32> to vector<16x128xf32>
    %6 = arith.addf %3, %5 : vector<16x128xf32>
    %cst = arith.constant 0.000000e+00 : f32
    %7 = vector.broadcast %cst : f32 to vector<16x128xf32>
    %8 = arith.maximumf %6, %7 : vector<16x128xf32>
    %c0_5 = arith.constant 0 : index
    %c0_6 = arith.constant 0 : index
    %9 = vector.load %arg4[%c0_5, %c0_6] : memref<16x128xf32, #tpu.memory_space<vmem>>, vector<16x128xf32>
    tpu.vector_store %arg4[%c0_5, %c0_6], %8 {strides = array<i32>} : memref<16x128xf32, #tpu.memory_space<vmem>>, vector<16x128xf32>,
    return
  }
  func.func @transform_0(%arg0: i32) -> (i32, i32) {
    %c0_i32 = arith.constant 0 : i32
    %c0_i32_0 = arith.constant 0 : i32
    return %arg0, %c0_i32 : i32, i32
  }
  func.func @transform_1(%arg0: i32) -> (i32, i32) {
    %c0_i32 = arith.constant 0 : i32
    %c0_i32_0 = arith.constant 0 : i32
    %c0_i32_1 = arith.constant 0 : i32
    return %c0_i32, %c0_i32_0 : i32, i32
  }
  func.func @transform_2(%arg0: i32) -> (i32, i32) {
    %c0_i32 = arith.constant 0 : i32
    %c0_i32_0 = arith.constant 0 : i32
    %c0_i32_1 = arith.constant 0 : i32
    return %c0_i32, %c0_i32_0 : i32, i32
  }
  func.func @transform_3(%arg0: i32) -> (i32, i32) {
    %c0_i32 = arith.constant 0 : i32
    %c0_i32_0 = arith.constant 0 : i32
    return %arg0, %c0_i32 : i32, i32
  }
}

module attributes {stable_mosaic.version = 11 : i64} {
  func.func @_bn_act_kernel(%arg0: i32, %arg1: memref<16x128xf32, #tpu.memory_space<vmem>>, %arg2: memref<1x128xf32, #tpu.memory_space<vmem>>, %arg3: memref<1x128xf32, #tpu.memory_space<vmem>>, %arg4: memref<16x128xf32, #tpu.memory_space<vmem>>, %arg5: memref<16x128xf32, #tpu.memory_space<vmem>>) attributes {dimension_semantics = [#tpu.dimension_semantics<parallel>], iteration_bounds = array<i64: 1>, scalar_prefetch = 0 : i64, scratch_operands = 0 : i64, tpu.core_type = #tpu.core_type<tc>, window_params = [{transform_indices = @transform_0, window_bounds = array<i64: 16, 128>}, {pipeline_mode = #tpu.pipeline_mode<synchronous>, transform_indices = @transform_1, window_bounds = array<i64: 1, 128>}, {pipeline_mode = #tpu.pipeline_mode<synchronous>, transform_indices = @transform_2, window_bounds = array<i64: 1, 128>}, {transform_indices = @transform_3, window_bounds = array<i64: 16, 128>}, {transform_indices = @transform_4, window_bounds = array<i64: 16, 128>}]} {
    %c0 = arith.constant 0 : index
    %c0_0 = arith.constant 0 : index
    %0 = vector.load %arg1[%c0, %c0_0] : memref<16x128xf32, #tpu.memory_space<vmem>>, vector<16x128xf32>
    %c0_1 = arith.constant 0 : index
    %c0_2 = arith.constant 0 : index
    %1 = vector.load %arg2[%c0_1, %c0_2] : memref<1x128xf32, #tpu.memory_space<vmem>>, vector<1x128xf32>
    %2 = vector.broadcast %1 : vector<1x128xf32> to vector<16x128xf32>
    %3 = arith.mulf %0, %2 : vector<16x128xf32>
    %c0_3 = arith.constant 0 : index
    %c0_4 = arith.constant 0 : index
    %4 = vector.load %arg3[%c0_3, %c0_4] : memref<1x128xf32, #tpu.memory_space<vmem>>, vector<1x128xf32>
    %5 = vector.broadcast %4 : vector<1x128xf32> to vector<16x128xf32>
    %6 = arith.addf %3, %5 : vector<16x128xf32>
    %c0_5 = arith.constant 0 : index
    %c0_6 = arith.constant 0 : index
    %7 = vector.load %arg4[%c0_5, %c0_6] : memref<16x128xf32, #tpu.memory_space<vmem>>, vector<16x128xf32>
    %8 = arith.addf %6, %7 : vector<16x128xf32>
    %cst = arith.constant 0.000000e+00 : f32
    %9 = vector.broadcast %cst : f32 to vector<16x128xf32>
    %10 = arith.maximumf %8, %9 : vector<16x128xf32>
    %c0_7 = arith.constant 0 : index
    %c0_8 = arith.constant 0 : index
    %11 = vector.load %arg5[%c0_7, %c0_8] : memref<16x128xf32, #tpu.memory_space<vmem>>, vector<16x128xf32>
    tpu.vector_store %arg5[%c0_7, %c0_8], %10 {strides = array<i32>} : memref<16x128xf32, #tpu.memory_space<vmem>>, vector<16x128xf32>,
    return
  }
  func.func @transform_0(%arg0: i32) -> (i32, i32) {
    %c0_i32 = arith.constant 0 : i32
    %c0_i32_0 = arith.constant 0 : i32
    return %arg0, %c0_i32 : i32, i32
  }
  func.func @transform_1(%arg0: i32) -> (i32, i32) {
    %c0_i32 = arith.constant 0 : i32
    %c0_i32_0 = arith.constant 0 : i32
    %c0_i32_1 = arith.constant 0 : i32
    return %c0_i32, %c0_i32_0 : i32, i32
  }
  func.func @transform_2(%arg0: i32) -> (i32, i32) {
    %c0_i32 = arith.constant 0 : i32
    %c0_i32_0 = arith.constant 0 : i32
    %c0_i32_1 = arith.constant 0 : i32
    return %c0_i32, %c0_i32_0 : i32, i32
  }
  func.func @transform_3(%arg0: i32) -> (i32, i32) {
    %c0_i32 = arith.constant 0 : i32
    %c0_i32_0 = arith.constant 0 : i32
    return %arg0, %c0_i32 : i32, i32
  }
  func.func @transform_4(%arg0: i32) -> (i32, i32) {
    %c0_i32 = arith.constant 0 : i32
    %c0_i32_0 = arith.constant 0 : i32
    return %arg0, %c0_i32 : i32, i32
  }
}

module attributes {stable_mosaic.version = 11 : i64} {
  func.func @_conv_pix_kernel(%arg0: i32, %arg1: i32, %arg2: memref<1x32x64xbf16, #tpu.memory_space<vmem>>, %arg3: memref<1x64x64xbf16, #tpu.memory_space<vmem>>, %arg4: memref<32x64xf32, #tpu.memory_space<vmem>>, %arg5: memref<1x1x64xf32, #tpu.memory_space<vmem>>, %arg6: memref<1x1x64xf32, #tpu.memory_space<vmem>>, %arg7: memref<32x64xf32, #tpu.memory_space<vmem>>) attributes {dimension_semantics = [#tpu.dimension_semantics<parallel>, #tpu.dimension_semantics<arbitrary>], iteration_bounds = array<i64: 1, 9>, scalar_prefetch = 0 : i64, scratch_operands = 1 : i64, tpu.core_type = #tpu.core_type<tc>, window_params = [{transform_indices = @transform_0, window_bounds = array<i64: 1, 32, 64>}, {transform_indices = @transform_1, window_bounds = array<i64: 1, 64, 64>}, {transform_indices = @transform_2, window_bounds = array<i64: 32, 64>}, {transform_indices = @transform_3, window_bounds = array<i64: 1, 1, 64>}, {transform_indices = @transform_4, window_bounds = array<i64: 1, 1, 64>}]} {
    %c0_i32 = arith.constant 0 : i32
    %0 = arith.cmpi eq, %arg1, %c0_i32 : i32
    %1 = arith.extui %0 : i1 to i32
    %c0_i32_0 = arith.constant 0 : i32
    %2 = arith.cmpi ne, %1, %c0_i32_0 : i32
    scf.if %2 {
      %cst_11 = arith.constant 0.000000e+00 : f32
      %14 = vector.broadcast %cst_11 : f32 to vector<32x64xf32>
      %c0_12 = arith.constant 0 : index
      %c0_13 = arith.constant 0 : index
      %15 = vector.load %arg7[%c0_12, %c0_13] : memref<32x64xf32, #tpu.memory_space<vmem>>, vector<32x64xf32>
      tpu.vector_store %arg7[%c0_12, %c0_13], %14 {strides = array<i32>} : memref<32x64xf32, #tpu.memory_space<vmem>>, vector<32x64xf32>,
    } else {
    }
    %c0 = arith.constant 0 : index
    %c0_1 = arith.constant 0 : index
    %3 = vector.load %arg7[%c0, %c0_1] : memref<32x64xf32, #tpu.memory_space<vmem>>, vector<32x64xf32>
    %c0_2 = arith.constant 0 : index
    %c0_3 = arith.constant 0 : index
    %c0_4 = arith.constant 0 : index
    %4 = vector.load %arg2[%c0_2, %c0_3, %c0_4] : memref<1x32x64xbf16, #tpu.memory_space<vmem>>, vector<1x32x64xbf16>
    %5 = vector.shape_cast %4 : vector<1x32x64xbf16> to vector<32x64xbf16>
    %c0_5 = arith.constant 0 : index
    %c0_6 = arith.constant 0 : index
    %c0_7 = arith.constant 0 : index
    %6 = vector.load %arg3[%c0_5, %c0_6, %c0_7] : memref<1x64x64xbf16, #tpu.memory_space<vmem>>, vector<1x64x64xbf16>
    %7 = vector.shape_cast %6 : vector<1x64x64xbf16> to vector<64x64xbf16>
    %cst = arith.constant dense<0.000000e+00> : vector<32x64xf32>
    %8 = tpu.matmul %5, %7, %cst {dimension_numbers = #tpu.dot_dimension_numbers<[1], [0], [0], [1], [0, 0, 1, 1], [], []>} : vector<32x64xbf16>, vector<64x64xbf16>, vector<32x64xf32> -> vector<32x64xf32>
    %9 = arith.addf %3, %8 : vector<32x64xf32>
    %c0_8 = arith.constant 0 : index
    %c0_9 = arith.constant 0 : index
    %10 = vector.load %arg7[%c0_8, %c0_9] : memref<32x64xf32, #tpu.memory_space<vmem>>, vector<32x64xf32>
    tpu.vector_store %arg7[%c0_8, %c0_9], %9 {strides = array<i32>} : memref<32x64xf32, #tpu.memory_space<vmem>>, vector<32x64xf32>,
    %c8_i32 = arith.constant 8 : i32
    %11 = arith.cmpi eq, %arg1, %c8_i32 : i32
    %12 = arith.extui %11 : i1 to i32
    %c0_i32_10 = arith.constant 0 : i32
    %13 = arith.cmpi ne, %12, %c0_i32_10 : i32
    scf.if %13 {
      %c0_11 = arith.constant 0 : index
      %c0_12 = arith.constant 0 : index
      %14 = vector.load %arg7[%c0_11, %c0_12] : memref<32x64xf32, #tpu.memory_space<vmem>>, vector<32x64xf32>
      %c0_13 = arith.constant 0 : index
      %c0_14 = arith.constant 0 : index
      %15 = vector.load %arg4[%c0_13, %c0_14] : memref<32x64xf32, #tpu.memory_space<vmem>>, vector<32x64xf32>
      tpu.vector_store %arg4[%c0_13, %c0_14], %14 {strides = array<i32>} : memref<32x64xf32, #tpu.memory_space<vmem>>, vector<32x64xf32>,
      %cst_15 = arith.constant dense<0.000000e+00> : vector<64xf32>
      %16 = vector.multi_reduction <add>, %14, %cst_15 [0] : vector<32x64xf32> to vector<64xf32>
      %17 = vector.shape_cast %16 : vector<64xf32> to vector<1x64xf32>
      %18 = vector.shape_cast %17 : vector<1x64xf32> to vector<1x1x64xf32>
      %c0_16 = arith.constant 0 : index
      %c0_17 = arith.constant 0 : index
      %c0_18 = arith.constant 0 : index
      %19 = vector.load %arg5[%c0_16, %c0_17, %c0_18] : memref<1x1x64xf32, #tpu.memory_space<vmem>>, vector<1x1x64xf32>
      tpu.vector_store %arg5[%c0_16, %c0_17, %c0_18], %18 {strides = array<i32>} : memref<1x1x64xf32, #tpu.memory_space<vmem>>, vector<1x1x64xf32>,
      %20 = arith.mulf %14, %14 : vector<32x64xf32>
      %cst_19 = arith.constant dense<0.000000e+00> : vector<64xf32>
      %21 = vector.multi_reduction <add>, %20, %cst_19 [0] : vector<32x64xf32> to vector<64xf32>
      %22 = vector.shape_cast %21 : vector<64xf32> to vector<1x64xf32>
      %23 = vector.shape_cast %22 : vector<1x64xf32> to vector<1x1x64xf32>
      %c0_20 = arith.constant 0 : index
      %c0_21 = arith.constant 0 : index
      %c0_22 = arith.constant 0 : index
      %24 = vector.load %arg6[%c0_20, %c0_21, %c0_22] : memref<1x1x64xf32, #tpu.memory_space<vmem>>, vector<1x1x64xf32>
      tpu.vector_store %arg6[%c0_20, %c0_21, %c0_22], %23 {strides = array<i32>} : memref<1x1x64xf32, #tpu.memory_space<vmem>>, vector<1x1x64xf32>,
    } else {
    }
    return
  }
  func.func @transform_0(%arg0: i32, %arg1: i32) -> (i32, i32, i32) {
    %c0_i32 = arith.constant 0 : i32
    %c0_i32_0 = arith.constant 0 : i32
    return %arg1, %arg0, %c0_i32 : i32, i32, i32
  }
  func.func @transform_1(%arg0: i32, %arg1: i32) -> (i32, i32, i32) {
    %c0_i32 = arith.constant 0 : i32
    %c0_i32_0 = arith.constant 0 : i32
    %c0_i32_1 = arith.constant 0 : i32
    return %arg1, %c0_i32, %c0_i32_0 : i32, i32, i32
  }
  func.func @transform_2(%arg0: i32, %arg1: i32) -> (i32, i32) {
    %c0_i32 = arith.constant 0 : i32
    %c0_i32_0 = arith.constant 0 : i32
    return %arg0, %c0_i32 : i32, i32
  }
  func.func @transform_3(%arg0: i32, %arg1: i32) -> (i32, i32, i32) {
    %c0_i32 = arith.constant 0 : i32
    %c0_i32_0 = arith.constant 0 : i32
    %c0_i32_1 = arith.constant 0 : i32
    return %arg0, %c0_i32, %c0_i32_0 : i32, i32, i32
  }
  func.func @transform_4(%arg0: i32, %arg1: i32) -> (i32, i32, i32) {
    %c0_i32 = arith.constant 0 : i32
    %c0_i32_0 = arith.constant 0 : i32
    %c0_i32_1 = arith.constant 0 : i32
    return %arg0, %c0_i32, %c0_i32_0 : i32, i32, i32
  }
}

module attributes {stable_mosaic.version = 11 : i64} {
  func.func @_linear_kernel(%arg0: i32, %arg1: memref<32x64xbf16, #tpu.memory_space<vmem>>, %arg2: memref<64x4xbf16, #tpu.memory_space<vmem>>, %arg3: memref<1x4xf32, #tpu.memory_space<vmem>>, %arg4: memref<32x2xf32, #tpu.memory_space<vmem>>) attributes {dimension_semantics = [#tpu.dimension_semantics<parallel>], iteration_bounds = array<i64: 1>, scalar_prefetch = 0 : i64, scratch_operands = 0 : i64, tpu.core_type = #tpu.core_type<tc>, window_params = [{transform_indices = @transform_0, window_bounds = array<i64: 32, 64>}, {pipeline_mode = #tpu.pipeline_mode<synchronous>, transform_indices = @transform_1, window_bounds = array<i64: 64, 4>}, {pipeline_mode = #tpu.pipeline_mode<synchronous>, transform_indices = @transform_2, window_bounds = array<i64: 1, 4>}, {transform_indices = @transform_3, window_bounds = array<i64: 32, 2>}]} {
    %c0 = arith.constant 0 : index
    %c0_0 = arith.constant 0 : index
    %0 = vector.load %arg1[%c0, %c0_0] : memref<32x64xbf16, #tpu.memory_space<vmem>>, vector<32x64xbf16>
    %c0_1 = arith.constant 0 : index
    %c0_2 = arith.constant 0 : index
    %1 = vector.load %arg2[%c0_1, %c0_2] : memref<64x4xbf16, #tpu.memory_space<vmem>>, vector<64x4xbf16>
    %cst = arith.constant dense<0.000000e+00> : vector<32x4xf32>
    %2 = tpu.matmul %0, %1, %cst {dimension_numbers = #tpu.dot_dimension_numbers<[1], [0], [0], [1], [0, 0, 1, 1], [], []>} : vector<32x64xbf16>, vector<64x4xbf16>, vector<32x4xf32> -> vector<32x4xf32>
    %c0_3 = arith.constant 0 : index
    %c0_4 = arith.constant 0 : index
    %3 = vector.load %arg3[%c0_3, %c0_4] : memref<1x4xf32, #tpu.memory_space<vmem>>, vector<1x4xf32>
    %4 = vector.broadcast %3 : vector<1x4xf32> to vector<32x4xf32>
    %5 = arith.addf %2, %4 : vector<32x4xf32>
    %6 = vector.extract_strided_slice %5 {offsets = [0, 2], sizes = [32, 2], strides = [1, 1]} : vector<32x4xf32> to vector<32x2xf32>
    %7 = vector.extract_strided_slice %5 {offsets = [0, 0], sizes = [32, 2], strides = [1, 1]} : vector<32x4xf32> to vector<32x2xf32>
    %8 = arith.subf %6, %7 : vector<32x2xf32>
    %cst_5 = arith.constant 0.000000e+00 : f32
    %9 = vector.broadcast %cst_5 : f32 to vector<32x2xf32>
    %10 = arith.subf %9, %8 : vector<32x2xf32>
    %11 = math.exp %10 : vector<32x2xf32>
    %cst_6 = arith.constant 1.000000e+00 : f32
    %12 = vector.broadcast %cst_6 : f32 to vector<32x2xf32>
    %13 = arith.addf %12, %11 : vector<32x2xf32>
    %cst_7 = arith.constant 1.000000e+00 : f32
    %14 = vector.broadcast %cst_7 : f32 to vector<32x2xf32>
    %15 = arith.divf %14, %13 : vector<32x2xf32>
    %c0_8 = arith.constant 0 : index
    %c0_9 = arith.constant 0 : index
    %16 = vector.load %arg4[%c0_8, %c0_9] : memref<32x2xf32, #tpu.memory_space<vmem>>, vector<32x2xf32>
    tpu.vector_store %arg4[%c0_8, %c0_9], %15 {strides = array<i32>} : memref<32x2xf32, #tpu.memory_space<vmem>>, vector<32x2xf32>,
    return
  }
  func.func @transform_0(%arg0: i32) -> (i32, i32) {
    %c0_i32 = arith.constant 0 : i32
    %c0_i32_0 = arith.constant 0 : i32
    return %arg0, %c0_i32 : i32, i32
  }
  func.func @transform_1(%arg0: i32) -> (i32, i32) {
    %c0_i32 = arith.constant 0 : i32
    %c0_i32_0 = arith.constant 0 : i32
    %c0_i32_1 = arith.constant 0 : i32
    return %c0_i32, %c0_i32_0 : i32, i32
  }
  func.func @transform_2(%arg0: i32) -> (i32, i32) {
    %c0_i32 = arith.constant 0 : i32
    %c0_i32_0 = arith.constant 0 : i32
    %c0_i32_1 = arith.constant 0 : i32
    return %c0_i32, %c0_i32_0 : i32, i32
  }
  func.func @transform_3(%arg0: i32) -> (i32, i32) {
    %c0_i32 = arith.constant 0 : i32
    %c0_i32_0 = arith.constant 0 : i32
    return %arg0, %c0_i32 : i32, i32
  }
}

module attributes {stable_mosaic.version = 11 : i64} {
  func.func @_meanpool_kernel(%arg0: i32, %arg1: memref<8x4x64xf32, #tpu.memory_space<vmem>>, %arg2: memref<8x64xf32, #tpu.memory_space<vmem>>) attributes {dimension_semantics = [#tpu.dimension_semantics<parallel>], iteration_bounds = array<i64: 1>, scalar_prefetch = 0 : i64, scratch_operands = 0 : i64, tpu.core_type = #tpu.core_type<tc>, window_params = [{transform_indices = @transform_0, window_bounds = array<i64: 8, 4, 64>}, {transform_indices = @transform_1, window_bounds = array<i64: 8, 64>}]} {
    %c0 = arith.constant 0 : index
    %c0_0 = arith.constant 0 : index
    %c0_1 = arith.constant 0 : index
    %0 = vector.load %arg1[%c0, %c0_0, %c0_1] : memref<8x4x64xf32, #tpu.memory_space<vmem>>, vector<8x4x64xf32>
    %cst = arith.constant dense<0.000000e+00> : vector<8x64xf32>
    %1 = vector.multi_reduction <add>, %0, %cst [1] : vector<8x4x64xf32> to vector<8x64xf32>
    %cst_2 = arith.constant 4.000000e+00 : f32
    %2 = vector.broadcast %cst_2 : f32 to vector<8x64xf32>
    %3 = arith.divf %1, %2 : vector<8x64xf32>
    %c0_3 = arith.constant 0 : index
    %c0_4 = arith.constant 0 : index
    %4 = vector.load %arg2[%c0_3, %c0_4] : memref<8x64xf32, #tpu.memory_space<vmem>>, vector<8x64xf32>
    tpu.vector_store %arg2[%c0_3, %c0_4], %3 {strides = array<i32>} : memref<8x64xf32, #tpu.memory_space<vmem>>, vector<8x64xf32>,
    return
  }
  func.func @transform_0(%arg0: i32) -> (i32, i32, i32) {
    %c0_i32 = arith.constant 0 : i32
    %c0_i32_0 = arith.constant 0 : i32
    %c0_i32_1 = arith.constant 0 : i32
    return %arg0, %c0_i32, %c0_i32_0 : i32, i32, i32
  }
  func.func @transform_1(%arg0: i32) -> (i32, i32) {
    %c0_i32 = arith.constant 0 : i32
    %c0_i32_0 = arith.constant 0 : i32
    return %arg0, %c0_i32 : i32, i32
  }
}

module attributes {stable_mosaic.version = 11 : i64} {
  func.func @_linear_kernel(%arg0: i32, %arg1: memref<8x64xbf16, #tpu.memory_space<vmem>>, %arg2: memref<64x4xbf16, #tpu.memory_space<vmem>>, %arg3: memref<1x4xf32, #tpu.memory_space<vmem>>, %arg4: memref<8x4xf32, #tpu.memory_space<vmem>>) attributes {dimension_semantics = [#tpu.dimension_semantics<parallel>], iteration_bounds = array<i64: 1>, scalar_prefetch = 0 : i64, scratch_operands = 0 : i64, tpu.core_type = #tpu.core_type<tc>, window_params = [{transform_indices = @transform_0, window_bounds = array<i64: 8, 64>}, {pipeline_mode = #tpu.pipeline_mode<synchronous>, transform_indices = @transform_1, window_bounds = array<i64: 64, 4>}, {pipeline_mode = #tpu.pipeline_mode<synchronous>, transform_indices = @transform_2, window_bounds = array<i64: 1, 4>}, {transform_indices = @transform_3, window_bounds = array<i64: 8, 4>}]} {
    %c0 = arith.constant 0 : index
    %c0_0 = arith.constant 0 : index
    %0 = vector.load %arg1[%c0, %c0_0] : memref<8x64xbf16, #tpu.memory_space<vmem>>, vector<8x64xbf16>
    %c0_1 = arith.constant 0 : index
    %c0_2 = arith.constant 0 : index
    %1 = vector.load %arg2[%c0_1, %c0_2] : memref<64x4xbf16, #tpu.memory_space<vmem>>, vector<64x4xbf16>
    %cst = arith.constant dense<0.000000e+00> : vector<8x4xf32>
    %2 = tpu.matmul %0, %1, %cst {dimension_numbers = #tpu.dot_dimension_numbers<[1], [0], [0], [1], [0, 0, 1, 1], [], []>} : vector<8x64xbf16>, vector<64x4xbf16>, vector<8x4xf32> -> vector<8x4xf32>
    %c0_3 = arith.constant 0 : index
    %c0_4 = arith.constant 0 : index
    %3 = vector.load %arg3[%c0_3, %c0_4] : memref<1x4xf32, #tpu.memory_space<vmem>>, vector<1x4xf32>
    %4 = vector.broadcast %3 : vector<1x4xf32> to vector<8x4xf32>
    %5 = arith.addf %2, %4 : vector<8x4xf32>
    %c0_5 = arith.constant 0 : index
    %c0_6 = arith.constant 0 : index
    %6 = vector.load %arg4[%c0_5, %c0_6] : memref<8x4xf32, #tpu.memory_space<vmem>>, vector<8x4xf32>
    tpu.vector_store %arg4[%c0_5, %c0_6], %5 {strides = array<i32>} : memref<8x4xf32, #tpu.memory_space<vmem>>, vector<8x4xf32>,
    return
  }
  func.func @transform_0(%arg0: i32) -> (i32, i32) {
    %c0_i32 = arith.constant 0 : i32
    %c0_i32_0 = arith.constant 0 : i32
    return %arg0, %c0_i32 : i32, i32
  }
  func.func @transform_1(%arg0: i32) -> (i32, i32) {
    %c0_i32 = arith.constant 0 : i32
    %c0_i32_0 = arith.constant 0 : i32
    %c0_i32_1 = arith.constant 0 : i32
    return %c0_i32, %c0_i32_0 : i32, i32
  }
  func.func @transform_2(%arg0: i32) -> (i32, i32) {
    %c0_i32 = arith.constant 0 : i32
    %c0_i32_0 = arith.constant 0 : i32
    %c0_i32_1 = arith.constant 0 : i32
    return %c0_i32, %c0_i32_0 : i32, i32
  }
  func.func @transform_3(%arg0: i32) -> (i32, i32) {
    %c0_i32 = arith.constant 0 : i32
    %c0_i32_0 = arith.constant 0 : i32
    return %arg0, %c0_i32 : i32, i32
  }
}

module attributes {stable_mosaic.version = 11 : i64} {
  func.func @_lse_kernel(%arg0: i32, %arg1: memref<8x4xf32, #tpu.memory_space<vmem>>, %arg2: memref<8x1xf32, #tpu.memory_space<vmem>>) attributes {dimension_semantics = [#tpu.dimension_semantics<arbitrary>], iteration_bounds = array<i64: 1>, scalar_prefetch = 0 : i64, scratch_operands = 0 : i64, tpu.core_type = #tpu.core_type<tc>, window_params = [{pipeline_mode = #tpu.pipeline_mode<synchronous>, transform_indices = @transform_0, window_bounds = array<i64: 8, 4>}, {pipeline_mode = #tpu.pipeline_mode<synchronous>, transform_indices = @transform_1, window_bounds = array<i64: 8, 1>}]} {
    %c0 = arith.constant 0 : index
    %c0_0 = arith.constant 0 : index
    %0 = vector.load %arg1[%c0, %c0_0] : memref<8x4xf32, #tpu.memory_space<vmem>>, vector<8x4xf32>
    %cst = arith.constant dense<0xFF800000> : vector<8xf32>
    %1 = vector.multi_reduction <maximumf>, %0, %cst [1] : vector<8x4xf32> to vector<8xf32>
    %2 = vector.shape_cast %1 : vector<8xf32> to vector<8x1xf32>
    %3 = vector.broadcast %2 : vector<8x1xf32> to vector<8x4xf32>
    %4 = arith.subf %0, %3 : vector<8x4xf32>
    %5 = math.exp %4 : vector<8x4xf32>
    %cst_1 = arith.constant dense<0.000000e+00> : vector<8xf32>
    %6 = vector.multi_reduction <add>, %5, %cst_1 [1] : vector<8x4xf32> to vector<8xf32>
    %7 = vector.shape_cast %6 : vector<8xf32> to vector<8x1xf32>
    %cst_2 = arith.constant 4.000000e+00 : f32
    %8 = vector.broadcast %cst_2 : f32 to vector<8x1xf32>
    %9 = arith.divf %7, %8 : vector<8x1xf32>
    %10 = math.log %9 : vector<8x1xf32>
    %11 = arith.addf %2, %10 : vector<8x1xf32>
    %c0_3 = arith.constant 0 : index
    %c0_4 = arith.constant 0 : index
    %12 = vector.load %arg2[%c0_3, %c0_4] : memref<8x1xf32, #tpu.memory_space<vmem>>, vector<8x1xf32>
    tpu.vector_store %arg2[%c0_3, %c0_4], %11 {strides = array<i32>} : memref<8x1xf32, #tpu.memory_space<vmem>>, vector<8x1xf32>,
    return
  }
  func.func @transform_0(%arg0: i32) -> (i32, i32) {
    %c0_i32 = arith.constant 0 : i32
    %c0_i32_0 = arith.constant 0 : i32
    %c0_i32_1 = arith.constant 0 : i32
    return %c0_i32, %c0_i32_0 : i32, i32
  }
  func.func @transform_1(%arg0: i32) -> (i32, i32) {
    %c0_i32 = arith.constant 0 : i32
    %c0_i32_0 = arith.constant 0 : i32
    %c0_i32_1 = arith.constant 0 : i32
    return %c0_i32, %c0_i32_0 : i32, i32
  }
}

</mosaic_0001>

<bundles_post_ra>
// kernel: tpu_custom_call.1
= control target key start
LH: loop header
LB: loop body
LE: loop exit
PB: predicated region body
PF: predicated region fallthrough
CT: control target
= control target key end

     0   :  { %10 = vsyncpa [#allocation4], 0  ;;  %s3987_s0 = inlined_call_operand.vmem [shape: bf16[3,16,18,8], index: 0, kind: input, shape index: {}]   ;;  %s3988_s1 = inlined_call_operand.vmem [shape: bf16[3,3,8,8], index: 1, kind: input, shape index: {}]   ;;  %s3989_s2 = inlined_call_operand.vmem [shape: f32[256,8], index: 2, kind: output, shape index: {0}]   ;;  %s3990_s3 = inlined_call_operand.hbm [shape: f32[1,1,8], index: 3, kind: output, shape index: {1}]   ;;  %s3991_s4 = inlined_call_operand.hbm [shape: f32[1,1,8], index: 4, kind: output, shape index: {2}]  }
   0x1   :  { %11 = vsyncpa [#allocation6], 0  ;;  %s2800_s15 = smov 0   ;;  %s2802_s16 = smov 0  }
   0x2   :  { %s2804_s17 = smov 0  }
   0x3 LB: > { %s2344_s18 = sadd.s32 4294967295, %s2770_s17   ;;  %s26_s19 = sadd.s32 1, %s2766_s16  ;;  %s2770_s17 = sphi %s2804_s17, %s17_s17   ;;  %s2766_s16 = sphi %s2802_s16, %s4047_s16   ;;  %s2762_s15 = sphi %s2800_s15, %s4046_s15  }
   0x4   : > { %p27_p0 = scmp.ge.s32.totalorder %s26_s19, 3  ;;  %p2347_p1 = scmp.ge.s32.totalorder %s2770_s17, 1 }
   0x5   : > { %p199_p2 = scmp.lt.s32.totalorder %s2770_s17, 4 }
   0x6   : > { %s4049_s19 = smov (%p27_p0, %s26_s19), 0 }
   0x7   : > { %p200_p3 = pnand %p2347_p1, %p199_p2 }
   0x9   : > { %203 = sbr.rel (%p200_p3) target bundleno = 482 (0x1e2), region = 28 }
  0x10   : > { %p236_p4 = scmp.lt.s32.totalorder %s2762_s15, 2  ;;  %p2350_p5 = scmp.ne.s32.totalorder %s2762_s15, 0 }
  0x11   : > { %vm262_vm0 = vcmask (!%p2350_p5), 64512   ;;  %v2772_v0 = vmov (!%p2350_p5), 0.0  }
  0x12   : > { %s237_s20 = scalar_select %p236_p4, %s2762_s15, 2 }
  0x13   : > { %261 = sbr.rel (%p2350_p5) target bundleno = 35 (0x23), region = 32  ;;  %263 = vst.msk [vmem:[#allocation2] sm:$0xff] (!%p2350_p5), %vm262_vm0, %v2772_v0  ;;  %264 = vst.msk [vmem:[#allocation2 + $0x8] sm:$0xff] (!%p2350_p5), %vm262_vm0, %v2772_v0 }
  0x14   : > { %s2631_s21 = smul.u32 192, %s237_s20  ;;  %265 = vst.msk [vmem:[#allocation2 + $0x10] sm:$0xff] (!%p2350_p5), %vm262_vm0, %v2772_v0  ;;  %266 = vst.msk [vmem:[#allocation2 + $0x18] sm:$0xff] (!%p2350_p5), %vm262_vm0, %v2772_v0 }
  0x15   : > { %s2632_s22 = smul.u32 12, %s237_s20  ;;  %267 = vst.msk [vmem:[#allocation2 + $0x20] sm:$0xff] (!%p2350_p5), %vm262_vm0, %v2772_v0  ;;  %268 = vst.msk [vmem:[#allocation2 + $0x28] sm:$0xff] (!%p2350_p5), %vm262_vm0, %v2772_v0 }
  0x16   : > { %s2826_s25 = scalar_lea.vmem %s3987_s0, %s2631_s21  ;;  %269 = vst.msk [vmem:[#allocation2 + $0x30] sm:$0xff] (!%p2350_p5), %vm262_vm0, %v2772_v0  ;;  %270 = vst.msk [vmem:[#allocation2 + $0x38] sm:$0xff] (!%p2350_p5), %vm262_vm0, %v2772_v0 }
  0x17   : > { %s2831_s28 = scalar_lea.vmem %s3988_s1, %s2632_s22  ;;  %271 = vst.msk [vmem:[#allocation2 + $0x40] sm:$0xff] (!%p2350_p5), %vm262_vm0, %v2772_v0  ;;  %272 = vst.msk [vmem:[#allocation2 + $0x48] sm:$0xff] (!%p2350_p5), %vm262_vm0, %v2772_v0 }
  0x18   : > { %273 = vst.msk [vmem:[#allocation2 + $0x50] sm:$0xff] (!%p2350_p5), %vm262_vm0, %v2772_v0  ;;  %274 = vst.msk [vmem:[#allocation2 + $0x58] sm:$0xff] (!%p2350_p5), %vm262_vm0, %v2772_v0 }
  0x19   : > { %275 = vst.msk [vmem:[#allocation2 + $0x60] sm:$0xff] (!%p2350_p5), %vm262_vm0, %v2772_v0  ;;  %276 = vst.msk [vmem:[#allocation2 + $0x68] sm:$0xff] (!%p2350_p5), %vm262_vm0, %v2772_v0 }
  0x1a   : > { %277 = vst.msk [vmem:[#allocation2 + $0x70] sm:$0xff] %vm262_vm0, %v2772_v0  ;;  %278 = vst.msk [vmem:[#allocation2 + $0x78] sm:$0xff] %vm262_vm0, %v2772_v0 }
  0x1b   : > { %279 = vst.msk [vmem:[#allocation2 + $0x80] sm:$0xff] %vm262_vm0, %v2772_v0  ;;  %280 = vst.msk [vmem:[#allocation2 + $0x88] sm:$0xff] %vm262_vm0, %v2772_v0 }
  0x1c   : > { %281 = vst.msk [vmem:[#allocation2 + $0x90] sm:$0xff] %vm262_vm0, %v2772_v0  ;;  %282 = vst.msk [vmem:[#allocation2 + $0x98] sm:$0xff] %vm262_vm0, %v2772_v0 }
  0x1d   : > { %283 = vst.msk [vmem:[#allocation2 + $0xa0] sm:$0xff] %vm262_vm0, %v2772_v0  ;;  %284 = vst.msk [vmem:[#allocation2 + $0xa8] sm:$0xff] %vm262_vm0, %v2772_v0 }
  0x1e   : > { %285 = vst.msk [vmem:[#allocation2 + $0xb0] sm:$0xff] %vm262_vm0, %v2772_v0  ;;  %286 = vst.msk [vmem:[#allocation2 + $0xb8] sm:$0xff] %vm262_vm0, %v2772_v0 }
  0x1f   : > { %287 = vst.msk [vmem:[#allocation2 + $0xc0] sm:$0xff] %vm262_vm0, %v2772_v0  ;;  %288 = vst.msk [vmem:[#allocation2 + $0xc8] sm:$0xff] %vm262_vm0, %v2772_v0 }
  0x20   : > { %289 = vst.msk [vmem:[#allocation2 + $0xd0] sm:$0xff] %vm262_vm0, %v2772_v0  ;;  %290 = vst.msk [vmem:[#allocation2 + $0xd8] sm:$0xff] %vm262_vm0, %v2772_v0 }
  0x21   : > { %291 = vst.msk [vmem:[#allocation2 + $0xe0] sm:$0xff] %vm262_vm0, %v2772_v0  ;;  %292 = vst.msk [vmem:[#allocation2 + $0xe8] sm:$0xff] %vm262_vm0, %v2772_v0 }
  0x22   : > { %293 = vst.msk [vmem:[#allocation2 + $0xf0] sm:$0xff] %vm262_vm0, %v2772_v0  ;;  %294 = vst.msk [vmem:[#allocation2 + $0xf8] sm:$0xff] %vm262_vm0, %v2772_v0 }
  0x23 PF: > { %v295_v1 = vld [vmem:[%s2831_s28] sm:$0xf]  ;;  %vm507_vm1 = vcmask 1043456   ;;  %vm458_vm2 = vcmask 64512   ;;  %v2873_v4 = vld [vmem:[%s2826_s25 + $0x64] sm:$0xf] }
  0x24   : > { %v2868_v2 = vld [vmem:[%s2826_s25 + $0x60] sm:$0xf]  ;;  %2628 = vmatprep.subr.msk.bf16.mxu1 %vm507_vm1, %v295_v1  ;;  %v509_v3 = vsel %vm507_vm1, %v295_v1, 0  ;;  %2627 = vmatprep.subr.msk.bf16.mxu0 %vm507_vm1, %v295_v1  ;;  %v941_v9 = vshll.u32 %v2873_v4, 16  ;;  %v945_v10 = vshrl.u32 %v2873_v4, 16  ;;  %v3992_v11 = vrot.slane %v2873_v4, 5 }
  0x25   : > { %v932_v5 = vshrl.u32 %v2868_v2, 16  ;;  %v935_v6 = vshll.u32 %v2868_v2, 16  ;;  %2626 = vmatpush3.bf16.msra.mxu1 %v509_v3  ;;  %v2359_v8 = vcombine.low %v2868_v2, %v2873_v4  ;;  %v2885_v12 = vld [vmem:[%s2826_s25 + $0x6c] sm:$0xf]  ;;  %2524 = vmatpush3.bf16.msra.mxu0 %v509_v3  ;;  %v2888_v15 = vld [vmem:[%s2826_s25 + $0x70] sm:$0xf] }
  0x26   : > { %v2893_v18 = vrot.slane %v941_v9, 5  ;;  %v947_v19 = vrot.slane %v945_v10, 4  ;;  %v2897_v20 = vrot.slane %v3992_v11, 4  ;;  %v2360_v21 = vcombine.low %v2885_v12, %v2888_v15  ;;  %v296_v22 = vld [vmem:[%s2831_s28 + $0x4] sm:$0xf]  ;;  %p2463_p6 = scmp.ne.s32.totalorder %s2762_s15, 2 }
  0x27   : > { %v934_v13 = vrot.slane %v932_v5, 4  ;;  %v937_v14 = vrot.slane %v935_v6, 5  ;;  %2541 = vmatprep.mubr.msk.bf16.mxu1 %vm458_vm2, %v2359_v8  ;;  %2629 = vmatprep.subr.msk.bf16.mxu1 %vm507_vm1, %v296_v22  ;;  %v1252_v25 = vsel %vm507_vm1, %v296_v22, 0  ;;  %v2906_v26 = vld [vmem:[%s2826_s25] sm:$0xf]  ;;  %vm1495_vm6 = vcmask 1042432  }
  0x28   : > { %v2909_v27 = vld [vmem:[%s2826_s25 + $0x4] sm:$0xf]  ;;  %v948_v28 = vor.u32 %v947_v19, %v2893_v18  ;;  %2542 = vmatmul.mubr.msk.bf16.vlgmr.msra.gmra.mrb[0].mxu1 %vm458_vm2, %v2360_v21  ;;  %v740_v30 = vshrl.u32 %v2906_v26, 16  ;;  %v743_v31 = vshll.u32 %v2906_v26, 16  ;;  %v2918_v32 = vld [vmem:[%s2826_s25 + $0x78] sm:$0xf] }
  0x29   : > { %v938_v23 = vor.u32 %v937_v14, %v934_v13  ;;  %v2351_v29 = vcombine.low %v2906_v26, %v2909_v27  ;;  %v2921_v33 = vld [vmem:[%s2826_s25 + $0x7c] sm:$0xf]  ;;  %2558 = vmatpush3.bf16.msra.mxu1 %v1252_v25  ;;  %v749_v35 = vshll.u32 %v2909_v27, 16  ;;  %v753_v36 = vshrl.u32 %v2909_v27, 16  ;;  %v2929_v38 = vld [vmem:[%s2826_s25 + $0xc] sm:$0xf] }
  0x2a   : > { %v2931_v39 = vrot.slane %v948_v28, 4  ;;  %v742_v40 = vrot.slane %v740_v30, 4  ;;  %v745_v41 = vrot.slane %v743_v31, 5  ;;  %v3994_v42 = vrot.slane %v2909_v27, 5  ;;  %v2936_v43 = vld [vmem:[%s2826_s25 + $0x10] sm:$0xf] }
  0x2b   : > { %v2923_v34 = vrot.slane %v938_v23, 4  ;;  %2525 = vmatprep.mubr.msk.bf16.mxu0 %vm458_vm2, %v2351_v29  ;;  %v2938_v44 = vrot.slane %v749_v35, 5  ;;  %v755_v45 = vrot.slane %v753_v36, 4  ;;  %v2361_v46 = vcombine.low %v2918_v32, %v2921_v33  ;;  %v2944_v48 = vld [vmem:[%s2826_s25 + $0x84] sm:$0xf] }
  0x2c   : > { %v746_v49 = vor.u32 %v745_v41, %v742_v40  ;;  %v2948_v50 = vrot.slane %v3994_v42, 4  ;;  %v2953_v53 = vld [vmem:[%s2826_s25 + $0x88] sm:$0xf]  ;;  %v2352_v55 = vcombine.low %v2929_v38, %v2936_v43  ;;  %v764_v56 = vshrl.u32 %v2929_v38, 16  ;;  %v2963_v59 = vld [vmem:[%s2826_s25 + $0x18] sm:$0xf] }
  0x2d   : > { %v756_v54 = vor.u32 %v755_v45, %v2938_v44  ;;  %2545 = vmatprep.mubr.msk.bf16.mxu1 %vm458_vm2, %v2361_v46  ;;  %v767_v57 = vshll.u32 %v2929_v38, 16  ;;  %v297_v58 = vld [vmem:[%s2831_s28 + $0x8] sm:$0xf]  ;;  %v773_v61 = vshll.u32 %v2936_v43, 16  ;;  %v777_v62 = vshrl.u32 %v2936_v43, 16 }
  0x2e   : > { %v2965_v60 = vrot.slane %v746_v49, 4  ;;  %2630 = vmatprep.subr.msk.bf16.mxu0 %vm507_vm1, %v297_v58  ;;  %v2972_v0 = vld [vmem:[%s2826_s25 + $0x1c] sm:$0xf]  ;;  %2526 = vmatmul.mubr.msk.bf16.vlgmr.msra.gmra.mrb[0].mxu0 %vm458_vm2, %v2352_v55  ;;  %v766_v3 = vrot.slane %v764_v56, 4  ;;  %v3993_v6 = vrot.slane %v2936_v43, 5  ;;  %v2362_v13 = vcombine.low %v2944_v48, %v2953_v53 }
  0x2f   : > { %v2974_v1 = vrot.slane %v756_v54, 4  ;;  %v769_v5 = vrot.slane %v767_v57, 5  ;;  %v2979_v8 = vld [vmem:[%s2826_s25 + $0x90] sm:$0xf]  ;;  %v2981_v9 = vrot.slane %v773_v61, 5  ;;  %v779_v10 = vrot.slane %v777_v62, 4 }
  0x30   : > { %v2987_v19 = vld [vmem:[%s2826_s25 + $0x94] sm:$0xf]  ;;  %v2991_v22 = vrot.slane %v3993_v6, 4  ;;  %2546 = vmatmul.mubr.msk.bf16.gmra.mrb[4].mxu1 %vm458_vm2, %v2362_v13  ;;  %v1739_v29 = vsel %vm507_vm1, %v297_v58, 0  ;;  %v2353_v30 = vcombine.low %v2963_v59, %v2972_v0  ;;  %v788_v31 = vshrl.u32 %v2963_v59, 16 }
  0x31   : > { %v770_v21 = vor.u32 %v769_v5, %v766_v3  ;;  %v780_v28 = vor.u32 %v779_v10, %v2981_v9  ;;  %v3002_v35 = vld [vmem:[%s2826_s25 + $0x24] sm:$0xf]  ;;  %v3005_v36 = vld [vmem:[%s2826_s25 + $0x28] sm:$0xf]  ;;  %2592 = vmatpush3.bf16.msra.mxu0 %v1739_v29  ;;  %v791_v41 = vshll.u32 %v2963_v59, 16  ;;  %v2363_v45 = vcombine.low %v2979_v8, %v2987_v19 }
  0x32   : > { %v3013_v46 = vld [vmem:[%s2826_s25 + $0x9c] sm:$0xf]  ;;  %v3016_v49 = vld [vmem:[%s2826_s25 + $0xa0] sm:$0xf]  ;;  %2529 = vmatprep.mubr.msk.bf16.mxu0 %vm458_vm2, %v2353_v30  ;;  %v801_v55 = vshrl.u32 %v2972_v0, 16  ;;  %v2354_v62 = vcombine.low %v3002_v35, %v3005_v36  ;;  %v790_v16 = vrot.slane %v788_v31, 4 }
  0x33   : > { %v3007_v40 = vrot.slane %v770_v21, 4  ;;  %v3018_v54 = vrot.slane %v780_v28, 4  ;;  %v3025_v58 = vld [vmem:[%s2826_s25 + $0x30] sm:$0xf]  ;;  %2549 = vmatprep.mubr.msk.bf16.mxu1 %vm458_vm2, %v2363_v45  ;;  %v3034_v10 = vld [vmem:[%s2826_s25 + $0x34] sm:$0xf]  ;;  %v2364_v21 = vcombine.low %v3013_v46, %v3016_v49 }
  0x34   : > { %v3042_v30 = vld [vmem:[%s2826_s25 + $0xa8] sm:$0xf]  ;;  %v2355_v61 = vcombine.low %v3025_v58, %v3034_v10  ;;  %v3051_v25 = vld [vmem:[%s2826_s25 + $0xac] sm:$0xf]  ;;  %v3059_v45 = vld [vmem:[%s2826_s25 + $0x3c] sm:$0xf] }
  0x35   : > { %v2365_v29 = vcombine.low %v3042_v30, %v3051_v25  ;;  %v3064_v7 = vld [vmem:[%s2826_s25 + $0x40] sm:$0xf]  ;;  %v3068_v52 = vld [vmem:[%s2826_s25 + $0xb4] sm:$0xf]  ;;  %v3074_v51 = vld [vmem:[%s2826_s25 + $0xb8] sm:$0xf] }
  0x36   : > { %2530 = vmatmul.mubr.msk.bf16.gmra.mrb[4].mxu0 %vm458_vm2, %v2354_v62  ;;  %3997 = vst [vmem:[#allocation9_spill] sm:$0xff] %v3074_v51  ;;  %v2356_v14 = vcombine.low %v3059_v45, %v3064_v7  ;;  %v3086_v17 = vld [vmem:[%s2826_s25 + $0x4c] sm:$0xf]  ;;  %v300_v23 = vld [vmem:[%s2826_s25 + $0x8] sm:$0x1]  ;;  %v793_v11 = vrot.slane %v791_v41, 5  ;;  %v2366_v28 = vcombine.low %v3068_v52, %v3074_v51 }
  0x37   : > { %2533 = vmatprep.mubr.msk.bf16.mxu0 %vm458_vm2, %v2355_v61  ;;  %vm736_vm3 = vsmask.f32 3328  ;;  %vm737_vm4 = vsmask.f32 7440  ;;  %v759_v24 = vshll.u32 %v300_v23, 16  ;;  %v803_v61 = vrot.slane %v801_v55, 4 }
  0x38   : > { %2550 = vmatmul.mubr.msk.bf16.gmra.mrb[8].mxu1 %vm458_vm2, %v2364_v21  ;;  %v3083_v21 = vld [vmem:[%s2826_s25 + $0x48] sm:$0xf]  ;;  %vm3096_vm5 = vmor %vm736_vm3, %vm737_vm4  ;;  %v3101_v56 = vld [vmem:[%s2826_s25 + $0x54] sm:$0xf]  ;;  %v794_v6 = vor.u32 %v793_v11, %v790_v16  ;;  %vm1496_vm7 = vcmask 1046532   ;;  %v4002_v16 = vrot.slane %v2909_v27, 5 }
  0x39   : > { %2553 = vmatprep.mubr.msk.bf16.mxu1 %vm458_vm2, %v2365_v29  ;;  %v2357_v62 = vcombine.low %v3083_v21, %v3086_v17  ;;  %v3104_v47 = vld [vmem:[%s2826_s25 + $0x58] sm:$0xf]  ;;  %v797_v29 = vshll.u32 %v2972_v0, 16  ;;  %v752_v41 = vsel %vm3096_vm5, %v2965_v60, %v2938_v44  ;;  %v761_v57 = vrot.slane %v759_v24, 5  ;;  %v303_v13 = vld [vmem:[%s2826_s25 + $0x14] sm:$0x1]  ;;  %vm3131_vm8 = vmor %vm1495_vm6, %vm1496_vm7 }
  0x3a   : > { %v2358_v63 = vcombine.low %v3101_v56, %v3104_v47  ;;  %v3117_v5 = vld [vmem:[%s2826_s25 + $0x20] sm:$0x1]  ;;  %v776_v44 = vsel %vm3096_vm5, %v3007_v40, %v2981_v9  ;;  %v783_v24 = vshll.u32 %v303_v13, 16  ;;  %v1503_v40 = vrot.slane %v300_v23, 5 }
  0x3b   : > { %v762_v60 = vsel %vm3096_vm5, %v2974_v1, %v761_v57  ;;  %v799_v3 = vrot.slane %v797_v29, 5  ;;  %v807_v37 = vshll.u32 %v3117_v5, 16  ;;  %v4003_v1 = vrot.slane %v2906_v26, 9  ;;  %v3146_v57 = vld [vmem:[%s2826_s25 + $0x2c] sm:$0x1] }
  0x3c   : > { %v785_v55 = vrot.slane %v783_v24, 5  ;;  %v4005_v23 = vshll.u32 %v3002_v35, 16  ;;  %v1504_v26 = vsel %vm3131_vm8, %v2948_v50, %v1503_v40  ;;  %v821_v24 = vshll.u32 %v3005_v36, 16 }
  0x3d   : > { %v804_v42 = vor.u32 %v803_v61, %v799_v3  ;;  %v809_v51 = vrot.slane %v807_v37, 5  ;;  %v4004_v37 = vshrl.u32 %v3002_v35, 16  ;;  %v1510_v40 = vrot.slane %v303_v13, 5 }
  0x3e   : > { %2534 = vmatmul.mubr.msk.bf16.gmra.mrb[8].mxu0 %vm458_vm2, %v2356_v14  ;;  %v795_v14 = vrot.slane %v794_v6, 4  ;;  %v786_v11 = vsel %vm3096_vm5, %v3018_v54, %v785_v55  ;;  %v1501_v6 = vsel %vm3131_vm8, %v4003_v1, %v4002_v16  ;;  %v817_v61 = vrot.slane %v4005_v23, 5 }
  0x3f   : > { %2537 = vmatprep.mubr.msk.bf16.mxu0 %vm458_vm2, %v2357_v62  ;;  %v2383_v62 = vcombine.low %v752_v41, %v762_v60  ;;  %v2384_v29 = vcombine.low %v776_v44, %v786_v11  ;;  %v805_v54 = vrot.slane %v804_v42, 4  ;;  %v2431_v27 = vcombine.low %v1501_v6, %v1504_v26  ;;  %v3172_v6 = vld [vmem:[%s2826_s25 + $0x38] sm:$0x1] }
  0x40   : > { %2554 = vmatmul.mubr.msk.bf16.gmra.mrb[12].mxu1 %vm458_vm2, %v2366_v28  ;;  %v814_v28 = vrot.slane %v4004_v37, 4  ;;  %v800_v41 = vsel %vm3096_vm5, %v795_v14, %v799_v3  ;;  %v4006_v60 = vshrl.u32 %v3005_v36, 16  ;;  %v831_v3 = vshll.u32 %v3146_v57, 16 }
  0x41   : > { %2559 = vmatprep.mubr.msk.bf16.mxu1 %vm458_vm2, %v2383_v62  ;;  %v810_v44 = vsel %vm3096_vm5, %v805_v54, %v809_v51  ;;  %v4007_v42 = vrot.slane %v2936_v43, 5  ;;  %v4008_v14 = vrot.slane %v2929_v38, 9  ;;  %v823_v1 = vrot.slane %v821_v24, 5 }
  0x42   : > { %v818_v55 = vor.u32 %v817_v61, %v814_v28  ;;  %v827_v62 = vrot.slane %v4006_v60, 4  ;;  %v2385_v11 = vcombine.low %v800_v41, %v810_v44  ;;  %v833_v37 = vrot.slane %v831_v3, 5 }
  0x43   : > { %v1508_v50 = vsel %vm3131_vm8, %v4008_v14, %v4007_v42  ;;  %v1511_v43 = vsel %vm3131_vm8, %v2991_v22, %v1510_v40  ;;  %v4010_v38 = vshll.u32 %v3025_v58, 16  ;;  %v845_v13 = vshll.u32 %v3034_v10, 16  ;;  %v3195_v40 = vld [vmem:[%s2826_s25 + $0x44] sm:$0x1] }
  0x44   : > { %v819_v16 = vrot.slane %v818_v55, 4  ;;  %v828_v61 = vor.u32 %v827_v62, %v823_v1  ;;  %v2432_v41 = vcombine.low %v1508_v50, %v1511_v43  ;;  %v4011_v54 = vshrl.u32 %v3034_v10, 16 }
  0x45   : > { %v841_v28 = vrot.slane %v4010_v38, 5  ;;  %v847_v22 = vrot.slane %v845_v13, 5  ;;  %v855_v55 = vshll.u32 %v3172_v6, 16  ;;  %v2417_v24 = vrot.slane %v2963_v59, 9 }
  0x46   : > { %2538 = vmatmul.mubr.msk.bf16.gmra.mrb[12].mxu0 %vm458_vm2, %v2358_v63  ;;  %v4009_v63 = vshrl.u32 %v3025_v58, 16  ;;  %v824_v23 = vsel %vm3096_vm5, %v819_v16, %v823_v1  ;;  %v851_v26 = vrot.slane %v4011_v54, 4  ;;  %v829_v60 = vrot.slane %v828_v61, 4 }
  0x47   : > { %2593 = vmatprep.mubr.msk.bf16.mxu0 %vm458_vm2, %v2431_v27  ;;  %v1517_v44 = vrot.slane %v3117_v5, 5  ;;  %v4012_v3 = vshrl.u32 %v3059_v45, 16  ;;  %v857_v50 = vrot.slane %v855_v55, 5  ;;  %v869_v5 = vshll.u32 %v3064_v7, 16 }
  0x48   : > { %v838_v51 = vrot.slane %v4009_v63, 4  ;;  %2560 = vmatmul.mubr.msk.bf16.vlgmr.msra.gmra.mrb[16].mxu1 %vm458_vm2, %v2384_v29  ;;  %v1514_v29 = vrot.slane %v2972_v0, 5  ;;  %v852_v14 = vor.u32 %v851_v26, %v847_v22  ;;  %v834_v1 = vsel %vm3096_vm5, %v829_v60, %v833_v37 }
  0x49   : > { %2563 = vmatprep.mubr.msk.bf16.mxu1 %vm458_vm2, %v2385_v11  ;;  %v862_v62 = vrot.slane %v4012_v3, 4  ;;  %v4013_v11 = vshll.u32 %v3059_v45, 16  ;;  %v2386_v63 = vcombine.low %v824_v23, %v834_v1  ;;  %v871_v13 = vrot.slane %v869_v5, 5 }
  0x4a   : > { %v842_v27 = vor.u32 %v841_v28, %v838_v51  ;;  %v1515_v59 = vsel %vm3131_vm8, %v2417_v24, %v1514_v29  ;;  %v1516_v0 = vrot.slane %v1514_v29, 4  ;;  %v853_v43 = vrot.slane %v852_v14, 4  ;;  %v3218_v29 = vld [vmem:[%s2826_s25 + $0x50] sm:$0x1] }
  0x4b   : > { %v865_v16 = vrot.slane %v4013_v11, 5  ;;  %v4014_v37 = vshrl.u32 %v3064_v7, 16  ;;  %v879_v54 = vshll.u32 %v3195_v40, 16  ;;  %v1521_v60 = vrot.slane %v3005_v36, 5 }
  0x4c   : > { %v843_v42 = vrot.slane %v842_v27, 4  ;;  %v1518_v28 = vsel %vm3131_vm8, %v1516_v0, %v1517_v44  ;;  %v858_v23 = vsel %vm3096_vm5, %v853_v43, %v857_v50  ;;  %v2418_v27 = vrot.slane %v3002_v35, 9 }
  0x4d   : > { %v866_v38 = vor.u32 %v865_v16, %v862_v62  ;;  %v875_v61 = vrot.slane %v4014_v37, 4  ;;  %v2433_v26 = vcombine.low %v1515_v59, %v1518_v28  ;;  %v881_v24 = vrot.slane %v879_v54, 5  ;;  %v3242_v54 = vld [vmem:[%s2826_s25 + $0x5c] sm:$0x1] }
  0x4e   : > { %2594 = vmatmul.mubr.msk.bf16.vlgmr.msra.gmra.mrb[16].mxu0 %vm458_vm2, %v2432_v41  ;;  %v848_v51 = vsel %vm3096_vm5, %v843_v42, %v847_v22  ;;  %v1524_v3 = vrot.slane %v3146_v57, 5  ;;  %v4015_v62 = vshrl.u32 %v3083_v21, 16  ;;  %v4016_v35 = vshll.u32 %v3083_v21, 16 }
  0x4f   : > { %v867_v41 = vrot.slane %v866_v38, 4  ;;  %v2387_v22 = vcombine.low %v848_v51, %v858_v23  ;;  %v876_v55 = vor.u32 %v875_v61, %v871_v13  ;;  %2597 = vmatprep.mubr.msk.bf16.mxu0 %vm458_vm2, %v2433_v26  ;;  %v1522_v36 = vsel %vm3131_vm8, %v2418_v27, %v1521_v60 }
  0x50   : > { %2564 = vmatmul.mubr.msk.bf16.gmra.mrb[20].mxu1 %vm458_vm2, %v2386_v63  ;;  %v886_v42 = vrot.slane %v4015_v62, 4  ;;  %v889_v14 = vrot.slane %v4016_v35, 5  ;;  %v1523_v11 = vrot.slane %v1521_v60, 4  ;;  %v893_v16 = vshll.u32 %v3086_v17, 16 }
  0x51   : > { %v872_v44 = vsel %vm3096_vm5, %v867_v41, %v871_v13  ;;  %2567 = vmatprep.mubr.msk.bf16.mxu1 %vm458_vm2, %v2387_v22  ;;  %v877_v50 = vrot.slane %v876_v55, 4  ;;  %v4017_v59 = vshrl.u32 %v3086_v17, 16  ;;  %v903_v0 = vshll.u32 %v3218_v29, 16 }
  0x52   : > { %v890_v1 = vor.u32 %v889_v14, %v886_v42  ;;  %v2419_v5 = vrot.slane %v3025_v58, 9  ;;  %v1525_v51 = vsel %vm3131_vm8, %v1523_v11, %v1524_v3  ;;  %v895_v43 = vrot.slane %v893_v16, 5  ;;  %v3263_v11 = vld [vmem:[%s2826_s25 + $0x68] sm:$0x1] }
  0x53   : > { %v899_v57 = vrot.slane %v4017_v59, 4  ;;  %v882_v63 = vsel %vm3096_vm5, %v877_v50, %v881_v24  ;;  %v1528_v38 = vrot.slane %v3034_v10, 5  ;;  %v2434_v13 = vcombine.low %v1522_v36, %v1525_v51 }
  0x54   : > { %v2388_v28 = vcombine.low %v872_v44, %v882_v63  ;;  %v891_v37 = vrot.slane %v890_v1, 4  ;;  %v905_v61 = vrot.slane %v903_v0, 5  ;;  %v1531_v41 = vrot.slane %v3172_v6, 5 }
  0x55   : > { %v900_v23 = vor.u32 %v899_v57, %v895_v43  ;;  %v1529_v26 = vsel %vm3131_vm8, %v2419_v5, %v1528_v38  ;;  %v1530_v58 = vrot.slane %v1528_v38, 4  ;;  %v4018_v10 = vshrl.u32 %v3101_v56, 16 }
  0x56   : > { %2598 = vmatmul.mubr.msk.bf16.gmra.mrb[20].mxu0 %vm458_vm2, %v2434_v13  ;;  %v896_v27 = vsel %vm3096_vm5, %v891_v37, %v895_v43  ;;  %v4019_v55 = vshll.u32 %v3101_v56, 16  ;;  %v917_v60 = vshll.u32 %v3104_v47, 16  ;;  %v4020_v6 = vshrl.u32 %v3104_v47, 16 }
  0x57   : > { %v910_v22 = vrot.slane %v4018_v10, 4  ;;  %v901_v44 = vrot.slane %v900_v23, 4  ;;  %v1532_v3 = vsel %vm3131_vm8, %v1530_v58, %v1531_v41  ;;  %v927_v42 = vshll.u32 %v3242_v54, 16 }
  0x58   : > { %v913_v24 = vrot.slane %v4019_v55, 5  ;;  %2568 = vmatmul.mubr.msk.bf16.gmra.mrb[24].mxu1 %vm458_vm2, %v2388_v28  ;;  %v923_v62 = vrot.slane %v4020_v6, 4  ;;  %v2435_v35 = vcombine.low %v1529_v26, %v1532_v3  ;;  %v919_v50 = vrot.slane %v917_v60, 5 }
  0x59   : > { %v2420_v36 = vrot.slane %v3059_v45, 9  ;;  %v906_v16 = vsel %vm3096_vm5, %v901_v44, %v905_v61  ;;  %v929_v1 = vrot.slane %v927_v42, 5  ;;  %v1535_v59 = vrot.slane %v3064_v7, 5  ;;  %v3286_v61 = vld [vmem:[%s2826_s25 + $0x74] sm:$0x1] }
  0x5a   : > { %v914_v14 = vor.u32 %v913_v24, %v910_v22  ;;  %v1538_v57 = vrot.slane %v3195_v40, 5  ;;  %v2389_v0 = vcombine.low %v896_v27, %v906_v16  ;;  %2601 = vmatprep.mubr.msk.bf16.mxu0 %vm458_vm2, %v2435_v35  ;;  %v924_v63 = vor.u32 %v923_v62, %v919_v50 }
  0x5b   : > { %v944_v45 = vsel %vm3096_vm5, %v2923_v34, %v2893_v18  ;;  %v1536_v51 = vsel %vm3131_vm8, %v2420_v36, %v1535_v59  ;;  %v1537_v43 = vrot.slane %v1535_v59, 4  ;;  %v951_v38 = vshll.u32 %v3263_v11, 16 }
  0x5c   : > { %v915_v5 = vrot.slane %v914_v14, 4  ;;  %v2421_v7 = vrot.slane %v3083_v21, 9  ;;  %2571 = vmatprep.mubr.msk.bf16.mxu1 %vm458_vm2, %v2389_v0  ;;  %v925_v28 = vrot.slane %v924_v63, 4  ;;  %v1542_v13 = vrot.slane %v3086_v17, 5 }
  0x5d   : > { %v1545_v37 = vrot.slane %v3218_v29, 5  ;;  %v1539_v18 = vsel %vm3131_vm8, %v1537_v43, %v1538_v57  ;;  %v953_v34 = vrot.slane %v951_v38, 5  ;;  %v4021_v23 = vshrl.u32 %v2885_v12, 16 }
  0x5e   : > { %v920_v40 = vsel %vm3096_vm5, %v915_v5, %v919_v50  ;;  %v4022_v21 = vshll.u32 %v2885_v12, 16  ;;  %v930_v41 = vsel %vm3096_vm5, %v925_v28, %v929_v1  ;;  %v2436_v27 = vcombine.low %v1536_v51, %v1539_v18  ;;  %v3309_v50 = vld [vmem:[%s2826_s25 + $0x80] sm:$0x1] }
  0x5f   : > { %v958_v26 = vrot.slane %v4021_v23, 4  ;;  %v1543_v17 = vsel %vm3131_vm8, %v2421_v7, %v1542_v13  ;;  %v1544_v29 = vrot.slane %v1542_v13, 4  ;;  %v2390_v10 = vcombine.low %v920_v40, %v930_v41 }
  0x60   : > { %v961_v58 = vrot.slane %v4022_v21, 5  ;;  %v954_v22 = vsel %vm3096_vm5, %v2931_v39, %v953_v34  ;;  %v965_v24 = vshll.u32 %v2888_v15, 16  ;;  %2602 = vmatmul.mubr.msk.bf16.gmra.mrb[24].mxu0 %vm458_vm2, %v2436_v27  ;;  %v4023_v3 = vshrl.u32 %v2888_v15, 16 }
  0x61   : > { %v2391_v60 = vcombine.low %v944_v45, %v954_v22  ;;  %v1546_v44 = vsel %vm3131_vm8, %v1544_v29, %v1545_v37  ;;  %v975_v62 = vshll.u32 %v3286_v61, 16  ;;  %2572 = vmatmul.mubr.msk.bf16.gmra.mrb[28].mxu1 %vm458_vm2, %v2390_v10  ;;  %v2422_v39 = vrot.slane %v3101_v56, 9  ;;  %v3341_v29 = vld [vmem:[%s2826_s25 + $0x8c] sm:$0x1] }
  0x62   : > { %v962_v55 = vor.u32 %v961_v58, %v958_v26  ;;  %v971_v6 = vrot.slane %v4023_v3, 4  ;;  %v2437_v42 = vcombine.low %v1543_v17, %v1546_v44  ;;  %v967_v14 = vrot.slane %v965_v24, 5 }
  0x63   : > { %2575 = vmatprep.mubr.msk.bf16.mxu1 %vm458_vm2, %v2391_v60  ;;  %v977_v36 = vrot.slane %v975_v62, 5  ;;  %v1549_v16 = vrot.slane %v3104_v47, 5  ;;  %v1552_v1 = vrot.slane %v3242_v54, 5  ;;  %v4024_v59 = vshrl.u32 %v2918_v32, 16 }
  0x64   : > { %v963_v35 = vrot.slane %v962_v55, 4  ;;  %2605 = vmatprep.mubr.msk.bf16.mxu0 %vm458_vm2, %v2437_v42  ;;  %v972_v5 = vor.u32 %v971_v6, %v967_v14  ;;  %v4025_v56 = vshll.u32 %v2918_v32, 16  ;;  %v989_v45 = vshll.u32 %v2921_v33, 16 }
  0x65   : > { %v982_v57 = vrot.slane %v4024_v59, 4  ;;  %v1550_v51 = vsel %vm3131_vm8, %v2422_v39, %v1549_v16  ;;  %v1551_v47 = vrot.slane %v1549_v16, 4  ;;  %v4026_v54 = vshrl.u32 %v2921_v33, 16  ;;  %v3363_v16 = vld [vmem:[%s2826_s25 + $0x98] sm:$0x1] }
  0x66   : > { %v968_v0 = vsel %vm3096_vm5, %v963_v35, %v967_v14  ;;  %v985_v63 = vrot.slane %v4025_v56, 5  ;;  %v999_v38 = vshll.u32 %v3309_v50, 16  ;;  %v973_v7 = vrot.slane %v972_v5, 4 }
  0x67   : > { %v995_v43 = vrot.slane %v4026_v54, 4  ;;  %v991_v28 = vrot.slane %v989_v45, 5  ;;  %v4027_v13 = vrot.slane %v2873_v4, 5  ;;  %v4028_v37 = vrot.slane %v2868_v2, 9 }
  0x68   : > { %v986_v40 = vor.u32 %v985_v63, %v982_v57  ;;  %v1553_v34 = vsel %vm3131_vm8, %v1551_v47, %v1552_v1  ;;  %v1001_v23 = vrot.slane %v999_v38, 5  ;;  %v1559_v26 = vrot.slane %v3263_v11, 5 }
  0x69   : > { %v1557_v18 = vsel %vm3131_vm8, %v4028_v37, %v4027_v13  ;;  %v4029_v21 = vshrl.u32 %v2944_v48, 16  ;;  %v978_v41 = vsel %vm3096_vm5, %v973_v7, %v977_v36  ;;  %v2438_v27 = vcombine.low %v1550_v51, %v1553_v34 }
  0x6a   : > { %v987_v17 = vrot.slane %v986_v40, 4  ;;  %v996_v4 = vor.u32 %v995_v43, %v991_v28  ;;  %v2392_v2 = vcombine.low %v968_v0, %v978_v41  ;;  %v1560_v10 = vsel %vm3131_vm8, %v2897_v20, %v1559_v26 }
  0x6b   : > { %v1006_v58 = vrot.slane %v4029_v21, 4  ;;  %v4030_v22 = vshll.u32 %v2944_v48, 16  ;;  %v1013_v11 = vshll.u32 %v2953_v53, 16  ;;  %2606 = vmatmul.mubr.msk.bf16.gmra.mrb[28].mxu0 %vm458_vm2, %v2438_v27  ;;  %v2439_v44 = vcombine.low %v1557_v18, %v1560_v10  ;;  %v3386_v27 = vld [vmem:[%s2826_s25 + $0xa4] sm:$0x1] }
  0x6c   : > { %v992_v24 = vsel %vm3096_vm5, %v987_v17, %v991_v28  ;;  %v997_v60 = vrot.slane %v996_v4, 4  ;;  %v4031_v3 = vshrl.u32 %v2953_v53, 16  ;;  %2576 = vmatmul.mubr.msk.bf16.gmra.mrb[32].mxu1 %vm458_vm2, %v2392_v2  ;;  %v1023_v42 = vshll.u32 %v3341_v29, 16 }
  0x6d   : > { %v1009_v55 = vrot.slane %v4030_v22, 5  ;;  %v1015_v20 = vrot.slane %v1013_v11, 5  ;;  %v2424_v35 = vrot.slane %v2885_v12, 9  ;;  %2609 = vmatprep.mubr.msk.bf16.mxu0 %vm458_vm2, %v2439_v44  ;;  %v1563_v39 = vrot.slane %v2888_v15, 5 }
  0x6e   : > { %v1019_v6 = vrot.slane %v4031_v3, 4  ;;  %v1002_v14 = vsel %vm3096_vm5, %v997_v60, %v1001_v23  ;;  %v1566_v36 = vrot.slane %v3286_v61, 5  ;;  %v4032_v1 = vshrl.u32 %v2979_v8, 16 }
  0x6f   : > { %v1010_v62 = vor.u32 %v1009_v55, %v1006_v58  ;;  %v2393_v57 = vcombine.low %v992_v24, %v1002_v14  ;;  %v1025_v56 = vrot.slane %v1023_v42, 5  ;;  %v1564_v12 = vsel %vm3131_vm8, %v2424_v35, %v1563_v39 }
  0x70   : > { %v1030_v59 = vrot.slane %v4032_v1, 4  ;;  %v1020_v5 = vor.u32 %v1019_v6, %v1015_v20  ;;  %v1565_v63 = vrot.slane %v1563_v39, 4  ;;  %v4033_v45 = vshll.u32 %v2979_v8, 16 }
  0x71   : > { %v1011_v0 = vrot.slane %v1010_v62, 4  ;;  %v1037_v15 = vshll.u32 %v2987_v19, 16  ;;  %2579 = vmatprep.mubr.msk.bf16.mxu1 %vm458_vm2, %v2393_v57  ;;  %v4034_v54 = vshrl.u32 %v2987_v19, 16  ;;  %v1047_v38 = vshll.u32 %v3363_v16, 16 }
  0x72   : > { %v1033_v51 = vrot.slane %v4033_v45, 5  ;;  %v1021_v47 = vrot.slane %v1020_v5, 4  ;;  %v1567_v7 = vsel %vm3131_vm8, %v1565_v63, %v1566_v36  ;;  %v2425_v13 = vrot.slane %v2918_v32, 9 }
  0x73   : > { %v1016_v61 = vsel %vm3096_vm5, %v1011_v0, %v1015_v20  ;;  %v1043_v43 = vrot.slane %v4034_v54, 4  ;;  %v1039_v28 = vrot.slane %v1037_v15, 5  ;;  %v2440_v18 = vcombine.low %v1564_v12, %v1567_v7 }
  0x74   : > { %v1034_v40 = vor.u32 %v1033_v51, %v1030_v59  ;;  %v1026_v37 = vsel %vm3096_vm5, %v1021_v47, %v1025_v56  ;;  %v1049_v34 = vrot.slane %v1047_v38, 5  ;;  %v1570_v23 = vrot.slane %v2921_v33, 5  ;;  %v3410_v59 = vld [vmem:[%s2826_s25 + $0xb0] sm:$0x1] }
  0x75   : > { %v2394_v26 = vcombine.low %v1016_v61, %v1026_v37  ;;  %v1044_v58 = vor.u32 %v1043_v43, %v1039_v28  ;;  %v1573_v41 = vrot.slane %v3309_v50, 5  ;;  %2610 = vmatmul.mubr.msk.bf16.gmra.mrb[32].mxu0 %vm458_vm2, %v2440_v18  ;;  %v4035_v4 = vshrl.u32 %v3013_v46, 16  ;;  %v345_v18 = vld [vmem:[%s2826_s25 + $0xbc] sm:$0x1] }
  0x76   : > { %v1035_v21 = vrot.slane %v1034_v40, 4  ;;  %v1571_v17 = vsel %vm3131_vm8, %v2425_v13, %v1570_v23  ;;  %v1572_v32 = vrot.slane %v1570_v23, 4  ;;  %v4036_v10 = vshll.u32 %v3013_v46, 16 }
  0x77   : > { %v1054_v2 = vrot.slane %v4035_v4, 4  ;;  %2580 = vmatmul.mubr.msk.bf16.gmra.mrb[36].mxu1 %vm458_vm2, %v2394_v26  ;;  %v1045_v50 = vrot.slane %v1044_v58, 4  ;;  %v1061_v55 = vshll.u32 %v3016_v49, 16  ;;  %v4037_v11 = vshrl.u32 %v3016_v49, 16 }
  0x78   : > { %v1057_v22 = vrot.slane %v4036_v10, 5  ;;  %v1040_v33 = vsel %vm3096_vm5, %v1035_v21, %v1039_v28  ;;  %v1574_v60 = vsel %vm3131_vm8, %v1572_v32, %v1573_v41  ;;  %v1071_v3 = vshll.u32 %v3386_v27, 16  ;;  %v4043_v32 = vld [vmem:[#allocation9_spill] sm:$0xff] }
  0x79   : > { %v1067_v24 = vrot.slane %v4037_v11, 4  ;;  %v2426_v6 = vrot.slane %v2944_v48, 9  ;;  %v1050_v62 = vsel %vm3096_vm5, %v1045_v50, %v1049_v34  ;;  %v2441_v20 = vcombine.low %v1571_v17, %v1574_v60 }
  0x7a   : > { %v1058_v44 = vor.u32 %v1057_v22, %v1054_v2  ;;  %v1063_v42 = vrot.slane %v1061_v55, 5  ;;  %v1577_v35 = vrot.slane %v2953_v53, 5  ;;  %v2395_v14 = vcombine.low %v1040_v33, %v1050_v62 }
  0x7b   : > { %v1073_v36 = vrot.slane %v1071_v3, 5  ;;  %v1580_v1 = vrot.slane %v3341_v29, 5  ;;  %2613 = vmatprep.mubr.msk.bf16.mxu0 %vm458_vm2, %v2441_v20  ;;  %v4038_v5 = vshrl.u32 %v3042_v30, 16  ;;  %v4039_v29 = vshll.u32 %v3042_v30, 16 }
  0x7c   : > { %v1059_v39 = vrot.slane %v1058_v44, 4  ;;  %v1068_v57 = vor.u32 %v1067_v24, %v1063_v42  ;;  %v1578_v48 = vsel %vm3131_vm8, %v2426_v6, %v1577_v35  ;;  %v1579_v0 = vrot.slane %v1577_v35, 4  ;;  %2583 = vmatprep.mubr.msk.bf16.mxu1 %vm458_vm2, %v2395_v14 }
  0x7d   : > { %v1078_v56 = vrot.slane %v4038_v5, 4  ;;  %v1081_v12 = vrot.slane %v4039_v29, 5  ;;  %v1085_v63 = vshll.u32 %v3051_v25, 16  ;;  %v4040_v45 = vshrl.u32 %v3051_v25, 16 }
  0x7e   : > { %v1064_v53 = vsel %vm3096_vm5, %v1059_v39, %v1063_v42  ;;  %v1069_v15 = vrot.slane %v1068_v57, 4  ;;  %v1581_v61 = vsel %vm3131_vm8, %v1579_v0, %v1580_v1  ;;  %v1095_v47 = vshll.u32 %v3410_v59, 16 }
  0x7f   : > { %v1091_v51 = vrot.slane %v4040_v45, 4  ;;  %v2427_v54 = vrot.slane %v2979_v8, 9  ;;  %v2442_v43 = vcombine.low %v1578_v48, %v1581_v61  ;;  %v1082_v38 = vor.u32 %v1081_v12, %v1078_v56 }
  0x80   : > { %v1087_v7 = vrot.slane %v1085_v63, 5  ;;  %v1584_v40 = vrot.slane %v2987_v19, 5  ;;  %v1074_v28 = vsel %vm3096_vm5, %v1069_v15, %v1073_v36  ;;  %v1097_v13 = vrot.slane %v1095_v47, 5  ;;  %v362_v15 = vld [vmem:[#allocation2 + $0x80] sm:$0xff]  ;;  %v365_v47 = vld [vmem:[#allocation2 + $0x98] sm:$0xff] }
  0x81   : > { %v1587_v37 = vrot.slane %v3363_v16, 5  ;;  %v4041_v34 = vshrl.u32 %v3068_v52, 16  ;;  %v2396_v26 = vcombine.low %v1064_v53, %v1074_v28  ;;  %2614 = vmatmul.mubr.msk.bf16.gmra.mrb[36].mxu0 %vm458_vm2, %v2442_v43  ;;  %v1083_v21 = vrot.slane %v1082_v38, 4  ;;  %v363_v38 = vld [vmem:[#allocation2 + $0x88] sm:$0xff] }
  0x82   : > { %v1092_v8 = vor.u32 %v1091_v51, %v1087_v7  ;;  %v1585_v58 = vsel %vm3131_vm8, %v2427_v54, %v1584_v40  ;;  %v1586_v41 = vrot.slane %v1584_v40, 4  ;;  %v4042_v19 = vshll.u32 %v3068_v52, 16  ;;  %v364_v51 = vld [vmem:[#allocation2 + $0x90] sm:$0xff] }
  0x83   : > { %v1102_v23 = vrot.slane %v4041_v34, 4  ;;  %v1109_v4 = vshll.u32 %v4043_v32, 16  ;;  %v4044_v16 = vshrl.u32 %v4043_v32, 16  ;;  %2584 = vmatmul.mubr.msk.bf16.gmra.mrb[40].mxu1 %vm458_vm2, %v2396_v26  ;;  %v1088_v10 = vsel %vm3096_vm5, %v1083_v21, %v1087_v7  ;;  %v368_v21 = vld [vmem:[#allocation2 + $0xb0] sm:$0xff] }
  0x84   : > { %v1105_v17 = vrot.slane %v4042_v19, 5  ;;  %v1093_v22 = vrot.slane %v1092_v8, 4  ;;  %v1119_v33 = vshll.u32 %v345_v18, 16  ;;  %v2428_v50 = vrot.slane %v3013_v46, 9  ;;  %v366_v19 = vld [vmem:[#allocation2 + $0xa0] sm:$0xff] }
  0x85   : > { %v1115_v2 = vrot.slane %v4044_v16, 4  ;;  %v1588_v55 = vsel %vm3131_vm8, %v1586_v41, %v1587_v37  ;;  %v1111_v24 = vrot.slane %v1109_v4, 5  ;;  %v1591_v60 = vrot.slane %v3016_v49, 5  ;;  %v348_v37 = vld [vmem:[#allocation2 + $0x10] sm:$0xff]  ;;  %v369_v16 = vld [vmem:[#allocation2 + $0xb8] sm:$0xff] }
  0x86   : > { %v1106_v11 = vor.u32 %v1105_v17, %v1102_v23  ;;  %v1098_v44 = vsel %vm3096_vm5, %v1093_v22, %v1097_v13  ;;  %v2443_v3 = vcombine.low %v1585_v58, %v1588_v55  ;;  %v1121_v6 = vrot.slane %v1119_v33, 5  ;;  %v349_v23 = vld [vmem:[#allocation2 + $0x18] sm:$0xff]  ;;  %v347_v58 = vld [vmem:[#allocation2 + $0x8] sm:$0xff] }
  0x87   : > { %v1594_v62 = vrot.slane %v3386_v27, 5  ;;  %v2397_v20 = vcombine.low %v1088_v10, %v1098_v44  ;;  %v1116_v35 = vor.u32 %v1115_v2, %v1111_v24  ;;  %v1592_v46 = vsel %vm3131_vm8, %v2428_v50, %v1591_v60  ;;  %v367_v50 = vld [vmem:[#allocation2 + $0xa8] sm:$0xff]  ;;  %v352_v44 = vld [vmem:[#allocation2 + $0x30] sm:$0xff] }
  0x88   : > { %v1107_v42 = vrot.slane %v1106_v11, 4  ;;  %2617 = vmatprep.mubr.msk.bf16.mxu0 %vm458_vm2, %v2443_v3  ;;  %v1593_v14 = vrot.slane %v1591_v60, 4  ;;  %v2429_v39 = vrot.slane %v3042_v30, 9  ;;  %v1598_v49 = vrot.slane %v3051_v25, 5 }
  0x89   : > { %v1601_v36 = vrot.slane %v3410_v59, 5  ;;  %2587 = vmatprep.mubr.msk.bf16.mxu1 %vm458_vm2, %v2397_v20  ;;  %v1117_v1 = vrot.slane %v1116_v35, 4  ;;  %v2430_v57 = vrot.slane %v3068_v52, 9  ;;  %v1605_v48 = vrot.slane %v4043_v32, 5  ;;  %v353_v20 = vld [vmem:[#allocation2 + $0x38] sm:$0xff]  ;;  %v372_v35 = vld [vmem:[#allocation2 + $0xd0] sm:$0xff] }
  0x8a   : > { %v1112_v27 = vsel %vm3096_vm5, %v1107_v42, %v1111_v24  ;;  %v1595_v0 = vsel %vm3131_vm8, %v1593_v14, %v1594_v62  ;;  %v1599_v30 = vsel %vm3131_vm8, %v2429_v39, %v1598_v49  ;;  %v1600_v5 = vrot.slane %v1598_v49, 4  ;;  %v351_v14 = vld [vmem:[#allocation2 + $0x28] sm:$0xff]  ;;  %v370_v49 = vld [vmem:[#allocation2 + $0xc0] sm:$0xff] }
  0x8b   : > { %v1608_v25 = vrot.slane %v345_v18, 5  ;;  %v1122_v59 = vsel %vm3096_vm5, %v1117_v1, %v1121_v6  ;;  %v2444_v56 = vcombine.low %v1592_v46, %v1595_v0  ;;  %v1607_v53 = vrot.slane %v1605_v48, 4  ;;  %v346_v18 = vld [vmem:[#allocation2] sm:$0xff] }
  0x8c   : > { %v2398_v29 = vcombine.low %v1112_v27, %v1122_v59  ;;  %v1602_v12 = vsel %vm3131_vm8, %v1600_v5, %v1601_v36  ;;  %v1606_v63 = vsel %vm3131_vm8, %v2430_v57, %v1605_v48  ;;  %v350_v6 = vld [vmem:[#allocation2 + $0x20] sm:$0xff]  ;;  %v373_v57 = vld [vmem:[#allocation2 + $0xd8] sm:$0xff]  ;;  %vm2103_vm9 = vcmask (!%p2463_p6), 57344  }
  0x8d   : > { %2618 = vmatmul.mubr.msk.bf16.gmra.mrb[40].mxu0 %vm458_vm2, %v2444_v56  ;;  %v2445_v52 = vcombine.low %v1599_v30, %v1602_v12  ;;  %v1609_v45 = vsel %vm3131_vm8, %v1607_v53, %v1608_v25  ;;  %v371_v25 = vld [vmem:[#allocation2 + $0xc8] sm:$0xff]  ;;  %v356_v12 = vld [vmem:[#allocation2 + $0x50] sm:$0xff] }
  0x8e   : > { %2588 = vmatmul.mubr.msk.bf16.gmra.mrb[44].mxu1 %vm458_vm2, %v2398_v29  ;;  %v2446_v31 = vcombine.low %v1606_v63, %v1609_v45  ;;  %v354_v63 = vld [vmem:[#allocation2 + $0x40] sm:$0xff] }
  0x8f   : > { %2621 = vmatprep.mubr.msk.bf16.mxu0 %vm458_vm2, %v2445_v52 }
  0x95   : > { %2622 = vmatmul.mubr.msk.bf16.gmra.mrb[44].mxu0 %vm458_vm2, %v2446_v31  ;;  %v357_v31 = vld [vmem:[#allocation2 + $0x58] sm:$0xff] }
  0xfb   : > { %v2543_v61 = vpop.f32.mrb[0].mxu1 }
  0xfc   : > { %v690_v54 = vadd.f32 %v2543_v61, %v364_v51  ;;  %v609_v43 = vpop.f32.mrb[1].mxu1 }
  0xfd   : > { %v688_v7 = vadd.f32 %v609_v43, %v362_v15  ;;  %v2544_v40 = vpop.f32.mrb[2].mxu1  ;;  %v376_v15 = vld [vmem:[#allocation2 + $0xf0] sm:$0xff]  ;;  %v374_v43 = vld [vmem:[#allocation2 + $0xe0] sm:$0xff] }
  0xfe   : > { %722 = vst.msk [vmem:[#allocation2 + $0x90] sm:$0xff] %vm458_vm2, %v690_v54  ;;  %v691_v28 = vadd.f32 %v2544_v40, %v365_v47  ;;  %v612_v13 = vpop.f32.mrb[3].mxu1  ;;  %v355_v47 = vld [vmem:[#allocation2 + $0x48] sm:$0xff] }
  0xff   : > { %720 = vst.msk [vmem:[#allocation2 + $0x80] sm:$0xff] %vm458_vm2, %v688_v7  ;;  %v689_v9 = vadd.f32 %v612_v13, %v363_v38 }
 0x100   : > { %723 = vst.msk [vmem:[#allocation2 + $0x98] sm:$0xff] %vm458_vm2, %v691_v28  ;;  %v377_v28 = vld [vmem:[#allocation2 + $0xf8] sm:$0xff] }
 0x101   : > { %721 = vst.msk [vmem:[#allocation2 + $0x88] sm:$0xff] %vm458_vm2, %v689_v9  ;;  %v2527_v34 = vpop.f32.mrb[0].mxu0 }
 0x102   : > { %v674_v26 = vadd.f32 %v2527_v34, %v348_v37  ;;  %v545_v8 = vpop.f32.mrb[1].mxu0  ;;  %v375_v34 = vld [vmem:[#allocation2 + $0xe8] sm:$0xff] }
 0x103   : > { %v672_v41 = vadd.f32 %v545_v8, %v346_v18  ;;  %v2528_v17 = vpop.f32.mrb[2].mxu0  ;;  %v2547_v32 = vpop.f32.mrb[4].mxu1 }
 0x104   : > { %706 = vst.msk [vmem:[#allocation2 + $0x10] sm:$0xff] %vm458_vm2, %v674_v26  ;;  %v675_v4 = vadd.f32 %v2528_v17, %v349_v23  ;;  %v548_v2 = vpop.f32.mrb[3].mxu0  ;;  %v694_v10 = vadd.f32 %v2547_v32, %v368_v21  ;;  %v625_v22 = vpop.f32.mrb[5].mxu1  ;;  %v361_v32 = vld [vmem:[#allocation2 + $0x78] sm:$0xff] }
 0x105   : > { %704 = vst.msk [vmem:[#allocation2] sm:$0xff] %vm458_vm2, %v672_v41  ;;  %v673_v33 = vadd.f32 %v548_v2, %v347_v58  ;;  %v692_v55 = vadd.f32 %v625_v22, %v366_v19  ;;  %v2548_v11 = vpop.f32.mrb[6].mxu1  ;;  %v360_v58 = vld [vmem:[#allocation2 + $0x70] sm:$0xff]  ;;  %v358_v19 = vld [vmem:[#allocation2 + $0x60] sm:$0xff]  ;;  %v359_v2 = vld [vmem:[#allocation2 + $0x68] sm:$0xff] }
 0x106   : > { %707 = vst.msk [vmem:[#allocation2 + $0x18] sm:$0xff] %vm458_vm2, %v675_v4  ;;  %726 = vst.msk [vmem:[#allocation2 + $0xb0] sm:$0xff] %vm458_vm2, %v694_v10  ;;  %v695_v24 = vadd.f32 %v2548_v11, %v369_v16  ;;  %v628_v60 = vpop.f32.mrb[7].mxu1 }
 0x107   : > { %705 = vst.msk [vmem:[#allocation2 + $0x8] sm:$0xff] %vm458_vm2, %v673_v33  ;;  %724 = vst.msk [vmem:[#allocation2 + $0xa0] sm:$0xff] %vm458_vm2, %v692_v55  ;;  %v693_v3 = vadd.f32 %v628_v60, %v367_v50 }
 0x108   : > { %727 = vst.msk [vmem:[#allocation2 + $0xb8] sm:$0xff] %vm458_vm2, %v695_v24 }
 0x109   : > { %v2531_v62 = vpop.f32.mrb[4].mxu0  ;;  %725 = vst.msk [vmem:[#allocation2 + $0xa8] sm:$0xff] %vm458_vm2, %v693_v3 }
 0x10a   : > { %v678_v42 = vadd.f32 %v2531_v62, %v352_v44  ;;  %v561_v46 = vpop.f32.mrb[5].mxu0 }
 0x10b   : > { %v676_v39 = vadd.f32 %v561_v46, %v350_v6  ;;  %v2532_v36 = vpop.f32.mrb[6].mxu0  ;;  %v2551_v27 = vpop.f32.mrb[8].mxu1  ;;  %v1125_v33 = vld [vmem:[#allocation2 + $0x10] sm:$0xff] }
 0x10c   : > { %710 = vst.msk [vmem:[#allocation2 + $0x30] sm:$0xff] %vm458_vm2, %v678_v42  ;;  %v679_v1 = vadd.f32 %v2532_v36, %v353_v20  ;;  %v564_v48 = vpop.f32.mrb[7].mxu0  ;;  %v698_v0 = vadd.f32 %v2551_v27, %v372_v35  ;;  %v641_v30 = vpop.f32.mrb[9].mxu1  ;;  %v1123_v60 = vld [vmem:[#allocation2] sm:$0xff] }
 0x10d   : > { %708 = vst.msk [vmem:[#allocation2 + $0x20] sm:$0xff] %vm458_vm2, %v676_v39  ;;  %v677_v5 = vadd.f32 %v564_v48, %v351_v14  ;;  %v696_v59 = vadd.f32 %v641_v30, %v370_v49  ;;  %v2552_v56 = vpop.f32.mrb[10].mxu1  ;;  %v1126_v62 = vld [vmem:[#allocation2 + $0x18] sm:$0xff] }
 0x10e   : > { %711 = vst.msk [vmem:[#allocation2 + $0x38] sm:$0xff] %vm458_vm2, %v679_v1  ;;  %730 = vst.msk [vmem:[#allocation2 + $0xd0] sm:$0xff] %vm458_vm2, %v698_v0  ;;  %v699_v53 = vadd.f32 %v2552_v56, %v373_v57  ;;  %v644_v29 = vpop.f32.mrb[11].mxu1  ;;  %v1124_v35 = vld [vmem:[#allocation2 + $0x8] sm:$0xff] }
 0x10f   : > { %709 = vst.msk [vmem:[#allocation2 + $0x28] sm:$0xff] %vm458_vm2, %v677_v5  ;;  %728 = vst.msk [vmem:[#allocation2 + $0xc0] sm:$0xff] %vm458_vm2, %v696_v59  ;;  %v697_v52 = vadd.f32 %v644_v29, %v371_v25 }
 0x110   : > { %731 = vst.msk [vmem:[#allocation2 + $0xd8] sm:$0xff] %vm458_vm2, %v699_v53 }
 0x111   : > { %v2535_v45 = vpop.f32.mrb[8].mxu0  ;;  %729 = vst.msk [vmem:[#allocation2 + $0xc8] sm:$0xff] %vm458_vm2, %v697_v52 }
 0x112   : > { %v682_v51 = vadd.f32 %v2535_v45, %v356_v12  ;;  %v577_v61 = vpop.f32.mrb[9].mxu0 }
 0x113   : > { %v680_v54 = vadd.f32 %v577_v61, %v354_v63  ;;  %v2536_v38 = vpop.f32.mrb[10].mxu0  ;;  %v2555_v7 = vpop.f32.mrb[12].mxu1  ;;  %v1129_v27 = vld [vmem:[#allocation2 + $0x30] sm:$0xff] }
 0x114   : > { %714 = vst.msk [vmem:[#allocation2 + $0x50] sm:$0xff] %vm458_vm2, %v682_v51  ;;  %v683_v40 = vadd.f32 %v2536_v38, %v357_v31  ;;  %v580_v13 = vpop.f32.mrb[11].mxu0  ;;  %v702_v9 = vadd.f32 %v2555_v7, %v376_v15  ;;  %v657_v37 = vpop.f32.mrb[13].mxu1  ;;  %v1127_v0 = vld [vmem:[#allocation2 + $0x20] sm:$0xff] }
 0x115   : > { %712 = vst.msk [vmem:[#allocation2 + $0x40] sm:$0xff] %vm458_vm2, %v680_v54  ;;  %v681_v18 = vadd.f32 %v580_v13, %v355_v47  ;;  %v700_v23 = vadd.f32 %v657_v37, %v374_v43  ;;  %v2556_v26 = vpop.f32.mrb[14].mxu1  ;;  %v1130_v59 = vld [vmem:[#allocation2 + $0x38] sm:$0xff] }
 0x116   : > { %715 = vst.msk [vmem:[#allocation2 + $0x58] sm:$0xff] %vm458_vm2, %v683_v40  ;;  %734 = vst.msk [vmem:[#allocation2 + $0xf0] sm:$0xff] %vm458_vm2, %v702_v9  ;;  %v703_v21 = vadd.f32 %v2556_v26, %v377_v28  ;;  %v660_v8 = vpop.f32.mrb[15].mxu1  ;;  %v1128_v52 = vld [vmem:[#allocation2 + $0x28] sm:$0xff] }
 0x117   : > { %713 = vst.msk [vmem:[#allocation2 + $0x48] sm:$0xff] %vm458_vm2, %v681_v18  ;;  %732 = vst.msk [vmem:[#allocation2 + $0xe0] sm:$0xff] %vm458_vm2, %v700_v23  ;;  %v701_v41 = vadd.f32 %v660_v8, %v375_v34 }
 0x118   : > { %735 = vst.msk [vmem:[#allocation2 + $0xf8] sm:$0xff] %vm458_vm2, %v703_v21 }
 0x119   : > { %v2539_v17 = vpop.f32.mrb[12].mxu0  ;;  %733 = vst.msk [vmem:[#allocation2 + $0xe8] sm:$0xff] %vm458_vm2, %v701_v41 }
 0x11a   : > { %v686_v4 = vadd.f32 %v2539_v17, %v360_v58  ;;  %v593_v16 = vpop.f32.mrb[13].mxu0 }
 0x11b   : > { %v684_v10 = vadd.f32 %v593_v16, %v358_v19  ;;  %v2540_v22 = vpop.f32.mrb[14].mxu0  ;;  %v2561_v50 = vpop.f32.mrb[16].mxu1  ;;  %v1133_v43 = vld [vmem:[#allocation2 + $0x50] sm:$0xff] }
 0x11c   : > { %718 = vst.msk [vmem:[#allocation2 + $0x70] sm:$0xff] %vm458_vm2, %v686_v4  ;;  %v687_v55 = vadd.f32 %v2540_v22, %v361_v32  ;;  %v596_v11 = vpop.f32.mrb[15].mxu0  ;;  %v1417_v24 = vadd.f32 %v2561_v50, %v1125_v33  ;;  %v1288_v44 = vpop.f32.mrb[17].mxu1  ;;  %v1131_v28 = vld [vmem:[#allocation2 + $0x40] sm:$0xff] }
 0x11d   : > { %716 = vst.msk [vmem:[#allocation2 + $0x60] sm:$0xff] %vm458_vm2, %v684_v10  ;;  %v685_v3 = vadd.f32 %v596_v11, %v359_v2  ;;  %v1415_v6 = vadd.f32 %v1288_v44, %v1123_v60  ;;  %v2562_v20 = vpop.f32.mrb[18].mxu1  ;;  %v1134_v34 = vld [vmem:[#allocation2 + $0x58] sm:$0xff] }
 0x11e   : > { %719 = vst.msk [vmem:[#allocation2 + $0x78] sm:$0xff] %vm458_vm2, %v687_v55  ;;  %1449 = vst.msk [vmem:[#allocation2 + $0x10] sm:$0xff] %vm458_vm2, %v1417_v24  ;;  %v1418_v42 = vadd.f32 %v2562_v20, %v1126_v62  ;;  %v1291_v46 = vpop.f32.mrb[19].mxu1  ;;  %v1132_v41 = vld [vmem:[#allocation2 + $0x48] sm:$0xff] }
 0x11f   : > { %717 = vst.msk [vmem:[#allocation2 + $0x68] sm:$0xff] %vm458_vm2, %v685_v3  ;;  %1447 = vst.msk [vmem:[#allocation2] sm:$0xff] %vm458_vm2, %v1415_v6  ;;  %v1416_v14 = vadd.f32 %v1291_v46, %v1124_v35 }
 0x120   : > { %1450 = vst.msk [vmem:[#allocation2 + $0x18] sm:$0xff] %vm458_vm2, %v1418_v42 }
 0x121   : > { %v2595_v39 = vpop.f32.mrb[16].mxu0  ;;  %1448 = vst.msk [vmem:[#allocation2 + $0x8] sm:$0xff] %vm458_vm2, %v1416_v14 }
 0x122   : > { %v1775_v49 = vpop.f32.mrb[17].mxu0 }
 0x123   : > { %v2596_v36 = vpop.f32.mrb[18].mxu0  ;;  %v2565_v1 = vpop.f32.mrb[20].mxu1  ;;  %v1137_v33 = vld [vmem:[#allocation2 + $0x70] sm:$0xff] }
 0x124   : > { %v1778_v57 = vpop.f32.mrb[19].mxu0  ;;  %v1421_v48 = vadd.f32 %v2565_v1, %v1129_v27  ;;  %v1304_v30 = vpop.f32.mrb[21].mxu1  ;;  %v1135_v44 = vld [vmem:[#allocation2 + $0x60] sm:$0xff] }
 0x125   : > { %v1612_v5 = vld [vmem:[#allocation2 + $0x10] sm:$0xff]  ;;  %v1419_v25 = vadd.f32 %v1304_v30, %v1127_v0  ;;  %v2566_v56 = vpop.f32.mrb[22].mxu1  ;;  %v1138_v35 = vld [vmem:[#allocation2 + $0x78] sm:$0xff] }
 0x126   : > { %1453 = vst.msk [vmem:[#allocation2 + $0x30] sm:$0xff] %vm458_vm2, %v1421_v48  ;;  %v1904_v53 = vadd.f32 %v2595_v39, %v1612_v5  ;;  %v1610_v29 = vld [vmem:[#allocation2] sm:$0xff]  ;;  %v1422_v12 = vadd.f32 %v2566_v56, %v1130_v59  ;;  %v1307_v63 = vpop.f32.mrb[23].mxu1  ;;  %v1136_v27 = vld [vmem:[#allocation2 + $0x68] sm:$0xff]  ;;  %v1141_v5 = vld [vmem:[#allocation2 + $0x90] sm:$0xff] }
 0x127   : > { %1451 = vst.msk [vmem:[#allocation2 + $0x20] sm:$0xff] %vm458_vm2, %v1419_v25  ;;  %v1902_v45 = vadd.f32 %v1775_v49, %v1610_v29  ;;  %v1613_v31 = vld [vmem:[#allocation2 + $0x18] sm:$0xff]  ;;  %v1420_v51 = vadd.f32 %v1307_v63, %v1128_v52  ;;  %v1139_v29 = vld [vmem:[#allocation2 + $0x80] sm:$0xff] }
 0x128   : > { %1936 = vst.msk [vmem:[#allocation2 + $0x10] sm:$0xff] %vm458_vm2, %v1904_v53  ;;  %1454 = vst.msk [vmem:[#allocation2 + $0x38] sm:$0xff] %vm458_vm2, %v1422_v12  ;;  %v1905_v15 = vadd.f32 %v2596_v36, %v1613_v31  ;;  %v1611_v61 = vld [vmem:[#allocation2 + $0x8] sm:$0xff] }
 0x129   : > { %1934 = vst.msk [vmem:[#allocation2] sm:$0xff] %vm458_vm2, %v1902_v45  ;;  %1452 = vst.msk [vmem:[#allocation2 + $0x28] sm:$0xff] %vm458_vm2, %v1420_v51  ;;  %v1903_v47 = vadd.f32 %v1778_v57, %v1611_v61  ;;  %v2599_v54 = vpop.f32.mrb[20].mxu0  ;;  %v1142_v51 = vld [vmem:[#allocation2 + $0x98] sm:$0xff] }
 0x12a   : > { %1937 = vst.msk [vmem:[#allocation2 + $0x18] sm:$0xff] %vm458_vm2, %v1905_v15  ;;  %v1791_v7 = vpop.f32.mrb[21].mxu0 }
 0x12b   : > { %1935 = vst.msk [vmem:[#allocation2 + $0x8] sm:$0xff] %vm458_vm2, %v1903_v47  ;;  %v2569_v38 = vpop.f32.mrb[24].mxu1  ;;  %v2600_v9 = vpop.f32.mrb[22].mxu0 }
 0x12c   : > { %v1425_v40 = vadd.f32 %v2569_v38, %v1133_v43  ;;  %v1320_v13 = vpop.f32.mrb[25].mxu1  ;;  %v1794_v26 = vpop.f32.mrb[23].mxu0  ;;  %v1140_v38 = vld [vmem:[#allocation2 + $0x88] sm:$0xff] }
 0x12d   : > { %v1616_v37 = vld [vmem:[#allocation2 + $0x30] sm:$0xff]  ;;  %v1423_v18 = vadd.f32 %v1320_v13, %v1131_v28  ;;  %v2570_v23 = vpop.f32.mrb[26].mxu1 }
 0x12e   : > { %1457 = vst.msk [vmem:[#allocation2 + $0x50] sm:$0xff] %vm458_vm2, %v1425_v40  ;;  %v1908_v21 = vadd.f32 %v2599_v54, %v1616_v37  ;;  %v1614_v8 = vld [vmem:[#allocation2 + $0x20] sm:$0xff]  ;;  %v1426_v58 = vadd.f32 %v2570_v23, %v1134_v34  ;;  %v1323_v19 = vpop.f32.mrb[27].mxu1 }
 0x12f   : > { %1455 = vst.msk [vmem:[#allocation2 + $0x40] sm:$0xff] %vm458_vm2, %v1423_v18  ;;  %v1906_v17 = vadd.f32 %v1791_v7, %v1614_v8  ;;  %v1617_v32 = vld [vmem:[#allocation2 + $0x38] sm:$0xff]  ;;  %v1424_v4 = vadd.f32 %v1323_v19, %v1132_v41  ;;  %v1145_v18 = vld [vmem:[#allocation2 + $0xb0] sm:$0xff]  ;;  %v1143_v8 = vld [vmem:[#allocation2 + $0xa0] sm:$0xff] }
 0x130   : > { %1940 = vst.msk [vmem:[#allocation2 + $0x30] sm:$0xff] %vm458_vm2, %v1908_v21  ;;  %1458 = vst.msk [vmem:[#allocation2 + $0x58] sm:$0xff] %vm458_vm2, %v1426_v58  ;;  %v1909_v16 = vadd.f32 %v2600_v9, %v1617_v32  ;;  %v1615_v2 = vld [vmem:[#allocation2 + $0x28] sm:$0xff] }
 0x131   : > { %1938 = vst.msk [vmem:[#allocation2 + $0x20] sm:$0xff] %vm458_vm2, %v1906_v17  ;;  %1456 = vst.msk [vmem:[#allocation2 + $0x48] sm:$0xff] %vm458_vm2, %v1424_v4  ;;  %v1907_v10 = vadd.f32 %v1794_v26, %v1615_v2  ;;  %v1146_v4 = vld [vmem:[#allocation2 + $0xb8] sm:$0xff] }
 0x132   : > { %1941 = vst.msk [vmem:[#allocation2 + $0x38] sm:$0xff] %vm458_vm2, %v1909_v16 }
 0x133   : > { %1939 = vst.msk [vmem:[#allocation2 + $0x28] sm:$0xff] %vm458_vm2, %v1907_v10  ;;  %v2603_v22 = vpop.f32.mrb[24].mxu0 }
 0x134   : > { %v2573_v50 = vpop.f32.mrb[28].mxu1  ;;  %v1807_v11 = vpop.f32.mrb[25].mxu0 }
 0x135   : > { %v1620_v55 = vld [vmem:[#allocation2 + $0x50] sm:$0xff]  ;;  %v1429_v24 = vadd.f32 %v2573_v50, %v1137_v33  ;;  %v1336_v3 = vpop.f32.mrb[29].mxu1  ;;  %v2604_v62 = vpop.f32.mrb[26].mxu0  ;;  %v1144_v50 = vld [vmem:[#allocation2 + $0xa8] sm:$0xff] }
 0x136   : > { %v1912_v60 = vadd.f32 %v2603_v22, %v1620_v55  ;;  %v1618_v6 = vld [vmem:[#allocation2 + $0x40] sm:$0xff]  ;;  %v1427_v20 = vadd.f32 %v1336_v3, %v1135_v44  ;;  %v2574_v46 = vpop.f32.mrb[30].mxu1  ;;  %v1810_v39 = vpop.f32.mrb[27].mxu0 }
 0x137   : > { %v1910_v42 = vadd.f32 %v1807_v11, %v1618_v6  ;;  %v1621_v14 = vld [vmem:[#allocation2 + $0x58] sm:$0xff]  ;;  %1461 = vst.msk [vmem:[#allocation2 + $0x70] sm:$0xff] %vm458_vm2, %v1429_v24  ;;  %v1430_v49 = vadd.f32 %v2574_v46, %v1138_v35  ;;  %v1339_v1 = vpop.f32.mrb[31].mxu1 }
 0x138   : > { %1944 = vst.msk [vmem:[#allocation2 + $0x50] sm:$0xff] %vm458_vm2, %v1912_v60  ;;  %v1913_v36 = vadd.f32 %v2604_v62, %v1621_v14  ;;  %v1619_v57 = vld [vmem:[#allocation2 + $0x48] sm:$0xff]  ;;  %1459 = vst.msk [vmem:[#allocation2 + $0x60] sm:$0xff] %vm458_vm2, %v1427_v20  ;;  %v1428_v48 = vadd.f32 %v1339_v1, %v1136_v27  ;;  %v1149_v20 = vld [vmem:[#allocation2 + $0xd0] sm:$0xff] }
 0x139   : > { %1942 = vst.msk [vmem:[#allocation2 + $0x40] sm:$0xff] %vm458_vm2, %v1910_v42  ;;  %v1911_v0 = vadd.f32 %v1810_v39, %v1619_v57  ;;  %1462 = vst.msk [vmem:[#allocation2 + $0x78] sm:$0xff] %vm458_vm2, %v1430_v49  ;;  %v1147_v49 = vld [vmem:[#allocation2 + $0xc0] sm:$0xff] }
 0x13a   : > { %1945 = vst.msk [vmem:[#allocation2 + $0x58] sm:$0xff] %vm458_vm2, %v1913_v36  ;;  %1460 = vst.msk [vmem:[#allocation2 + $0x68] sm:$0xff] %vm458_vm2, %v1428_v48 }
 0x13b   : > { %1943 = vst.msk [vmem:[#allocation2 + $0x48] sm:$0xff] %vm458_vm2, %v1911_v0  ;;  %v1150_v0 = vld [vmem:[#allocation2 + $0xd8] sm:$0xff] }
 0x13e   : > { %v2607_v30 = vpop.f32.mrb[28].mxu0  ;;  %v1624_v53 = vld [vmem:[#allocation2 + $0x70] sm:$0xff] }
 0x13f   : > { %v2577_v25 = vpop.f32.mrb[32].mxu1  ;;  %v1823_v59 = vpop.f32.mrb[29].mxu0  ;;  %v1916_v63 = vadd.f32 %v2607_v30, %v1624_v53  ;;  %v1622_v31 = vld [vmem:[#allocation2 + $0x60] sm:$0xff] }
 0x140   : > { %v1433_v56 = vadd.f32 %v2577_v25, %v1141_v5  ;;  %v1352_v12 = vpop.f32.mrb[33].mxu1  ;;  %v2608_v52 = vpop.f32.mrb[30].mxu0  ;;  %v1914_v47 = vadd.f32 %v1823_v59, %v1622_v31  ;;  %v1625_v43 = vld [vmem:[#allocation2 + $0x78] sm:$0xff] }
 0x141   : > { %v1431_v45 = vadd.f32 %v1352_v12, %v1139_v29  ;;  %v2578_v15 = vpop.f32.mrb[34].mxu1  ;;  %v1826_v61 = vpop.f32.mrb[31].mxu0  ;;  %1948 = vst.msk [vmem:[#allocation2 + $0x70] sm:$0xff] %vm458_vm2, %v1916_v63  ;;  %v1917_v40 = vadd.f32 %v2608_v52, %v1625_v43  ;;  %v1623_v13 = vld [vmem:[#allocation2 + $0x68] sm:$0xff]  ;;  %v1153_v63 = vld [vmem:[#allocation2 + $0xf0] sm:$0xff] }
 0x142   : > { %1465 = vst.msk [vmem:[#allocation2 + $0x90] sm:$0xff] %vm458_vm2, %v1433_v56  ;;  %v1434_v54 = vadd.f32 %v2578_v15, %v1142_v51  ;;  %v1355_v7 = vpop.f32.mrb[35].mxu1  ;;  %1946 = vst.msk [vmem:[#allocation2 + $0x60] sm:$0xff] %vm458_vm2, %v1914_v47  ;;  %v1915_v9 = vadd.f32 %v1826_v61, %v1623_v13  ;;  %v1148_v56 = vld [vmem:[#allocation2 + $0xc8] sm:$0xff]  ;;  %v1151_v47 = vld [vmem:[#allocation2 + $0xe0] sm:$0xff] }
 0x143   : > { %1463 = vst.msk [vmem:[#allocation2 + $0x80] sm:$0xff] %vm458_vm2, %v1431_v45  ;;  %v1432_v28 = vadd.f32 %v1355_v7, %v1140_v38  ;;  %1949 = vst.msk [vmem:[#allocation2 + $0x78] sm:$0xff] %vm458_vm2, %v1917_v40 }
 0x144   : > { %1466 = vst.msk [vmem:[#allocation2 + $0x98] sm:$0xff] %vm458_vm2, %v1434_v54  ;;  %1947 = vst.msk [vmem:[#allocation2 + $0x68] sm:$0xff] %vm458_vm2, %v1915_v9 }
 0x145   : > { %1464 = vst.msk [vmem:[#allocation2 + $0x88] sm:$0xff] %vm458_vm2, %v1432_v28  ;;  %v1154_v28 = vld [vmem:[#allocation2 + $0xf8] sm:$0xff] }
 0x148   : > { %v2611_v37 = vpop.f32.mrb[32].mxu0 }
 0x149   : > { %v1839_v23 = vpop.f32.mrb[33].mxu0  ;;  %v1628_v21 = vld [vmem:[#allocation2 + $0x90] sm:$0xff] }
 0x14a   : > { %v2581_v34 = vpop.f32.mrb[36].mxu1  ;;  %v2612_v41 = vpop.f32.mrb[34].mxu0  ;;  %v1920_v19 = vadd.f32 %v2611_v37, %v1628_v21  ;;  %v1626_v32 = vld [vmem:[#allocation2 + $0x80] sm:$0xff] }
 0x14b   : > { %v1437_v26 = vadd.f32 %v2581_v34, %v1145_v18  ;;  %v1368_v58 = vpop.f32.mrb[37].mxu1  ;;  %v1842_v2 = vpop.f32.mrb[35].mxu0  ;;  %v1918_v10 = vadd.f32 %v1839_v23, %v1626_v32  ;;  %v1629_v33 = vld [vmem:[#allocation2 + $0x98] sm:$0xff]  ;;  %v1152_v23 = vld [vmem:[#allocation2 + $0xe8] sm:$0xff] }
 0x14c   : > { %v1435_v17 = vadd.f32 %v1368_v58, %v1143_v8  ;;  %v2582_v16 = vpop.f32.mrb[38].mxu1  ;;  %1952 = vst.msk [vmem:[#allocation2 + $0x90] sm:$0xff] %vm458_vm2, %v1920_v19  ;;  %v1921_v11 = vadd.f32 %v2612_v41, %v1629_v33  ;;  %v1627_v60 = vld [vmem:[#allocation2 + $0x88] sm:$0xff] }
 0x14d   : > { %1469 = vst.msk [vmem:[#allocation2 + $0xb0] sm:$0xff] %vm458_vm2, %v1437_v26  ;;  %v1438_v22 = vadd.f32 %v2582_v16, %v1146_v4  ;;  %v1371_v55 = vpop.f32.mrb[39].mxu1  ;;  %1950 = vst.msk [vmem:[#allocation2 + $0x80] sm:$0xff] %vm458_vm2, %v1918_v10  ;;  %v1919_v44 = vadd.f32 %v1842_v2, %v1627_v60  ;;  %v1972_v60 = vld [vmem:[#allocation2 + $0x10] sm:$0xff] (!%p2463_p6) }
 0x14e   : > { %1467 = vst.msk [vmem:[#allocation2 + $0xa0] sm:$0xff] %vm458_vm2, %v1435_v17  ;;  %v1436_v24 = vadd.f32 %v1371_v55, %v1144_v50  ;;  %1953 = vst.msk [vmem:[#allocation2 + $0x98] sm:$0xff] %vm458_vm2, %v1921_v11  ;;  %v1970_v11 = vld [vmem:[#allocation2] sm:$0xff] (!%p2463_p6) }
 0x14f   : > { %1470 = vst.msk [vmem:[#allocation2 + $0xb8] sm:$0xff] %vm458_vm2, %v1438_v22  ;;  %1951 = vst.msk [vmem:[#allocation2 + $0x88] sm:$0xff] %vm458_vm2, %v1919_v44  ;;  %v2034_v44 = vsel (!%p2463_p6), %vm458_vm2, %v1970_v11, 0.0 }
 0x150   : > { %1468 = vst.msk [vmem:[#allocation2 + $0xa8] sm:$0xff] %vm458_vm2, %v1436_v24  ;;  %v1971_v24 = vld [vmem:[#allocation2 + $0x8] sm:$0xff] (!%p2463_p6)  ;;  %2002 = vst.msk [vmem:[%s3989_s2] sm:$0xff] (!%p2463_p6), %vm458_vm2, %v1970_v11 }
 0x151   : > { %2003 = vst.msk [vmem:[%s3989_s2 + $0x8] sm:$0xff] (!%p2463_p6), %vm458_vm2, %v1971_v24  ;;  %2004 = vst.msk [vmem:[%s3989_s2 + $0x10] sm:$0xff] (!%p2463_p6), %vm458_vm2, %v1972_v60 }
 0x154   : > { %v2615_v3 = vpop.f32.mrb[36].mxu0  ;;  %v1632_v6 = vld [vmem:[#allocation2 + $0xb0] sm:$0xff] }
 0x155   : > { %v1855_v62 = vpop.f32.mrb[37].mxu0  ;;  %v1924_v35 = vadd.f32 %v2615_v3, %v1632_v6  ;;  %v1630_v46 = vld [vmem:[#allocation2 + $0xa0] sm:$0xff]  ;;  %v2105_v3 = vmul.f32 (!%p2463_p6), %v1970_v11, %v1970_v11  ;;  %v2035_v6 = vsel (!%p2463_p6), %vm458_vm2, %v1971_v24, 0.0 }
 0x156   : > { %v2585_v42 = vpop.f32.mrb[40].mxu1  ;;  %v2616_v14 = vpop.f32.mrb[38].mxu0  ;;  %v1922_v27 = vadd.f32 %v1855_v62, %v1630_v46  ;;  %v1633_v1 = vld [vmem:[#allocation2 + $0xb8] sm:$0xff]  ;;  %v2106_v62 = vmul.f32 (!%p2463_p6), %v1971_v24, %v1971_v24  ;;  %v2036_v46 = vadd.f32 (!%p2463_p6), %v2035_v6, %v2034_v44 }
 0x157   : > { %v1441_v39 = vadd.f32 %v2585_v42, %v1149_v20  ;;  %v1384_v36 = vpop.f32.mrb[41].mxu1  ;;  %v1858_v57 = vpop.f32.mrb[39].mxu0  ;;  %1956 = vst.msk [vmem:[#allocation2 + $0xb0] sm:$0xff] %vm458_vm2, %v1924_v35  ;;  %v1925_v5 = vadd.f32 %v2616_v14, %v1633_v1  ;;  %v1631_v25 = vld [vmem:[#allocation2 + $0xa8] sm:$0xff]  ;;  %v1973_v20 = vld [vmem:[#allocation2 + $0x18] sm:$0xff] (!%p2463_p6)  ;;  %v1974_v42 = vld [vmem:[#allocation2 + $0x20] sm:$0xff] (!%p2463_p6) }
 0x158   : > { %v1439_v48 = vadd.f32 %v1384_v36, %v1147_v49  ;;  %v2586_v30 = vpop.f32.mrb[42].mxu1  ;;  %1954 = vst.msk [vmem:[#allocation2 + $0xa0] sm:$0xff] %vm458_vm2, %v1922_v27  ;;  %v1923_v29 = vadd.f32 %v1858_v57, %v1631_v25  ;;  %v1975_v35 = vld [vmem:[#allocation2 + $0x28] sm:$0xff] (!%p2463_p6)  ;;  %v2037_v14 = vsel (!%p2463_p6), %vm458_vm2, %v1972_v60, 0.0  ;;  %2005 = vst.msk [vmem:[%s3989_s2 + $0x18] sm:$0xff] (!%p2463_p6), %vm458_vm2, %v1973_v20  ;;  %v1976_v49 = vld [vmem:[#allocation2 + $0x30] sm:$0xff] (!%p2463_p6) }
 0x159   : > { %1473 = vst.msk [vmem:[#allocation2 + $0xd0] sm:$0xff] %vm458_vm2, %v1441_v39  ;;  %v1442_v59 = vadd.f32 %v2586_v30, %v1150_v0  ;;  %v1387_v53 = vpop.f32.mrb[43].mxu1  ;;  %1957 = vst.msk [vmem:[#allocation2 + $0xb8] sm:$0xff] %vm458_vm2, %v1925_v5  ;;  %v2107_v39 = vmul.f32 (!%p2463_p6), %v1972_v60, %v1972_v60  ;;  %v3605_v36 = vld [vmem:[#allocation2 + $0x38] sm:$0xff] (!%p2463_p6)  ;;  %v3607_v27 = vld [vmem:[#allocation2 + $0x40] sm:$0xff] (!%p2463_p6)  ;;  %v2137_v1 = vsel (!%p2463_p6), %vm458_vm2, %v2105_v3, 0.0  ;;  %v2108_v0 = vmul.f32 (!%p2463_p6), %v1973_v20, %v1973_v20 }
 0x15a   : > { %1471 = vst.msk [vmem:[#allocation2 + $0xc0] sm:$0xff] %vm458_vm2, %v1439_v48  ;;  %v1440_v12 = vadd.f32 %v1387_v53, %v1148_v56  ;;  %1955 = vst.msk [vmem:[#allocation2 + $0xa8] sm:$0xff] %vm458_vm2, %v1923_v29  ;;  %v2138_v57 = vsel (!%p2463_p6), %vm458_vm2, %v2106_v62, 0.0  ;;  %v2039_v48 = vsel (!%p2463_p6), %vm458_vm2, %v1973_v20, 0.0  ;;  %v3626_v30 = vld [vmem:[#allocation2 + $0x48] sm:$0xff] (!%p2463_p6)  ;;  %v3628_v5 = vld [vmem:[#allocation2 + $0x50] sm:$0xff] (!%p2463_p6)  ;;  %v2038_v56 = vadd.f32 (!%p2463_p6), %v2037_v14, %v2036_v46 }
 0x15b   : > { %1474 = vst.msk [vmem:[#allocation2 + $0xd8] sm:$0xff] %vm458_vm2, %v1442_v59  ;;  %2006 = vst.msk [vmem:[%s3989_s2 + $0x20] sm:$0xff] (!%p2463_p6), %vm458_vm2, %v1974_v42  ;;  %v3630_v25 = vld [vmem:[#allocation2 + $0x58] sm:$0xff] (!%p2463_p6)  ;;  %v2139_v59 = vadd.f32 (!%p2463_p6), %v2138_v57, %v2137_v1  ;;  %v2140_v53 = vsel (!%p2463_p6), %vm458_vm2, %v2107_v39, 0.0  ;;  %v2109_v29 = vmul.f32 (!%p2463_p6), %v1974_v42, %v1974_v42  ;;  %v2113_v11 = vmul.f32 (!%p2463_p6), %v3607_v27, %v3607_v27 }
 0x15c   : > { %1472 = vst.msk [vmem:[#allocation2 + $0xc8] sm:$0xff] %vm458_vm2, %v1440_v12  ;;  %2007 = vst.msk [vmem:[%s3989_s2 + $0x28] sm:$0xff] (!%p2463_p6), %vm458_vm2, %v1975_v35  ;;  %v3648_v12 = vld [vmem:[#allocation2 + $0x60] sm:$0xff] (!%p2463_p6)  ;;  %v2049_v3 = vsel (!%p2463_p6), %vm458_vm2, %v3607_v27, 0.0  ;;  %v2114_v6 = vmul.f32 (!%p2463_p6), %v3626_v30, %v3626_v30  ;;  %v2115_v46 = vmul.f32 (!%p2463_p6), %v3628_v5, %v3628_v5 }
 0x15d   : > { %2008 = vst.msk [vmem:[%s3989_s2 + $0x30] sm:$0xff] (!%p2463_p6), %vm458_vm2, %v1976_v49  ;;  %2009 = vst.msk [vmem:[%s3989_s2 + $0x38] sm:$0xff] (!%p2463_p6), %vm458_vm2, %v3605_v36 }
 0x15e   : > { %2010 = vst.msk [vmem:[%s3989_s2 + $0x40] sm:$0xff] (!%p2463_p6), %vm458_vm2, %v3607_v27  ;;  %2011 = vst.msk [vmem:[%s3989_s2 + $0x48] sm:$0xff] (!%p2463_p6), %vm458_vm2, %v3626_v30  ;;  %v2116_v27 = vmul.f32 (!%p2463_p6), %v3630_v25, %v3630_v25 }
 0x15f   : > { %2012 = vst.msk [vmem:[%s3989_s2 + $0x50] sm:$0xff] (!%p2463_p6), %vm458_vm2, %v3628_v5  ;;  %2013 = vst.msk [vmem:[%s3989_s2 + $0x58] sm:$0xff] (!%p2463_p6), %vm458_vm2, %v3630_v25 }
 0x160   : > { %v2619_v52 = vpop.f32.mrb[40].mxu0  ;;  %v1636_v31 = vld [vmem:[#allocation2 + $0xd0] sm:$0xff]  ;;  %2014 = vst.msk [vmem:[%s3989_s2 + $0x60] sm:$0xff] (!%p2463_p6), %vm458_vm2, %v3648_v12 }
 0x161   : > { %v2589_v45 = vpop.f32.mrb[44].mxu1  ;;  %v1871_v51 = vpop.f32.mrb[41].mxu0  ;;  %v1928_v61 = vadd.f32 %v2619_v52, %v1636_v31  ;;  %v1634_v43 = vld [vmem:[#allocation2 + $0xc0] sm:$0xff]  ;;  %v3650_v52 = vld [vmem:[#allocation2 + $0x68] sm:$0xff] (!%p2463_p6)  ;;  %v2041_v31 = vsel (!%p2463_p6), %vm458_vm2, %v1974_v42, 0.0  ;;  %v2152_v42 = vsel (!%p2463_p6), %vm458_vm2, %v2113_v11, 0.0 }
 0x162   : > { %v1445_v15 = vadd.f32 %v2589_v45, %v1153_v63  ;;  %v1400_v54 = vpop.f32.mrb[45].mxu1  ;;  %v2620_v38 = vpop.f32.mrb[42].mxu0  ;;  %v1926_v40 = vadd.f32 %v1871_v51, %v1634_v43  ;;  %v1637_v9 = vld [vmem:[#allocation2 + $0xd8] sm:$0xff]  ;;  %v3652_v63 = vld [vmem:[#allocation2 + $0x70] sm:$0xff] (!%p2463_p6)  ;;  %v2142_v45 = vsel (!%p2463_p6), %vm458_vm2, %v2108_v0, 0.0  ;;  %v2110_v51 = vmul.f32 (!%p2463_p6), %v1975_v35, %v1975_v35  ;;  %2015 = vst.msk [vmem:[%s3989_s2 + $0x68] sm:$0xff] (!%p2463_p6), %vm458_vm2, %v3650_v52 }
 0x163   : > { %v1443_v7 = vadd.f32 %v1400_v54, %v1151_v47  ;;  %v2590_v13 = vpop.f32.mrb[46].mxu1  ;;  %v1874_v37 = vpop.f32.mrb[43].mxu0  ;;  %1960 = vst.msk [vmem:[#allocation2 + $0xd0] sm:$0xff] %vm458_vm2, %v1928_v61  ;;  %v1929_v34 = vadd.f32 %v2620_v38, %v1637_v9  ;;  %v1635_v21 = vld [vmem:[#allocation2 + $0xc8] sm:$0xff]  ;;  %2016 = vst.msk [vmem:[%s3989_s2 + $0x70] sm:$0xff] (!%p2463_p6), %vm458_vm2, %v3652_v63  ;;  %v3673_v61 = vld [vmem:[#allocation2 + $0x80] sm:$0xff] (!%p2463_p6)  ;;  %v2141_v54 = vadd.f32 (!%p2463_p6), %v2140_v53, %v2139_v59 }
 0x164   : > { %1477 = vst.msk [vmem:[#allocation2 + $0xf0] sm:$0xff] %vm458_vm2, %v1445_v15  ;;  %v1446_v18 = vadd.f32 %v2590_v13, %v1154_v28  ;;  %v1403_v26 = vpop.f32.mrb[47].mxu1  ;;  %1958 = vst.msk [vmem:[#allocation2 + $0xc0] sm:$0xff] %vm458_vm2, %v1926_v40  ;;  %v1927_v58 = vadd.f32 %v1874_v37, %v1635_v21  ;;  %v3671_v15 = vld [vmem:[#allocation2 + $0x78] sm:$0xff] (!%p2463_p6)  ;;  %v3675_v47 = vld [vmem:[#allocation2 + $0x88] sm:$0xff] (!%p2463_p6)  ;;  %v2040_v43 = vadd.f32 (!%p2463_p6), %v2039_v48, %v2038_v56  ;;  %v2144_v28 = vsel (!%p2463_p6), %vm458_vm2, %v2109_v29, 0.0 }
 0x165   : > { %1475 = vst.msk [vmem:[#allocation2 + $0xe0] sm:$0xff] %vm458_vm2, %v1443_v7  ;;  %v1444_v8 = vadd.f32 %v1403_v26, %v1152_v23  ;;  %1961 = vst.msk [vmem:[#allocation2 + $0xd8] sm:$0xff] %vm458_vm2, %v1929_v34  ;;  %v3692_v38 = vld [vmem:[#allocation2 + $0x90] sm:$0xff] (!%p2463_p6)  ;;  %v3694_v7 = vld [vmem:[#allocation2 + $0x98] sm:$0xff] (!%p2463_p6)  ;;  %v2043_v13 = vsel (!%p2463_p6), %vm458_vm2, %v1975_v35, 0.0  ;;  %v2111_v9 = vmul.f32 (!%p2463_p6), %v1976_v49, %v1976_v49  ;;  %v2143_v23 = vadd.f32 (!%p2463_p6), %v2142_v45, %v2141_v54 }
 0x166   : > { %1478 = vst.msk [vmem:[#allocation2 + $0xf8] sm:$0xff] %vm458_vm2, %v1446_v18  ;;  %1959 = vst.msk [vmem:[#allocation2 + $0xc8] sm:$0xff] %vm458_vm2, %v1927_v58  ;;  %v3696_v40 = vld [vmem:[#allocation2 + $0xa0] sm:$0xff] (!%p2463_p6)  ;;  %v3715_v37 = vld [vmem:[#allocation2 + $0xa8] sm:$0xff] (!%p2463_p6)  ;;  %v2042_v26 = vadd.f32 (!%p2463_p6), %v2041_v31, %v2040_v43  ;;  %v2051_v35 = vsel (!%p2463_p6), %vm458_vm2, %v3626_v30, 0.0  ;;  %v2156_v48 = vsel (!%p2463_p6), %vm458_vm2, %v2115_v46, 0.0  ;;  %v2117_v30 = vmul.f32 (!%p2463_p6), %v3648_v12, %v3648_v12 }
 0x167   : > { %1476 = vst.msk [vmem:[#allocation2 + $0xe8] sm:$0xff] %vm458_vm2, %v1444_v8  ;;  %2017 = vst.msk [vmem:[%s3989_s2 + $0x78] sm:$0xff] (!%p2463_p6), %vm458_vm2, %v3671_v15  ;;  %v3717_v18 = vld [vmem:[#allocation2 + $0xb0] sm:$0xff] (!%p2463_p6)  ;;  %v3719_v34 = vld [vmem:[#allocation2 + $0xb8] sm:$0xff] (!%p2463_p6)  ;;  %v2055_v0 = vsel (!%p2463_p6), %vm458_vm2, %v3630_v25, 0.0  ;;  %v2158_v53 = vsel (!%p2463_p6), %vm458_vm2, %v2116_v27, 0.0  ;;  %v2118_v29 = vmul.f32 (!%p2463_p6), %v3650_v52, %v3650_v52  ;;  %v2119_v54 = vmul.f32 (!%p2463_p6), %v3652_v63, %v3652_v63 }
 0x168   : > { %v2623_v41 = vpop.f32.mrb[44].mxu0  ;;  %2018 = vst.msk [vmem:[%s3989_s2 + $0x80] sm:$0xff] (!%p2463_p6), %vm458_vm2, %v3673_v61  ;;  %2019 = vst.msk [vmem:[%s3989_s2 + $0x88] sm:$0xff] (!%p2463_p6), %vm458_vm2, %v3675_v47  ;;  %v2059_v25 = vsel (!%p2463_p6), %vm458_vm2, %v3650_v52, 0.0  ;;  %v2063_v52 = vsel (!%p2463_p6), %vm458_vm2, %v3671_v15, 0.0  ;;  %v2125_v46 = vmul.f32 (!%p2463_p6), %v3696_v40, %v3696_v40 }
 0x169   : > { %v1887_v19 = vpop.f32.mrb[45].mxu0  ;;  %2020 = vst.msk [vmem:[%s3989_s2 + $0x90] sm:$0xff] (!%p2463_p6), %vm458_vm2, %v3692_v38  ;;  %2021 = vst.msk [vmem:[%s3989_s2 + $0x98] sm:$0xff] (!%p2463_p6), %vm458_vm2, %v3694_v7 }
 0x16a   : > { %v2624_v17 = vpop.f32.mrb[46].mxu0  ;;  %2022 = vst.msk [vmem:[%s3989_s2 + $0xa0] sm:$0xff] (!%p2463_p6), %vm458_vm2, %v3696_v40  ;;  %2023 = vst.msk [vmem:[%s3989_s2 + $0xa8] sm:$0xff] (!%p2463_p6), %vm458_vm2, %v3715_v37  ;;  %v3740_v58 = vld [vmem:[#allocation2 + $0xd0] sm:$0xff] (!%p2463_p6) }
 0x16b   : > { %v1640_v32 = vld [vmem:[#allocation2 + $0xf0] sm:$0xff]  ;;  %v1890_v4 = vpop.f32.mrb[47].mxu0  ;;  %1969 = sbr.rel (%p2463_p6) target bundleno = 434 (0x1b2), region = 36  ;;  %2024 = vst.msk [vmem:[%s3989_s2 + $0xb0] sm:$0xff] (!%p2463_p6), %vm458_vm2, %v3717_v18  ;;  %2025 = vst.msk [vmem:[%s3989_s2 + $0xb8] sm:$0xff] (!%p2463_p6), %vm458_vm2, %v3719_v34  ;;  %v3736_v21 = vld [vmem:[#allocation2 + $0xc0] sm:$0xff] (!%p2463_p6) }
 0x16c   : > { %v1932_v16 = vadd.f32 %v2623_v41, %v1640_v32  ;;  %v1638_v2 = vld [vmem:[#allocation2 + $0xe0] sm:$0xff]  ;;  %v2146_v41 = vsel (!%p2463_p6), %vm458_vm2, %v2110_v51, 0.0  ;;  %2026 = vst.msk [vmem:[%s3989_s2 + $0xc0] sm:$0xff] (!%p2463_p6), %vm458_vm2, %v3736_v21  ;;  %2028 = vst.msk [vmem:[%s3989_s2 + $0xd0] sm:$0xff] (!%p2463_p6), %vm458_vm2, %v3740_v58  ;;  %v3761_v32 = vld [vmem:[#allocation2 + $0xd8] sm:$0xff] (!%p2463_p6)  ;;  %v2160_v51 = vsel (!%p2463_p6), %vm458_vm2, %v2117_v30, 0.0 }
 0x16d   : > { %v1930_v10 = vadd.f32 %v1887_v19, %v1638_v2  ;;  %v1641_v22 = vld [vmem:[#allocation2 + $0xf8] sm:$0xff]  ;;  %v3738_v8 = vld [vmem:[#allocation2 + $0xc8] sm:$0xff] (!%p2463_p6)  ;;  %v2045_v19 = vsel (!%p2463_p6), %vm458_vm2, %v1976_v49, 0.0  ;;  %v2145_v2 = vadd.f32 (!%p2463_p6), %v2144_v28, %v2143_v23  ;;  %2029 = vst.msk [vmem:[%s3989_s2 + $0xd8] sm:$0xff] (!%p2463_p6), %vm458_vm2, %v3761_v32  ;;  %v2154_v49 = vsel (!%p2463_p6), %vm458_vm2, %v2114_v6, 0.0 }
 0x16e   : > { %1964 = vst.msk [vmem:[#allocation2 + $0xf0] sm:$0xff] %vm458_vm2, %v1932_v16  ;;  %v1933_v33 = vadd.f32 %v2624_v17, %v1641_v22  ;;  %v1639_v50 = vld [vmem:[#allocation2 + $0xe8] sm:$0xff]  ;;  %v2112_v17 = vmul.f32 (!%p2463_p6), %v3605_v36, %v3605_v36  ;;  %2027 = vst.msk [vmem:[%s3989_s2 + $0xc8] sm:$0xff] (!%p2463_p6), %vm458_vm2, %v3738_v8 }
 0x16f   : > { %1962 = vst.msk [vmem:[#allocation2 + $0xe0] sm:$0xff] %vm458_vm2, %v1930_v10  ;;  %v1931_v55 = vadd.f32 %v1890_v4, %v1639_v50  ;;  %v2044_v10 = vadd.f32 (!%p2463_p6), %v2043_v13, %v2042_v26  ;;  %v2148_v50 = vsel (!%p2463_p6), %vm458_vm2, %v2111_v9, 0.0  ;;  %v2147_v24 = vadd.f32 (!%p2463_p6), %v2146_v41, %v2145_v2 }
 0x170   : > { %1965 = vst.msk [vmem:[#allocation2 + $0xf8] sm:$0xff] %vm458_vm2, %v1933_v33  ;;  %v2150_v44 = vsel (!%p2463_p6), %vm458_vm2, %v2112_v17, 0.0  ;;  %v2162_v13 = vsel (!%p2463_p6), %vm458_vm2, %v2118_v29, 0.0  ;;  %v2120_v9 = vmul.f32 (!%p2463_p6), %v3671_v15, %v3671_v15  ;;  %v2164_v41 = vsel (!%p2463_p6), %vm458_vm2, %v2119_v54, 0.0 }
 0x171   : > { %1963 = vst.msk [vmem:[#allocation2 + $0xe8] sm:$0xff] %vm458_vm2, %v1931_v55  ;;  %v2047_v55 = vsel (!%p2463_p6), %vm458_vm2, %v3605_v36, 0.0  ;;  %v2046_v60 = vadd.f32 (!%p2463_p6), %v2045_v19, %v2044_v10  ;;  %v2149_v62 = vadd.f32 (!%p2463_p6), %v2148_v50, %v2147_v24  ;;  %v2053_v36 = vsel (!%p2463_p6), %vm458_vm2, %v3628_v5, 0.0 }
 0x172   : > { %v2057_v5 = vsel %vm458_vm2, %v3648_v12, 0.0  ;;  %v2061_v12 = vsel %vm458_vm2, %v3652_v63, 0.0  ;;  %v2121_v19 = vmul.f32 %v3673_v61, %v3673_v61  ;;  %v2166_v10 = vsel %vm458_vm2, %v2120_v9, 0.0 }
 0x173   : > { %v2048_v20 = vadd.f32 %v2047_v55, %v2046_v60  ;;  %v2151_v14 = vadd.f32 %v2150_v44, %v2149_v62  ;;  %v2065_v63 = vsel %vm458_vm2, %v3673_v61, 0.0  ;;  %v2122_v50 = vmul.f32 %v3675_v47, %v3675_v47 }
 0x174   : > { %v2168_v24 = vsel %vm458_vm2, %v2121_v19, 0.0  ;;  %v2067_v15 = vsel %vm458_vm2, %v3675_v47, 0.0  ;;  %v2123_v60 = vmul.f32 %v3692_v38, %v3692_v38  ;;  %v2069_v61 = vsel %vm458_vm2, %v3692_v38, 0.0 }
 0x175   : > { %v3782_v22 = vld [vmem:[#allocation2 + $0xf0] sm:$0xff]  ;;  %v2050_v39 = vadd.f32 %v2049_v3, %v2048_v20  ;;  %v2153_v1 = vadd.f32 %v2152_v42, %v2151_v14  ;;  %v2170_v6 = vsel %vm458_vm2, %v2122_v50, 0.0  ;;  %v2124_v62 = vmul.f32 %v3694_v7, %v3694_v7 }
 0x176   : > { %v3763_v4 = vld [vmem:[#allocation2 + $0xe0] sm:$0xff]  ;;  %2032 = vst.msk [vmem:[%s3989_s2 + $0xf0] sm:$0xff] %vm458_vm2, %v3782_v22  ;;  %v2071_v47 = vsel %vm458_vm2, %v3694_v7, 0.0  ;;  %v2073_v38 = vsel %vm458_vm2, %v3696_v40, 0.0  ;;  %v2075_v7 = vsel %vm458_vm2, %v3715_v37, 0.0  ;;  %v2077_v40 = vsel %vm458_vm2, %v3717_v18, 0.0 }
 0x177   : > { %2030 = vst.msk [vmem:[%s3989_s2 + $0xe0] sm:$0xff] %vm458_vm2, %v3763_v4  ;;  %v3784_v33 = vld [vmem:[#allocation2 + $0xf8] sm:$0xff]  ;;  %v2052_v57 = vadd.f32 %v2051_v35, %v2050_v39  ;;  %v2155_v59 = vadd.f32 %v2154_v49, %v2153_v1  ;;  %v2172_v35 = vsel %vm458_vm2, %v2123_v60, 0.0  ;;  %v2174_v49 = vsel %vm458_vm2, %v2124_v62, 0.0 }
 0x178   : > { %v3765_v16 = vld [vmem:[#allocation2 + $0xe8] sm:$0xff]  ;;  %2033 = vst.msk [vmem:[%s3989_s2 + $0xf8] sm:$0xff] %vm458_vm2, %v3784_v33  ;;  %v2130_v54 = vmul.f32 %v3738_v8, %v3738_v8  ;;  %v2135_v60 = vmul.f32 %v3782_v22, %v3782_v22 }
 0x179   : > { %2031 = vst.msk [vmem:[%s3989_s2 + $0xe8] sm:$0xff] %vm458_vm2, %v3765_v16  ;;  %v2054_v56 = vadd.f32 %v2053_v36, %v2052_v57  ;;  %v2157_v45 = vadd.f32 %v2156_v48, %v2155_v59  ;;  %v2126_v36 = vmul.f32 %v3715_v37, %v3715_v37  ;;  %v2176_v57 = vsel %vm458_vm2, %v2125_v46, 0.0 }
 0x17a   : > { %v2127_v48 = vmul.f32 %v3717_v18, %v3717_v18  ;;  %v2079_v37 = vsel %vm458_vm2, %v3719_v34, 0.0  ;;  %v2081_v18 = vsel %vm458_vm2, %v3736_v21, 0.0 }
 0x17b   : > { %v2056_v31 = vadd.f32 %v2055_v0, %v2054_v56  ;;  %v2159_v43 = vadd.f32 %v2158_v53, %v2157_v45  ;;  %v2178_v59 = vsel %vm458_vm2, %v2126_v36, 0.0  ;;  %v2128_v56 = vmul.f32 %v3719_v34, %v3719_v34 }
 0x17c   : > { %v2180_v29 = vsel %vm458_vm2, %v2127_v48, 0.0  ;;  %v2129_v45 = vmul.f32 %v3736_v21, %v3736_v21  ;;  %v2083_v34 = vsel %vm458_vm2, %v3738_v8, 0.0  ;;  %v2085_v21 = vsel %vm458_vm2, %v3740_v58, 0.0 }
 0x17d   : > { %v2058_v28 = vadd.f32 %v2057_v5, %v2056_v31  ;;  %v2161_v23 = vadd.f32 %v2160_v51, %v2159_v43  ;;  %v2087_v8 = vsel %vm458_vm2, %v3761_v32, 0.0 }
 0x17f   : > { %v2060_v26 = vadd.f32 %v2059_v25, %v2058_v28  ;;  %v2163_v17 = vadd.f32 %v2162_v13, %v2161_v23  ;;  %v2182_v25 = vsel %vm458_vm2, %v2128_v56, 0.0  ;;  %v2184_v13 = vsel %vm458_vm2, %v2129_v45, 0.0 }
 0x181   : > { %v2062_v2 = vadd.f32 %v2061_v12, %v2060_v26  ;;  %v2165_v55 = vadd.f32 %v2164_v41, %v2163_v17  ;;  %v2131_v12 = vmul.f32 %v3740_v58, %v3740_v58  ;;  %v2186_v26 = vsel %vm458_vm2, %v2130_v54, 0.0 }
 0x182   : > { %v2132_v41 = vmul.f32 %v3761_v32, %v3761_v32  ;;  %v2089_v58 = vsel %vm458_vm2, %v3763_v4, 0.0  ;;  %v2091_v32 = vsel %vm458_vm2, %v3765_v16, 0.0 }
 0x183   : > { %v2064_v11 = vadd.f32 %v2063_v52, %v2062_v2  ;;  %v2167_v44 = vadd.f32 %v2166_v10, %v2165_v55  ;;  %v2188_v17 = vsel %vm458_vm2, %v2131_v12, 0.0  ;;  %v2133_v2 = vmul.f32 %v3763_v4, %v3763_v4 }
 0x184   : > { %v2190_v50 = vsel %vm458_vm2, %v2132_v41, 0.0  ;;  %v2134_v55 = vmul.f32 %v3765_v16, %v3765_v16  ;;  %v2093_v4 = vsel %vm458_vm2, %v3782_v22, 0.0  ;;  %v2095_v16 = vsel %vm458_vm2, %v3784_v33, 0.0 }
 0x185   : > { %v2066_v3 = vadd.f32 %v2065_v63, %v2064_v11  ;;  %v2169_v20 = vadd.f32 %v2168_v24, %v2167_v44 }
 0x187   : > { %v2068_v42 = vadd.f32 %v2067_v15, %v2066_v3  ;;  %v2171_v14 = vadd.f32 %v2170_v6, %v2169_v20  ;;  %v2192_v15 = vsel %vm458_vm2, %v2133_v2, 0.0  ;;  %v2194_v6 = vsel %vm458_vm2, %v2134_v55, 0.0 }
 0x189   : > { %v2070_v39 = vadd.f32 %v2069_v61, %v2068_v42  ;;  %v2173_v27 = vadd.f32 %v2172_v35, %v2171_v14  ;;  %v2136_v61 = vmul.f32 %v3784_v33, %v3784_v33  ;;  %v2196_v42 = vsel %vm458_vm2, %v2135_v60, 0.0 }
 0x18b   : > { %v2072_v1 = vadd.f32 %v2071_v47, %v2070_v39  ;;  %v2175_v0 = vadd.f32 %v2174_v49, %v2173_v27  ;;  %v2198_v46 = vsel %vm458_vm2, %v2136_v61, 0.0 }
 0x18d   : > { %v2074_v30 = vadd.f32 %v2073_v38, %v2072_v1  ;;  %v2177_v53 = vadd.f32 %v2176_v57, %v2175_v0 }
 0x18f   : > { %v2076_v5 = vadd.f32 %v2075_v7, %v2074_v30  ;;  %v2179_v31 = vadd.f32 %v2178_v59, %v2177_v53 }
 0x191   : > { %v2078_v51 = vadd.f32 %v2077_v40, %v2076_v5  ;;  %v2181_v43 = vadd.f32 %v2180_v29, %v2179_v31 }
 0x193   : > { %v2080_v28 = vadd.f32 %v2079_v37, %v2078_v51  ;;  %v2183_v9 = vadd.f32 %v2182_v25, %v2181_v43 }
 0x195   : > { %v2082_v23 = vadd.f32 %v2081_v18, %v2080_v28  ;;  %v2185_v52 = vadd.f32 %v2184_v13, %v2183_v9 }
 0x197   : > { %v2084_v19 = vadd.f32 %v2083_v34, %v2082_v23  ;;  %v2187_v10 = vadd.f32 %v2186_v26, %v2185_v52 }
 0x199   : > { %v2086_v63 = vadd.f32 %v2085_v21, %v2084_v19  ;;  %v2189_v11 = vadd.f32 %v2188_v17, %v2187_v10 }
 0x19b   : > { %v2088_v24 = vadd.f32 %v2087_v8, %v2086_v63  ;;  %v2191_v44 = vadd.f32 %v2190_v50, %v2189_v11 }
 0x19d   : > { %v2090_v3 = vadd.f32 %v2089_v58, %v2088_v24  ;;  %v2193_v62 = vadd.f32 %v2192_v15, %v2191_v44 }
 0x19f   : > { %v2092_v20 = vadd.f32 %v2091_v32, %v2090_v3  ;;  %v2195_v35 = vadd.f32 %v2194_v6, %v2193_v62 }
 0x1a1   : > { %v2094_v47 = vadd.f32 %v2093_v4, %v2092_v20  ;;  %v2197_v14 = vadd.f32 %v2196_v42, %v2195_v35 }
 0x1a3   : > { %v2096_v39 = vadd.f32 %v2095_v16, %v2094_v47  ;;  %v2199_v38 = vadd.f32 %v2198_v46, %v2197_v14 }
 0x1a5   : > { %v2097_v49 = vrot.slane %v2096_v39, 4  ;;  %v2200_v22 = vrot.slane %v2199_v38, 4 }
 0x1a7   : > { %v2098_v36 = vadd.f32 %v2097_v49, %v2096_v39  ;;  %v2201_v1 = vadd.f32 %v2200_v22, %v2199_v38 }
 0x1a9   : > { %v2099_v27 = vrot.slane %v2098_v36, 2  ;;  %v2202_v7 = vrot.slane %v2201_v1, 2 }
 0x1ab   : > { %v2100_v57 = vadd.f32 %v2099_v27, %v2098_v36  ;;  %v2203_v0 = vadd.f32 %v2202_v7, %v2201_v1 }
 0x1ad   : > { %v2101_v48 = vrot.slane %v2100_v57, 1  ;;  %v2204_v59 = vrot.slane %v2203_v0, 1 }
 0x1af   : > { %v2102_v30 = vadd.f32 %v2101_v48, %v2100_v57  ;;  %v2205_v33 = vadd.f32 %v2204_v59, %v2203_v0 }
 0x1b1   : > { %2104 = vst.msk [vmem:[#allocation3] sm:$0x1] %vm2103_vm9, %v2102_v30  ;;  %2206 = vst.msk [vmem:[#allocation5] sm:$0x1] %vm2103_vm9, %v2205_v33 }
 0x1b2 PF: > { %p3922_p7 = scmp.eq.s32.totalorder %s2344_s18, 2  ;;  %s2773_s28 = smov [#allocation3]  }
 0x1b3   : > { %s2225_s29 = sshll.u32 %s2773_s28, 4  ;;  %s2774_s30 = smov [#allocation5]   ;;  %s2226_s29 = int_to_ptr.vmem [resolvable:$true] %s2225_s29 }
 0x1b4   : > { %s2238_s5 = sshll.u32 %s2774_s30, 4  ;;  %s2688_s6 = scalar_lea.vmem %s2226_s29, 16  ;;  %s3926_s5 = int_to_ptr.vmem [resolvable:$true] %s2238_s5 }
 0x1b5   : > { %p2689_p8 = scmp.ne.s32.totalorder %s2226_s29, %s2688_s6  ;;  %s2694_s7 = scalar_lea.vmem %s2226_s29, 32 }
 0x1b6   : > { %p2695_p11 = scmp.lt.s32.totalorder %s2226_s29, %s2226_s29  ;;  %p2696_p12 = scmp.lt.s32.totalorder %s2694_s7, %s2688_s6 }
 0x1b7   : > { %p2690_p9 = pnand %p2689_p8, %p3922_p7 }
 0x1b8   : > { %p2697_p13 = por %p2696_p12, %p2695_p11 }
 0x1b9   : > { %p2691_p10 = pneg %p2690_p9 }
 0x1bb   : > { %p2698_p0 = pnand %p2697_p13, %p2691_p10 }
 0x1bd   : > { %2701 = shalt.err (!%p2698_p0)
}
 0x1be   : > { %s2702_s9 = scalar_lea.hbm %s3990_s3, 16 }
 0x1bf   : > { %p2703_p1 = scmp.ne.s32.totalorder %s3990_s3, %s2702_s9  ;;  %p2708_p4 = scmp.lt.u32.totalorder %s2702_s9, %s3990_s3 }
 0x1c1   : > { %p2704_p2 = pnand %p2703_p1, %p3922_p7 }
 0x1c3   : > { %p2705_p3 = pneg %p2704_p2 }
 0x1c5   : > { %p2710_p5 = pnand %p2708_p4, %p2705_p3 }
 0x1c7   : > { %2713 = shalt.err (!%p2710_p5)
}
 0x1c8   : > { %2634 = dma.vmem_to_hbm [thread:$0]  (%p3922_p7), %s2226_s29, 16, %s3990_s3, [#allocation4]  }
 0x1c9   : > { %s2714_s20 = scalar_lea.vmem %s3926_s5, 16  ;;  %s2720_s21 = scalar_lea.vmem %s3926_s5, 32 }
 0x1ca   : > { %p2715_p6 = scmp.ne.s32.totalorder %s3926_s5, %s2714_s20  ;;  %p2721_p10 = scmp.lt.s32.totalorder %s3926_s5, %s3926_s5 }
 0x1cb   : > { %p2722_p11 = scmp.lt.s32.totalorder %s2720_s21, %s2714_s20 }
 0x1cc   : > { %p2716_p8 = pnand %p2715_p6, %p3922_p7 }
 0x1cd   : > { %p2723_p12 = por %p2722_p11, %p2721_p10 }
 0x1ce   : > { %p2717_p9 = pneg %p2716_p8 }
 0x1d0   : > { %p2724_p13 = pnand %p2723_p12, %p2717_p9 }
 0x1d2   : > { %2727 = shalt.err (!%p2724_p13)
}
 0x1d3   : > { %s2728_s24 = scalar_lea.hbm %s3991_s4, 16 }
 0x1d4   : > { %p2729_p0 = scmp.ne.s32.totalorder %s3991_s4, %s2728_s24  ;;  %p2734_p3 = scmp.lt.u32.totalorder %s2728_s24, %s3991_s4 }
 0x1d6   : > { %p2730_p1 = pnand %p2729_p0, %p3922_p7 }
 0x1d8   : > { %p2731_p2 = pneg %p2730_p1 }
 0x1da   : > { %p2736_p4 = pnand %p2734_p3, %p2731_p2 }
 0x1dc   : > { %2739 = shalt.err (!%p2736_p4)
}
 0x1dd   : > { %2636 = dma.vmem_to_hbm [thread:$0]  (%p3922_p7), %s3926_s5, 16, %s3991_s4, [#allocation6]  }
 0x1de   : > { %2753 = dma.done.wait (%p3922_p7), [#allocation4], 16  }
 0x1df   : > { %2755 = vsyncadd (%p3922_p7), [#allocation4], 4294967280 }
 0x1e0   : > { %2757 = dma.done.wait (%p3922_p7), [#allocation6], 16  }
 0x1e1   : > { %2759 = vsyncadd (%p3922_p7), [#allocation6], 4294967280 }
 0x1e2 PF: > { %s17_s17 = sadd.s32 1, %s2770_s17   ;;  %s4046_s15 = smov %s2766_s16 }
 0x1e3   : > { %p14_p5 = scmp.ge.s32.totalorder %s17_s17, 5   ;;  %s4047_s16 = smov %s4049_s19 }
 0x1e5   :  { %16 = sbr.rel (!%p14_p5) target bundleno = 3 (0x3), region = 88 }
 0x1ec   :  { %2263 = vsyncpa [#allocation4], 1 }
 0x1ed   :  { %2265 = vsyncpa [#allocation4 + $0x1], 1 }
 0x1ee   :  { %2266 = vsyncpa [#allocation6], 1 }

// kernel: squeeze.3
= control target key start
LH: loop header
LB: loop body
LE: loop exit
PB: predicated region body
PF: predicated region fallthrough
CT: control target
= control target key end

     0   :  { %s85_s0 = inlined_call_operand.vmem [shape: f32[4], index: 0, kind: input, shape index: {}]   ;;  %s86_s1 = inlined_call_operand.hbm [shape: f32[2,2], index: 1, kind: output, shape index: {}]  }
   0x1   :  { %v5_v0 = vld [vmem:[%s85_s0] sm:$0x1] }
   0x2   :  { %2 = vsyncpa [#allocation1], 0  ;;  %6 = vst [vmem:[#allocation3] sm:$0x1] %v5_v0  ;;  %vm8_vm0 = vcmask 15360   ;;  %s58_s0 = smov 126  }
   0x3   :  { %s59_s8 = smov [#allocation0]  }
   0x4   :  { %s26_s9 = sshll.u32 %s59_s8, 4  ;;  %s27_s9 = int_to_ptr.vmem [resolvable:$true] %s26_s9 }
   0x5   :  { %s34_s10 = scalar_lea.vmem %s27_s9, 32  ;;  %p39_p1 = scmp.lt.s32.totalorder %s27_s9, %s27_s9 }
   0x6   :  { %p35_p0 = scmp.ne.s32.totalorder %s27_s9, %s34_s10  ;;  %p40_p2 = scmp.lt.s32.totalorder %s34_s10, %s34_s10 }
   0x8   :  { %p41_p3 = por %p40_p2, %p39_p1 }
   0x9   :  { %v10_v1 = vld [vmem:[#allocation3] sm:$0x1]  }
   0xa   :  { %v7_v2 = vld [vmem:[#allocation3] sm:$0x1]   ;;  %11 = vrot.lane.b32.xlu0 %v10_v1, %s58_s0  ;;  %p42_p4 = pnand %p41_p3, %p35_p0 }
   0xb   :  { %9 = vst.msk [vmem:[#allocation2] sm:$0x1] %vm8_vm0, %v7_v2  }
  0x7c   :  { %v12_v3 = vpop.permute.xlu0 %11  }
  0x7d   :  { %15 = vst.msk [vmem:[#allocation2 + $0x1] sm:$0x1] %vm8_vm0, %v12_v3  }
  0x84   :  { %v19_v4 = vld [vmem:[#allocation2] sm:$0x3] }
  0x85   :  { %21 = vst [vmem:[#allocation0] sm:$0x3] %v19_v4 }
  0x86   :  { %45 = shalt.err (!%p42_p4)
}
  0x87   :  { %s46_s13 = scalar_lea.hbm %s86_s1, 32 }
  0x88   :  { %p47_p5 = scmp.ne.s32.totalorder %s86_s1, %s46_s13  ;;  %p50_p6 = scmp.lt.u32.totalorder %s46_s13, %s86_s1 }
  0x8a   :  { %p52_p7 = pnand %p50_p6, %p47_p5 }
  0x8c   :  { %55 = shalt.err (!%p52_p7)
}
  0x8d   :  { %29 = dma.vmem_to_hbm [thread:$0]  %s27_s9, 32, %s86_s1, [#allocation1]  }
  0x8e   :  { %56 = dma.done.wait [#allocation1], 32  }
  0x8f   :  { %57 = vsyncadd [#allocation1], 4294967264 }
  0x90   :  { %31 = vsyncpa [#allocation1], 1 }

</bundles_post_ra>
